<compile_context>
chip_gen: v5e
topology: v5e:2x2
jax: 0.10.0
libtpu: 0.0.40
codegen_flags: <defaults>
</compile_context>

<pallas_src>
import math
import jax
import jax.numpy as jnp
from jax.experimental import pallas as pl
from jax.experimental.pallas import tpu as pltpu

LEAKY_SLOPE = 0.2
BN_EPS = 1e-5
HIDDEN = (128, 256, 512, 1024)


def _leaky_relu(x):
    return jnp.where(x > 0, x, LEAKY_SLOPE * x)


def _batchnorm_train(x, gamma, beta):
    # x: (B, F) f32, gamma/beta: (1, F).  Training-mode BatchNorm1d
    # (biased batch variance, eps = 1e-5), matching the PyTorch module default.
    mean = jnp.mean(x, axis=0, keepdims=True)
    var = jnp.mean((x - mean) * (x - mean), axis=0, keepdims=True)
    inv = jax.lax.rsqrt(var + BN_EPS)
    return (x - mean) * (inv * gamma) + beta


# --------------------------------------------------------------------------
# Kernel A: blocks 1-4 (Linear + [BN] + LeakyReLU), full batch in one block.
# BatchNorm needs batch statistics over the whole batch, so this stage cannot
# be batch-tiled without changing training-mode semantics.
# --------------------------------------------------------------------------
def backbone_kernel(
    z_ref,
    w1_ref, b1_ref,
    w2_ref, g2_ref, be2_ref,
    w3_ref, g3_ref, be3_ref,
    w4_ref, g4_ref, be4_ref,
    h_ref,
):
    z = z_ref[...].astype(jnp.bfloat16)

    # block1: Linear(latent, 128) + LeakyReLU (no batchnorm -> bias kept)
    h = jnp.dot(z, w1_ref[...], preferred_element_type=jnp.float32) + b1_ref[...]
    h = _leaky_relu(h)

    # blocks 2-4: Linear + BatchNorm1d(train) + LeakyReLU.
    # Linear bias is omitted: training-mode BN subtracts the batch mean, so a
    # constant per-feature bias cancels exactly (same math as PyTorch).
    h = jnp.dot(h.astype(jnp.bfloat16), w2_ref[...],
                preferred_element_type=jnp.float32)
    h = _leaky_relu(_batchnorm_train(h, g2_ref[...], be2_ref[...]))

    h = jnp.dot(h.astype(jnp.bfloat16), w3_ref[...],
                preferred_element_type=jnp.float32)
    h = _leaky_relu(_batchnorm_train(h, g3_ref[...], be3_ref[...]))

    h = jnp.dot(h.astype(jnp.bfloat16), w4_ref[...],
                preferred_element_type=jnp.float32)
    h = _leaky_relu(_batchnorm_train(h, g4_ref[...], be4_ref[...]))

    h_ref[...] = h  # (B, 1024) f32


# --------------------------------------------------------------------------
# Kernel B: final Linear(1024, C*H*W) + Tanh, tiled over (batch, out-features).
# --------------------------------------------------------------------------
def final_kernel(h_ref, w5_ref, b5_ref, out_ref):
    h = h_ref[...].astype(jnp.bfloat16)
    y = jnp.dot(h, w5_ref[...], preferred_element_type=jnp.float32) + b5_ref[...]
    out_ref[...] = jnp.tanh(y)


# --------------------------------------------------------------------------
# Params (PyTorch-Linear-style init: U(-1/sqrt(in), 1/sqrt(in))).
# Weights are stored in bf16; biases / BN affine params in f32.
# --------------------------------------------------------------------------
def make_generator_params(key, latent_dim, img_size, n_channels):
    dims = [latent_dim, *HIDDEN, n_channels * img_size * img_size]
    params = {}
    keys = jax.random.split(key, 2 * (len(dims) - 1))
    for i in range(len(dims) - 1):
        din, dout = dims[i], dims[i + 1]
        bound = 1.0 / math.sqrt(din)
        w = jax.random.uniform(keys[2 * i], (din, dout), jnp.float32, -bound, bound)
        b = jax.random.uniform(keys[2 * i + 1], (1, dout), jnp.float32, -bound, bound)
        params[f"w{i + 1}"] = w.astype(jnp.bfloat16)
        if i + 1 in (1, 5):
            # Biases for layers 2-4 are omitted: they cancel under training-mode BN.
            params[f"b{i + 1}"] = b
    for i, dout in zip((2, 3, 4), HIDDEN[1:]):
        params[f"g{i}"] = jnp.ones((1, dout), jnp.float32)
        params[f"be{i}"] = jnp.zeros((1, dout), jnp.float32)
    return params


def _round_up(x, m):
    return ((x + m - 1) // m) * m


def _pick_tile(total, candidates):
    for c in candidates:
        if total % c == 0:
            return c
    return total


def generator_forward(z, params, img_size, n_channels):
    B, latent_dim = z.shape
    flat_out = n_channels * img_size * img_size
    H4 = HIDDEN[-1]  # 1024

    # ---------------- stage 1: blocks 1-4 (gridless, full batch) ------------
    backbone_inputs = (
        z,
        params["w1"], params["b1"],
        params["w2"], params["g2"], params["be2"],
        params["w3"], params["g3"], params["be3"],
        params["w4"], params["g4"], params["be4"],
    )
    vmem = pl.BlockSpec(memory_space=pltpu.MemorySpace.VMEM)
    bb_flops = 2 * B * (latent_dim * 128 + 128 * 256 + 256 * 512 + 512 * 1024)
    bb_bytes = sum(int(x.size) * x.dtype.itemsize for x in backbone_inputs) \
        + B * H4 * 4
    h = pl.pallas_call(
        backbone_kernel,
        out_shape=jax.ShapeDtypeStruct((B, H4), jnp.float32),
        in_specs=[vmem] * len(backbone_inputs),
        out_specs=vmem,
        cost_estimate=pl.CostEstimate(
            flops=bb_flops, transcendentals=3 * B, bytes_accessed=bb_bytes),
    )(*backbone_inputs)

    # ---------------- stage 2: final Linear + Tanh, tiled -------------------
    # Pad the output-feature dim to a multiple of 128 (lane-dense stores).
    flat_out_p = _round_up(flat_out, 128)
    w5 = params["w5"]
    b5 = params["b5"]
    if flat_out_p != flat_out:
        pad = flat_out_p - flat_out
        w5 = jnp.pad(w5, ((0, 0), (0, pad)))
        b5 = jnp.pad(b5, ((0, 0), (0, pad)))

    TN = _pick_tile(flat_out_p, (1024, 512, 256, 128))
    TB = _pick_tile(B, (256, 128)) if B > 256 else B
    grid = (B // TB, flat_out_p // TN)

    fin_flops = 2 * B * H4 * flat_out_p
    fin_bytes = (w5.size * 2 + b5.size * 4 + B * H4 * 4 + B * flat_out_p * 4)
    flat = pl.pallas_call(
        final_kernel,
        out_shape=jax.ShapeDtypeStruct((B, flat_out_p), jnp.float32),
        grid_spec=pltpu.PrefetchScalarGridSpec(
            num_scalar_prefetch=0,
            grid=grid,
            in_specs=[
                pl.BlockSpec((TB, H4), lambda i, j: (i, 0)),
                pl.BlockSpec((H4, TN), lambda i, j: (0, j)),
                pl.BlockSpec((1, TN), lambda i, j: (0, j)),
            ],
            out_specs=pl.BlockSpec((TB, TN), lambda i, j: (i, j)),
        ),
        compiler_params=pltpu.CompilerParams(
            dimension_semantics=("parallel", "parallel")),
        cost_estimate=pl.CostEstimate(
            flops=fin_flops, transcendentals=B * flat_out_p,
            bytes_accessed=int(fin_bytes)),
    )(h, w5, b5)

    flat = flat[:, :flat_out]
    # Match PyTorch: img.view(B, C, H, W) -> NCHW
    return flat.reshape(B, n_channels, img_size, img_size)


if __name__ == "__main__":
    # Small shapes consistent with the module (scaled-down defaults).
    latent_dim = 32
    img_size = 16
    n_channels = 3
    batch = 8

    key = jax.random.PRNGKey(0)
    pkey, zkey = jax.random.split(key)
    params = make_generator_params(pkey, latent_dim, img_size, n_channels)
    z = jax.random.normal(zkey, (batch, latent_dim), jnp.float32)

    img = generator_forward(z, params, img_size, n_channels)
    img = jax.block_until_ready(img)

    assert img.shape == (batch, n_channels, img_size, img_size), img.shape
    assert bool(jnp.all(jnp.isfinite(img)))
    assert bool(jnp.all(jnp.abs(img) <= 1.0 + 1e-6))  # tanh range
    print("KERNEL_OK")
</pallas_src>

<mosaic_0001>
module attributes {stable_mosaic.version = 11 : i64} {
  func.func @backbone_kernel(%arg0: memref<8x32xf32, #tpu.memory_space<vmem>>, %arg1: memref<32x128xbf16, #tpu.memory_space<vmem>>, %arg2: memref<1x128xf32, #tpu.memory_space<vmem>>, %arg3: memref<128x256xbf16, #tpu.memory_space<vmem>>, %arg4: memref<1x256xf32, #tpu.memory_space<vmem>>, %arg5: memref<1x256xf32, #tpu.memory_space<vmem>>, %arg6: memref<256x512xbf16, #tpu.memory_space<vmem>>, %arg7: memref<1x512xf32, #tpu.memory_space<vmem>>, %arg8: memref<1x512xf32, #tpu.memory_space<vmem>>, %arg9: memref<512x1024xbf16, #tpu.memory_space<vmem>>, %arg10: memref<1x1024xf32, #tpu.memory_space<vmem>>, %arg11: memref<1x1024xf32, #tpu.memory_space<vmem>>, %arg12: memref<8x1024xf32, #tpu.memory_space<vmem>>) attributes {dimension_semantics = [], scalar_prefetch = 0 : i64, scratch_operands = 0 : i64, tpu.core_type = #tpu.core_type<tc>} {
    %c0 = arith.constant 0 : index
    %c0_0 = arith.constant 0 : index
    %0 = vector.load %arg0[%c0, %c0_0] : memref<8x32xf32, #tpu.memory_space<vmem>>, vector<8x32xf32>
    %1 = arith.truncf %0 : vector<8x32xf32> to vector<8x32xbf16>
    %c0_1 = arith.constant 0 : index
    %c0_2 = arith.constant 0 : index
    %2 = vector.load %arg1[%c0_1, %c0_2] : memref<32x128xbf16, #tpu.memory_space<vmem>>, vector<32x128xbf16>
    %cst = arith.constant dense<0.000000e+00> : vector<8x128xf32>
    %3 = tpu.matmul %1, %2, %cst {dimension_numbers = #tpu.dot_dimension_numbers<[1], [0], [0], [1], [0, 0, 1, 1], [], []>} : vector<8x32xbf16>, vector<32x128xbf16>, vector<8x128xf32> -> vector<8x128xf32>
    %c0_3 = arith.constant 0 : index
    %c0_4 = arith.constant 0 : index
    %4 = vector.load %arg2[%c0_3, %c0_4] : memref<1x128xf32, #tpu.memory_space<vmem>>, vector<1x128xf32>
    %5 = vector.broadcast %4 : vector<1x128xf32> to vector<8x128xf32>
    %6 = arith.addf %3, %5 : vector<8x128xf32>
    %cst_5 = arith.constant 0.000000e+00 : f32
    %7 = vector.broadcast %cst_5 : f32 to vector<8x128xf32>
    %8 = arith.cmpf ogt, %6, %7 : vector<8x128xf32>
    %cst_6 = arith.constant 2.000000e-01 : f32
    %9 = vector.broadcast %cst_6 : f32 to vector<8x128xf32>
    %10 = arith.mulf %9, %6 : vector<8x128xf32>
    %11 = arith.select %8, %6, %10 : vector<8x128xi1>, vector<8x128xf32>
    %12 = arith.truncf %11 : vector<8x128xf32> to vector<8x128xbf16>
    %c0_7 = arith.constant 0 : index
    %c0_8 = arith.constant 0 : index
    %13 = vector.load %arg3[%c0_7, %c0_8] : memref<128x256xbf16, #tpu.memory_space<vmem>>, vector<128x256xbf16>
    %cst_9 = arith.constant dense<0.000000e+00> : vector<8x256xf32>
    %14 = tpu.matmul %12, %13, %cst_9 {dimension_numbers = #tpu.dot_dimension_numbers<[1], [0], [0], [1], [0, 0, 1, 1], [], []>} : vector<8x128xbf16>, vector<128x256xbf16>, vector<8x256xf32> -> vector<8x256xf32>
    %c0_10 = arith.constant 0 : index
    %c0_11 = arith.constant 0 : index
    %15 = vector.load %arg4[%c0_10, %c0_11] : memref<1x256xf32, #tpu.memory_space<vmem>>, vector<1x256xf32>
    %c0_12 = arith.constant 0 : index
    %c0_13 = arith.constant 0 : index
    %16 = vector.load %arg5[%c0_12, %c0_13] : memref<1x256xf32, #tpu.memory_space<vmem>>, vector<1x256xf32>
    %cst_14 = arith.constant dense<0.000000e+00> : vector<256xf32>
    %17 = vector.multi_reduction <add>, %14, %cst_14 [0] : vector<8x256xf32> to vector<256xf32>
    %18 = vector.shape_cast %17 : vector<256xf32> to vector<1x256xf32>
    %cst_15 = arith.constant 8.000000e+00 : f32
    %19 = vector.broadcast %cst_15 : f32 to vector<1x256xf32>
    %20 = arith.divf %18, %19 : vector<1x256xf32>
    %21 = vector.broadcast %20 : vector<1x256xf32> to vector<8x256xf32>
    %22 = arith.subf %14, %21 : vector<8x256xf32>
    %23 = vector.broadcast %20 : vector<1x256xf32> to vector<8x256xf32>
    %24 = arith.subf %14, %23 : vector<8x256xf32>
    %25 = arith.mulf %22, %24 : vector<8x256xf32>
    %cst_16 = arith.constant dense<0.000000e+00> : vector<256xf32>
    %26 = vector.multi_reduction <add>, %25, %cst_16 [0] : vector<8x256xf32> to vector<256xf32>
    %27 = vector.shape_cast %26 : vector<256xf32> to vector<1x256xf32>
    %cst_17 = arith.constant 8.000000e+00 : f32
    %28 = vector.broadcast %cst_17 : f32 to vector<1x256xf32>
    %29 = arith.divf %27, %28 : vector<1x256xf32>
    %cst_18 = arith.constant 9.99999974E-6 : f32
    %30 = vector.broadcast %cst_18 : f32 to vector<1x256xf32>
    %31 = arith.addf %29, %30 : vector<1x256xf32>
    %32 = math.rsqrt %31 : vector<1x256xf32>
    %33 = vector.broadcast %20 : vector<1x256xf32> to vector<8x256xf32>
    %34 = arith.subf %14, %33 : vector<8x256xf32>
    %35 = arith.mulf %32, %15 : vector<1x256xf32>
    %36 = vector.broadcast %35 : vector<1x256xf32> to vector<8x256xf32>
    %37 = arith.mulf %34, %36 : vector<8x256xf32>
    %38 = vector.broadcast %16 : vector<1x256xf32> to vector<8x256xf32>
    %39 = arith.addf %37, %38 : vector<8x256xf32>
    %cst_19 = arith.constant 0.000000e+00 : f32
    %40 = vector.broadcast %cst_19 : f32 to vector<8x256xf32>
    %41 = arith.cmpf ogt, %39, %40 : vector<8x256xf32>
    %cst_20 = arith.constant 2.000000e-01 : f32
    %42 = vector.broadcast %cst_20 : f32 to vector<8x256xf32>
    %43 = arith.mulf %42, %39 : vector<8x256xf32>
    %44 = arith.select %41, %39, %43 : vector<8x256xi1>, vector<8x256xf32>
    %45 = arith.truncf %44 : vector<8x256xf32> to vector<8x256xbf16>
    %c0_21 = arith.constant 0 : index
    %c0_22 = arith.constant 0 : index
    %46 = vector.load %arg6[%c0_21, %c0_22] : memref<256x512xbf16, #tpu.memory_space<vmem>>, vector<256x512xbf16>
    %cst_23 = arith.constant dense<0.000000e+00> : vector<8x512xf32>
    %47 = tpu.matmul %45, %46, %cst_23 {dimension_numbers = #tpu.dot_dimension_numbers<[1], [0], [0], [1], [0, 0, 1, 1], [], []>} : vector<8x256xbf16>, vector<256x512xbf16>, vector<8x512xf32> -> vector<8x512xf32>
    %c0_24 = arith.constant 0 : index
    %c0_25 = arith.constant 0 : index
    %48 = vector.load %arg7[%c0_24, %c0_25] : memref<1x512xf32, #tpu.memory_space<vmem>>, vector<1x512xf32>
    %c0_26 = arith.constant 0 : index
    %c0_27 = arith.constant 0 : index
    %49 = vector.load %arg8[%c0_26, %c0_27] : memref<1x512xf32, #tpu.memory_space<vmem>>, vector<1x512xf32>
    %cst_28 = arith.constant dense<0.000000e+00> : vector<512xf32>
    %50 = vector.multi_reduction <add>, %47, %cst_28 [0] : vector<8x512xf32> to vector<512xf32>
    %51 = vector.shape_cast %50 : vector<512xf32> to vector<1x512xf32>
    %cst_29 = arith.constant 8.000000e+00 : f32
    %52 = vector.broadcast %cst_29 : f32 to vector<1x512xf32>
    %53 = arith.divf %51, %52 : vector<1x512xf32>
    %54 = vector.broadcast %53 : vector<1x512xf32> to vector<8x512xf32>
    %55 = arith.subf %47, %54 : vector<8x512xf32>
    %56 = vector.broadcast %53 : vector<1x512xf32> to vector<8x512xf32>
    %57 = arith.subf %47, %56 : vector<8x512xf32>
    %58 = arith.mulf %55, %57 : vector<8x512xf32>
    %cst_30 = arith.constant dense<0.000000e+00> : vector<512xf32>
    %59 = vector.multi_reduction <add>, %58, %cst_30 [0] : vector<8x512xf32> to vector<512xf32>
    %60 = vector.shape_cast %59 : vector<512xf32> to vector<1x512xf32>
    %cst_31 = arith.constant 8.000000e+00 : f32
    %61 = vector.broadcast %cst_31 : f32 to vector<1x512xf32>
    %62 = arith.divf %60, %61 : vector<1x512xf32>
    %cst_32 = arith.constant 9.99999974E-6 : f32
    %63 = vector.broadcast %cst_32 : f32 to vector<1x512xf32>
    %64 = arith.addf %62, %63 : vector<1x512xf32>
    %65 = math.rsqrt %64 : vector<1x512xf32>
    %66 = vector.broadcast %53 : vector<1x512xf32> to vector<8x512xf32>
    %67 = arith.subf %47, %66 : vector<8x512xf32>
    %68 = arith.mulf %65, %48 : vector<1x512xf32>
    %69 = vector.broadcast %68 : vector<1x512xf32> to vector<8x512xf32>
    %70 = arith.mulf %67, %69 : vector<8x512xf32>
    %71 = vector.broadcast %49 : vector<1x512xf32> to vector<8x512xf32>
    %72 = arith.addf %70, %71 : vector<8x512xf32>
    %cst_33 = arith.constant 0.000000e+00 : f32
    %73 = vector.broadcast %cst_33 : f32 to vector<8x512xf32>
    %74 = arith.cmpf ogt, %72, %73 : vector<8x512xf32>
    %cst_34 = arith.constant 2.000000e-01 : f32
    %75 = vector.broadcast %cst_34 : f32 to vector<8x512xf32>
    %76 = arith.mulf %75, %72 : vector<8x512xf32>
    %77 = arith.select %74, %72, %76 : vector<8x512xi1>, vector<8x512xf32>
    %78 = arith.truncf %77 : vector<8x512xf32> to vector<8x512xbf16>
    %c0_35 = arith.constant 0 : index
    %c0_36 = arith.constant 0 : index
    %79 = vector.load %arg9[%c0_35, %c0_36] : memref<512x1024xbf16, #tpu.memory_space<vmem>>, vector<512x1024xbf16>
    %cst_37 = arith.constant dense<0.000000e+00> : vector<8x1024xf32>
    %80 = tpu.matmul %78, %79, %cst_37 {dimension_numbers = #tpu.dot_dimension_numbers<[1], [0], [0], [1], [0, 0, 1, 1], [], []>} : vector<8x512xbf16>, vector<512x1024xbf16>, vector<8x1024xf32> -> vector<8x1024xf32>
    %c0_38 = arith.constant 0 : index
    %c0_39 = arith.constant 0 : index
    %81 = vector.load %arg10[%c0_38, %c0_39] : memref<1x1024xf32, #tpu.memory_space<vmem>>, vector<1x1024xf32>
    %c0_40 = arith.constant 0 : index
    %c0_41 = arith.constant 0 : index
    %82 = vector.load %arg11[%c0_40, %c0_41] : memref<1x1024xf32, #tpu.memory_space<vmem>>, vector<1x1024xf32>
    %cst_42 = arith.constant dense<0.000000e+00> : vector<1024xf32>
    %83 = vector.multi_reduction <add>, %80, %cst_42 [0] : vector<8x1024xf32> to vector<1024xf32>
    %84 = vector.shape_cast %83 : vector<1024xf32> to vector<1x1024xf32>
    %cst_43 = arith.constant 8.000000e+00 : f32
    %85 = vector.broadcast %cst_43 : f32 to vector<1x1024xf32>
    %86 = arith.divf %84, %85 : vector<1x1024xf32>
    %87 = vector.broadcast %86 : vector<1x1024xf32> to vector<8x1024xf32>
    %88 = arith.subf %80, %87 : vector<8x1024xf32>
    %89 = vector.broadcast %86 : vector<1x1024xf32> to vector<8x1024xf32>
    %90 = arith.subf %80, %89 : vector<8x1024xf32>
    %91 = arith.mulf %88, %90 : vector<8x1024xf32>
    %cst_44 = arith.constant dense<0.000000e+00> : vector<1024xf32>
    %92 = vector.multi_reduction <add>, %91, %cst_44 [0] : vector<8x1024xf32> to vector<1024xf32>
    %93 = vector.shape_cast %92 : vector<1024xf32> to vector<1x1024xf32>
    %cst_45 = arith.constant 8.000000e+00 : f32
    %94 = vector.broadcast %cst_45 : f32 to vector<1x1024xf32>
    %95 = arith.divf %93, %94 : vector<1x1024xf32>
    %cst_46 = arith.constant 9.99999974E-6 : f32
    %96 = vector.broadcast %cst_46 : f32 to vector<1x1024xf32>
    %97 = arith.addf %95, %96 : vector<1x1024xf32>
    %98 = math.rsqrt %97 : vector<1x1024xf32>
    %99 = vector.broadcast %86 : vector<1x1024xf32> to vector<8x1024xf32>
    %100 = arith.subf %80, %99 : vector<8x1024xf32>
    %101 = arith.mulf %98, %81 : vector<1x1024xf32>
    %102 = vector.broadcast %101 : vector<1x1024xf32> to vector<8x1024xf32>
    %103 = arith.mulf %100, %102 : vector<8x1024xf32>
    %104 = vector.broadcast %82 : vector<1x1024xf32> to vector<8x1024xf32>
    %105 = arith.addf %103, %104 : vector<8x1024xf32>
    %cst_47 = arith.constant 0.000000e+00 : f32
    %106 = vector.broadcast %cst_47 : f32 to vector<8x1024xf32>
    %107 = arith.cmpf ogt, %105, %106 : vector<8x1024xf32>
    %cst_48 = arith.constant 2.000000e-01 : f32
    %108 = vector.broadcast %cst_48 : f32 to vector<8x1024xf32>
    %109 = arith.mulf %108, %105 : vector<8x1024xf32>
    %110 = arith.select %107, %105, %109 : vector<8x1024xi1>, vector<8x1024xf32>
    %c0_49 = arith.constant 0 : index
    %c0_50 = arith.constant 0 : index
    %111 = vector.load %arg12[%c0_49, %c0_50] : memref<8x1024xf32, #tpu.memory_space<vmem>>, vector<8x1024xf32>
    tpu.vector_store %arg12[%c0_49, %c0_50], %110 {strides = array<i32>} : memref<8x1024xf32, #tpu.memory_space<vmem>>, vector<8x1024xf32>,
    return
  }
}

</mosaic_0001>

<bundles_post_ra>
// kernel: tpu_custom_call.1
= control target key start
LH: loop header
LB: loop body
LE: loop exit
PB: predicated region body
PF: predicated region fallthrough
CT: control target
= control target key end

     0   :  { %17 = vsyncpa [#allocation3], 0  ;;  %s5788_s0 = inlined_call_operand.hbm [shape: f32[8,32], index: 0, kind: input, shape index: {}]   ;;  %s5789_s1 = inlined_call_operand.hbm [shape: bf16[32,128], index: 1, kind: input, shape index: {}]   ;;  %s5790_s2 = inlined_call_operand.vmem [shape: f32[1,128], index: 2, kind: input, shape index: {}]   ;;  %s5791_s3 = inlined_call_operand.hbm [shape: bf16[128,256], index: 3, kind: input, shape index: {}]   ;;  %s5792_s4 = inlined_call_operand.hbm [shape: f32[1,256], index: 4, kind: input, shape index: {}]   ;;  %s5793_s5 = inlined_call_operand.hbm [shape: f32[1,256], index: 5, kind: input, shape index: {}]   ;;  %s5794_s6 = inlined_call_operand.hbm [shape: bf16[256,512], index: 6, kind: input, shape index: {}]   ;;  %s5795_s7 = inlined_call_operand.hbm [shape: f32[1,512], index: 7, kind: input, shape index: {}]   ;;  %s5796_s8 = inlined_call_operand.hbm [shape: f32[1,512], index: 8, kind: input, shape index: {}]   ;;  %s5797_s9 = inlined_call_operand.hbm [shape: bf16[512,1024], index: 9, kind: input, shape index: {}]   ;;  %s5798_s10 = inlined_call_operand.vmem [shape: f32[1,1024], index: 10, kind: input, shape index: {}]   ;;  %s5799_s11 = inlined_call_operand.hbm [shape: f32[1,1024], index: 11, kind: input, shape index: {}]   ;;  %s5800_s12 = inlined_call_operand.hbm [shape: f32[8,1024], index: 12, kind: output, shape index: {}]  }
   0x1   :  { %18 = vsyncpa [#allocation6], 0 }
   0x2   :  { %19 = vsyncpa [#allocation9], 0 }
   0x3   :  { %20 = vsyncpa [#allocation12], 0 }
   0x4   :  { %21 = vsyncpa [#allocation15], 0 }
   0x5   :  { %22 = vsyncpa [#allocation18], 0  ;;  %s39_s23 = sshll.u32 %s5789_s1, 4  ;;  %s40_s23 = int_to_ptr.hbm [resolvable:$true] %s39_s23 }
   0x6   :  { %23 = vsyncpa [#allocation4], 0  ;;  %s5399_s24 = smov [#allocation5]   ;;  %s68_s28 = sshll.u32 %s5792_s4, 4  ;;  %s69_s28 = int_to_ptr.hbm [resolvable:$true] %s68_s28 }
   0x7   :  { %s41_s25 = sshll.u32 %s5399_s24, 4  ;;  %s5400_s29 = smov 64   ;;  %s42_s25 = int_to_ptr.vmem [resolvable:$true] %s41_s25 }
   0x8   :  { %s5401_s30 = smov 4   ;;  %s5402_s13 = smov [#allocation8]  }
   0x9   :  { %47 = dma.hbm_to_vmem [thread:$0]  %s40_s23, 256, %s42_s25, [#allocation6], %s5400_s29, %s5400_s29, %s5401_s30  }
   0xa   :  { %s70_s14 = sshll.u32 %s5402_s13, 4  ;;  %s89_s17 = sshll.u32 %s5794_s6, 4  ;;  %s71_s14 = int_to_ptr.vmem [resolvable:$true] %s70_s14  ;;  %s90_s17 = int_to_ptr.hbm [resolvable:$true] %s89_s17 }
   0xb   :  { %73 = dma.hbm_to_vmem [thread:$0]  %s69_s28, 32, %s71_s14, [#allocation9]  }
   0xc   :  { %s5403_s1 = smov [#allocation11]   ;;  %s114_s4 = sshll.u32 %s5796_s8, 4  ;;  %s115_s4 = int_to_ptr.hbm [resolvable:$true] %s114_s4 }
   0xd   :  { %s91_s18 = sshll.u32 %s5403_s1, 4  ;;  %s5404_s21 = smov 256   ;;  %s92_s18 = int_to_ptr.vmem [resolvable:$true] %s91_s18 }
   0xe   :  { %s5405_s22 = smov 16   ;;  %s5406_s23 = smov [#allocation14]  }
   0xf   :  { %97 = dma.hbm_to_vmem [thread:$0]  %s90_s17, 8192, %s92_s18, [#allocation12], %s5404_s21, %s5404_s21, %s5405_s22  }
  0x10   :  { %s116_s24 = sshll.u32 %s5406_s23, 4  ;;  %s29_s6 = sshll.u32 %s5788_s0, 4  ;;  %s117_s24 = int_to_ptr.vmem [resolvable:$true] %s116_s24  ;;  %s30_s6 = int_to_ptr.hbm [resolvable:$true] %s29_s6 }
  0x11   :  { %119 = dma.hbm_to_vmem [thread:$0]  %s115_s4, 64, %s117_s24, [#allocation15]  }
  0x12   :  { %s54_s29 = sshll.u32 %s5791_s3, 4  ;;  %s5407_s30 = smov [#allocation2]   ;;  %s55_s29 = int_to_ptr.hbm [resolvable:$true] %s54_s29 }
  0x13   :  { %s31_s13 = sshll.u32 %s5407_s30, 4  ;;  %s5408_s8 = smov [#allocation7]   ;;  %s32_s13 = int_to_ptr.vmem [resolvable:$true] %s31_s13 }
  0x14   :  { %34 = dma.hbm_to_vmem [thread:$0]  %s30_s6, 128, %s32_s13, [#allocation3]  }
  0x15   :  { %s56_s14 = sshll.u32 %s5408_s8, 4  ;;  %s5409_s15 = smov 128   ;;  %s57_s14 = int_to_ptr.vmem [resolvable:$true] %s56_s14 }
  0x16   :  { %s5410_s16 = smov 8   ;;  %s79_s1 = sshll.u32 %s5793_s5, 4  ;;  %s80_s1 = int_to_ptr.hbm [resolvable:$true] %s79_s1 }
  0x17   :  { %62 = dma.hbm_to_vmem [thread:$0]  %s55_s29, 2048, %s57_s14, [#allocation6], %s5409_s15, %s5409_s15, %s5410_s16  }
  0x18   :  { %s5411_s18 = smov [#allocation10]   ;;  %s103_s4 = sshll.u32 %s5795_s7, 4  ;;  %s104_s4 = int_to_ptr.hbm [resolvable:$true] %s103_s4 }
  0x19   :  { %s81_s19 = sshll.u32 %s5411_s18, 4  ;;  %s5412_s21 = smov [#allocation13]   ;;  %s82_s19 = int_to_ptr.vmem [resolvable:$true] %s81_s19 }
  0x1a   :  { %84 = dma.hbm_to_vmem [thread:$0]  %s80_s1, 32, %s82_s19, [#allocation9]  }
  0x1b   :  { %s105_s22 = sshll.u32 %s5412_s21, 4  ;;  %s124_s25 = sshll.u32 %s5797_s9, 4  ;;  %s106_s22 = int_to_ptr.vmem [resolvable:$true] %s105_s22  ;;  %s125_s25 = int_to_ptr.hbm [resolvable:$true] %s124_s25 }
  0x1c   :  { %108 = dma.hbm_to_vmem [thread:$0]  %s104_s4, 64, %s106_s22, [#allocation12]  }
  0x1d   :  { %s5413_s5 = smov [#allocation16]   ;;  %s140_s28 = sshll.u32 %s5799_s11, 4  ;;  %s141_s28 = int_to_ptr.hbm [resolvable:$true] %s140_s28 }
  0x1e   :  { %s126_s26 = sshll.u32 %s5413_s5, 4  ;;  %s5414_s29 = smov 512   ;;  %s127_s26 = int_to_ptr.vmem [resolvable:$true] %s126_s26 }
  0x1f   :  { %s5415_s7 = smov 32   ;;  %s5416_s30 = smov [#allocation17]  }
  0x20   :  { %132 = dma.hbm_to_vmem [thread:$0]  %s125_s25, 32768, %s127_s26, [#allocation15], %s5414_s29, %s5414_s29, %s5415_s7  }
  0x21   :  { %s142_s13 = sshll.u32 %s5416_s30, 4  ;;  %s143_s13 = int_to_ptr.vmem [resolvable:$true] %s142_s13 }
  0x22   :  { %145 = dma.hbm_to_vmem [thread:$0]  %s141_s28, 128, %s143_s13, [#allocation18]  }
  0x23   :  { %5385 = dma.done.wait [#allocation3], 128  }
  0x24   :  { %5386 = vsyncadd [#allocation3], 4294967168 }
  0x25   :  { %5387 = dma.done.wait [#allocation6], 2304  }
  0x26   :  { %5388 = vsyncadd [#allocation6], 4294964992 }
  0x27   :  { %5389 = dma.done.wait [#allocation9], 64  }
  0x28   :  { %5390 = vsyncadd [#allocation9], 4294967232 }
  0x29   :  { %5391 = dma.done.wait [#allocation12], 8256  }
  0x2a   :  { %5392 = vsyncadd [#allocation12], 4294959040 }
  0x2b   :  { %5393 = dma.done.wait [#allocation15], 32832  }
  0x2c   :  { %5394 = vsyncadd [#allocation15], 4294934464 }
  0x2d   :  { %5395 = dma.done.wait [#allocation18], 128  }
  0x2e   :  { %5396 = vsyncadd [#allocation18], 4294967168  ;;  %v4733_v0 = vld [vmem:[#allocation5 + $0x8] sm:$0xff]  ;;  %v4732_v1 = vld [vmem:[#allocation5] sm:$0xff]  ;;  %vm209_vm0 = vcmask 261120   ;;  %v5417_v59 = vmov 8.0  }
  0x2f   :  { %v187_v2 = vld [vmem:[#allocation2] sm:$0xff]  ;;  %v3446_v3 = vld [vmem:[#allocation7 + $0x70] sm:$0xf]  ;;  %v4749_v4 = vld [vmem:[#allocation7 + $0x74] sm:$0xf0]  ;;  %219 = vmatpush.bf16.msra.mxu0 %v4733_v0  ;;  %5091 = vrcp.f32 %v5417_v59  ;;  %s3364_s17 = sshll.u32 %s5800_s12, 4  ;;  %s3365_s17 = int_to_ptr.hbm [resolvable:$true] %s3364_s17 }
  0x30   :  { %v4748_v5 = vld [vmem:[#allocation7 + $0x74] sm:$0xf]  ;;  %v3447_v6 = vor.u32 %v4749_v4, %v3446_v3  ;;  %v3448_v7 = vld [vmem:[#allocation7 + $0x78] sm:$0xf0]  ;;  %v3438_v8 = vld [vmem:[#allocation7 + $0x60] sm:$0xf]  ;;  %v188_v14 = vpack.c.bf16 %v187_v2, %v187_v2 }
  0x31   :  { %v4747_v9 = vld [vmem:[#allocation7 + $0x64] sm:$0xf0]  ;;  %v3451_v10 = vor.u32 %v4748_v5, %v3448_v7  ;;  %v4746_v11 = vld [vmem:[#allocation7 + $0x64] sm:$0xf]  ;;  %v3440_v12 = vld [vmem:[#allocation7 + $0x68] sm:$0xf0] }
  0x32   :  { %326 = vmatpush.bf16.msra.mxu1 %v3447_v6  ;;  %v3439_v13 = vor.u32 %v4747_v9, %v3438_v8  ;;  %v3443_v15 = vor.u32 %v4746_v11, %v3440_v12  ;;  %v3430_v16 = vld [vmem:[#allocation7 + $0x50] sm:$0xf]  ;;  %v4745_v17 = vld [vmem:[#allocation7 + $0x54] sm:$0xf0]  ;;  %v4744_v18 = vld [vmem:[#allocation7 + $0x54] sm:$0xf] }
  0x33   :  { %339 = vmatpush.bf16.msra.mxu2 %v3451_v10  ;;  %220 = vmatpush.bf16.msra.mxu0 %v4732_v1  ;;  %v3432_v19 = vld [vmem:[#allocation7 + $0x58] sm:$0xf0]  ;;  %v3431_v20 = vor.u32 %v4745_v17, %v3430_v16  ;;  %v3422_v22 = vld [vmem:[#allocation7 + $0x40] sm:$0xf]  ;;  %v4743_v23 = vld [vmem:[#allocation7 + $0x44] sm:$0xf0] }
  0x34   :  { %v3435_v21 = vor.u32 %v4744_v18, %v3432_v19  ;;  %v4742_v24 = vld [vmem:[#allocation7 + $0x44] sm:$0xf]  ;;  %v3424_v25 = vld [vmem:[#allocation7 + $0x48] sm:$0xf0]  ;;  %v3423_v26 = vor.u32 %v4743_v23, %v3422_v22  ;;  %v3414_v28 = vld [vmem:[#allocation7 + $0x30] sm:$0xf] }
  0x35   :  { %v3427_v27 = vor.u32 %v4742_v24, %v3424_v25  ;;  %v4741_v29 = vld [vmem:[#allocation7 + $0x34] sm:$0xf0]  ;;  %v4740_v30 = vld [vmem:[#allocation7 + $0x34] sm:$0xf]  ;;  %v3416_v31 = vld [vmem:[#allocation7 + $0x38] sm:$0xf0]  ;;  %v5517_v2 = vpop.eup %5091 }
  0x36   :  { %327 = vmatpush.bf16.msra.mxu1 %v3439_v13  ;;  %3387 = vmatmul.msk.bf16.vlgmr.msra.gmra.mxu0 %vm209_vm0, %v188_v14  ;;  %v3415_v32 = vor.u32 %v4741_v29, %v3414_v28  ;;  %v3419_v33 = vor.u32 %v4740_v30, %v3416_v31  ;;  %v3406_v34 = vld [vmem:[#allocation7 + $0x20] sm:$0xf]  ;;  %v4739_v35 = vld [vmem:[#allocation7 + $0x24] sm:$0xf0]  ;;  %v4738_v36 = vld [vmem:[#allocation7 + $0x24] sm:$0xf]  ;;  %vm371_vm2 = vweird.f32 %v5517_v2 }
  0x37   :  { %340 = vmatpush.bf16.msra.mxu2 %v3443_v15  ;;  %v3408_v37 = vld [vmem:[#allocation7 + $0x28] sm:$0xf0]  ;;  %v3407_v38 = vor.u32 %v4739_v35, %v3406_v34  ;;  %v3398_v40 = vld [vmem:[#allocation7 + $0x10] sm:$0xf]  ;;  %v4737_v41 = vld [vmem:[#allocation7 + $0x14] sm:$0xf0] }
  0x38   :  { %v3411_v39 = vor.u32 %v4738_v36, %v3408_v37  ;;  %v4736_v42 = vld [vmem:[#allocation7 + $0x14] sm:$0xf]  ;;  %v3399_v43 = vor.u32 %v4737_v41, %v3398_v40  ;;  %v3400_v44 = vld [vmem:[#allocation7 + $0x18] sm:$0xf0]  ;;  %v3390_v46 = vld [vmem:[#allocation7] sm:$0xf] }
  0x39   :  { %v3403_v45 = vor.u32 %v4736_v42, %v3400_v44  ;;  %v4735_v47 = vld [vmem:[#allocation7 + $0x4] sm:$0xf0]  ;;  %v4734_v48 = vld [vmem:[#allocation7 + $0x4] sm:$0xf]  ;;  %v3392_v50 = vld [vmem:[#allocation7 + $0x8] sm:$0xf0] }
  0x3a   :  { %328 = vmatpush.bf16.msra.mxu1 %v3431_v20  ;;  %v3391_v49 = vor.u32 %v4735_v47, %v3390_v46  ;;  %v3395_v51 = vor.u32 %v4734_v48, %v3392_v50  ;;  %v5090_v52 = vld [vmem:[%s5790_s2] ss:$0 sm:$0xff]  ;;  %v3566_v60 = vld [vmem:[#allocation11 + $0xe0] sm:$0xf]  ;;  %v4780_v61 = vld [vmem:[#allocation11 + $0xec] sm:$0xf0] }
  0x3b   :  { %341 = vmatpush.bf16.msra.mxu2 %v3435_v21  ;;  %v4778_v62 = vld [vmem:[#allocation11 + $0xe4] sm:$0xf]  ;;  %v3567_v63 = vor.u32 %v4780_v61, %v3566_v60  ;;  %v3568_v0 = vld [vmem:[#allocation11 + $0xf0] sm:$0xf0]  ;;  %v3550_v3 = vld [vmem:[#allocation11 + $0xc0] sm:$0xf] }
  0x3c   :  { %v3571_v1 = vor.u32 %v4778_v62, %v3568_v0  ;;  %v4776_v4 = vld [vmem:[#allocation11 + $0xcc] sm:$0xf0]  ;;  %v4774_v5 = vld [vmem:[#allocation11 + $0xc4] sm:$0xf]  ;;  %v3552_v7 = vld [vmem:[#allocation11 + $0xd0] sm:$0xf0] }
  0x3d   :  { %825 = vmatpush.bf16.msra.mxu3 %v3567_v63  ;;  %v3551_v6 = vor.u32 %v4776_v4, %v3550_v3  ;;  %v3555_v8 = vor.u32 %v4774_v5, %v3552_v7  ;;  %v3694_v9 = vld [vmem:[#allocation11 + $0x1e0] sm:$0xf]  ;;  %v4812_v10 = vld [vmem:[#allocation11 + $0x1ec] sm:$0xf0]  ;;  %v4810_v11 = vld [vmem:[#allocation11 + $0x1e4] sm:$0xf] }
  0x3e   :  { %329 = vmatpush.bf16.msra.mxu1 %v3423_v26  ;;  %v367_v12 = vmul.f32 8.0, %v5517_v2  ;;  %v3695_v13 = vor.u32 %v4812_v10, %v3694_v9  ;;  %v3696_v14 = vld [vmem:[#allocation11 + $0x1f0] sm:$0xf0]  ;;  %v3534_v16 = vld [vmem:[#allocation11 + $0xa0] sm:$0xf] }
  0x3f   :  { %342 = vmatpush.bf16.msra.mxu2 %v3427_v27  ;;  %v3699_v15 = vor.u32 %v4810_v11, %v3696_v14  ;;  %v4772_v17 = vld [vmem:[#allocation11 + $0xac] sm:$0xf0]  ;;  %v4770_v18 = vld [vmem:[#allocation11 + $0xa4] sm:$0xf]  ;;  %v3536_v20 = vld [vmem:[#allocation11 + $0xb0] sm:$0xf0] }
  0x40   :  { %838 = vmatpush.bf16.msrb.mxu0 %v3695_v13  ;;  %v3535_v19 = vor.u32 %v4772_v17, %v3534_v16  ;;  %v3539_v21 = vor.u32 %v4770_v18, %v3536_v20  ;;  %v3678_v22 = vld [vmem:[#allocation11 + $0x1c0] sm:$0xf]  ;;  %v4808_v23 = vld [vmem:[#allocation11 + $0x1cc] sm:$0xf0]  ;;  %v4806_v24 = vld [vmem:[#allocation11 + $0x1c4] sm:$0xf] }
  0x41   :  { %826 = vmatpush.bf16.msra.mxu3 %v3551_v6  ;;  %v368_v25 = vsub.f32 1.0, %v367_v12  ;;  %v3679_v26 = vor.u32 %v4808_v23, %v3678_v22  ;;  %v3680_v27 = vld [vmem:[#allocation11 + $0x1d0] sm:$0xf0]  ;;  %v3518_v29 = vld [vmem:[#allocation11 + $0x80] sm:$0xf] }
  0x42   :  { %330 = vmatpush.bf16.msra.mxu1 %v3415_v32  ;;  %v3683_v28 = vor.u32 %v4806_v24, %v3680_v27  ;;  %v4768_v30 = vld [vmem:[#allocation11 + $0x8c] sm:$0xf0]  ;;  %v4766_v31 = vld [vmem:[#allocation11 + $0x84] sm:$0xf]  ;;  %v3520_v34 = vld [vmem:[#allocation11 + $0x90] sm:$0xf0] }
  0x43   :  { %343 = vmatpush.bf16.msra.mxu2 %v3419_v33  ;;  %v3519_v33 = vor.u32 %v4768_v30, %v3518_v29  ;;  %v3523_v36 = vor.u32 %v4766_v31, %v3520_v34  ;;  %v3662_v37 = vld [vmem:[#allocation11 + $0x1a0] sm:$0xf]  ;;  %v4802_v41 = vld [vmem:[#allocation11 + $0x1a4] sm:$0xf]  ;;  %v3664_v42 = vld [vmem:[#allocation11 + $0x1b0] sm:$0xf0] }
  0x44   :  { %839 = vmatpush.bf16.msrb.mxu0 %v3679_v26  ;;  %v3667_v44 = vor.u32 %v4802_v41, %v3664_v42  ;;  %v4764_v46 = vld [vmem:[#allocation11 + $0x6c] sm:$0xf0]  ;;  %v4762_v47 = vld [vmem:[#allocation11 + $0x64] sm:$0xf]  ;;  %v3486_v62 = vld [vmem:[#allocation11 + $0x40] sm:$0xf] }
  0x45   :  { %827 = vmatpush.bf16.msra.mxu3 %v3535_v19  ;;  %v4760_v63 = vld [vmem:[#allocation11 + $0x4c] sm:$0xf0]  ;;  %v4758_v3 = vld [vmem:[#allocation11 + $0x44] sm:$0xf]  ;;  %v3488_v4 = vld [vmem:[#allocation11 + $0x50] sm:$0xf0] }
  0x46   :  { %331 = vmatpush.bf16.msra.mxu1 %v3407_v38  ;;  %v4804_v38 = vld [vmem:[#allocation11 + $0x1ac] sm:$0xf0]  ;;  %v3491_v7 = vor.u32 %v4758_v3, %v3488_v4  ;;  %v4794_v12 = vld [vmem:[#allocation11 + $0x164] sm:$0xf]  ;;  %v3632_v13 = vld [vmem:[#allocation11 + $0x170] sm:$0xf0] }
  0x47   :  { %344 = vmatpush.bf16.msra.mxu2 %v3411_v39  ;;  %v369_v39 = vmul.f32 %v5517_v2, %v368_v25  ;;  %v3663_v40 = vor.u32 %v4804_v38, %v3662_v37  ;;  %v4796_v9 = vld [vmem:[#allocation11 + $0x16c] sm:$0xf0]  ;;  %v3635_v16 = vor.u32 %v4794_v12, %v3632_v13  ;;  %v3470_v17 = vld [vmem:[#allocation11 + $0x20] sm:$0xf]  ;;  %v4754_v20 = vld [vmem:[#allocation11 + $0x24] sm:$0xf] }
  0x48   :  { %v4756_v18 = vld [vmem:[#allocation11 + $0x2c] sm:$0xf0]  ;;  %v3614_v24 = vld [vmem:[#allocation11 + $0x140] sm:$0xf]  ;;  %v4790_v26 = vld [vmem:[#allocation11 + $0x144] sm:$0xf] }
  0x49   :  { %828 = vmatpush.bf16.msra.mxu3 %v3519_v33  ;;  %840 = vmatpush.bf16.msrb.mxu0 %v3663_v40  ;;  %v3471_v19 = vor.u32 %v4756_v18, %v3470_v17  ;;  %v4792_v25 = vld [vmem:[#allocation11 + $0x14c] sm:$0xf0]  ;;  %v3616_v29 = vld [vmem:[#allocation11 + $0x150] sm:$0xf0]  ;;  %v3454_v34 = vld [vmem:[#allocation11] sm:$0xf] }
  0x4a   :  { %332 = vmatpush.bf16.msra.mxu1 %v3399_v43  ;;  %v3619_v33 = vor.u32 %v4790_v26, %v3616_v29  ;;  %v4750_v37 = vld [vmem:[#allocation11 + $0x4] sm:$0xf]  ;;  %v3456_v38 = vld [vmem:[#allocation11 + $0x10] sm:$0xf0]  ;;  %v4811_v12 = vld [vmem:[#allocation11 + $0x1ec] sm:$0xf] }
  0x4b   :  { %345 = vmatpush.bf16.msra.mxu2 %v3403_v45  ;;  %v3502_v45 = vld [vmem:[#allocation11 + $0x60] sm:$0xf]  ;;  %v3459_v42 = vor.u32 %v4750_v37, %v3456_v38  ;;  %v4782_v4 = vld [vmem:[#allocation11 + $0x104] sm:$0xf]  ;;  %v3704_v13 = vld [vmem:[#allocation11 + $0x1f8] sm:$0xf0] }
  0x4c   :  { %v3503_v48 = vor.u32 %v4764_v46, %v3502_v45  ;;  %v4771_v18 = vld [vmem:[#allocation11 + $0xac] sm:$0xf]  ;;  %v3528_v38 = vld [vmem:[#allocation11 + $0x98] sm:$0xf0] }
  0x4e   :  { %333 = vmatpush.bf16.msra.mxu1 %v3391_v49  ;;  %v3504_v49 = vld [vmem:[#allocation11 + $0x70] sm:$0xf0]  ;;  %829 = vmatpush.bf16.msra.mxu3 %v3503_v48  ;;  %v4788_v48 = vld [vmem:[#allocation11 + $0x12c] sm:$0xf0] }
  0x4f   :  { %346 = vmatpush.bf16.msra.mxu2 %v3395_v51  ;;  %v3507_v51 = vor.u32 %v4762_v47, %v3504_v49  ;;  %v3598_v47 = vld [vmem:[#allocation11 + $0x120] sm:$0xf]  ;;  %v4786_v49 = vld [vmem:[#allocation11 + $0x124] sm:$0xf] }
  0x52   :  { %851 = vmatpush.bf16.msrb.mxu1 %v3571_v1  ;;  %v3487_v1 = vor.u32 %v4760_v63, %v3486_v62  ;;  %v3560_v62 = vld [vmem:[#allocation11 + $0xd8] sm:$0xf0]  ;;  %v3582_v63 = vld [vmem:[#allocation11 + $0x100] sm:$0xf] }
  0x53   :  { %864 = vmatpush.bf16.msrb.mxu2 %v3699_v15 }
  0x54   :  { %830 = vmatpush.bf16.msra.mxu3 %v3487_v1 }
  0x56   :  { %852 = vmatpush.bf16.msrb.mxu1 %v3555_v8  ;;  %v3630_v8 = vld [vmem:[#allocation11 + $0x160] sm:$0xf] }
  0x57   :  { %865 = vmatpush.bf16.msrb.mxu2 %v3683_v28  ;;  %v3631_v11 = vor.u32 %v4796_v9, %v3630_v8  ;;  %v3615_v28 = vor.u32 %v4792_v25, %v3614_v24 }
  0x58   :  { %831 = vmatpush.bf16.msra.mxu3 %v3471_v19  ;;  %v3707_v19 = vor.u32 %v4811_v12, %v3704_v13  ;;  %v3640_v13 = vld [vmem:[#allocation11 + $0x178] sm:$0xf0] }
  0x5a   :  { %853 = vmatpush.bf16.msrb.mxu1 %v3539_v21  ;;  %v3472_v21 = vld [vmem:[#allocation11 + $0x30] sm:$0xf0] }
  0x5b   :  { %866 = vmatpush.bf16.msrb.mxu2 %v3667_v44  ;;  %v4779_v44 = vld [vmem:[#allocation11 + $0xec] sm:$0xf] }
  0x5e   :  { %854 = vmatpush.bf16.msrb.mxu1 %v3523_v36 }
  0x62   :  { %855 = vmatpush.bf16.msrb.mxu1 %v3507_v51 }
  0x66   :  { %856 = vmatpush.bf16.msrb.mxu1 %v3491_v7 }
  0xb3   :  { %v222_v53 = vpop.f32.mrf.mxu0 }
  0xb4   :  { %v223_v54 = vadd.f32 %v5090_v52, %v222_v53  ;;  %v3646_v52 = vld [vmem:[#allocation11 + $0x180] sm:$0xf]  ;;  %v4800_v53 = vld [vmem:[#allocation11 + $0x18c] sm:$0xf0] }
  0xb6   :  { %v227_v55 = vmul.f32 0.2, %v223_v54  ;;  %vm226_vm1 = vcmp.gt.f32.partialorder %v223_v54, 0.0 }
  0xb8   :  { %v228_v56 = vsel %vm226_vm1, %v223_v54, %v227_v55  ;;  %v370_v54 = vadd.f32 %v5517_v2, %v369_v39  ;;  %v3574_v39 = vld [vmem:[#allocation11 + $0xe8] sm:$0xf] }
  0xb9   :  { %v229_v57 = vpack.c.bf16 %v228_v56, %v228_v56  ;;  %v3647_v56 = vor.u32 %v4800_v53, %v3646_v52  ;;  %v3599_v52 = vor.u32 %v4788_v48, %v3598_v47  ;;  %v3600_v53 = vld [vmem:[#allocation11 + $0x130] sm:$0xf0]  ;;  %v3510_v47 = vld [vmem:[#allocation11 + $0x68] sm:$0xf]  ;;  %v4765_v48 = vld [vmem:[#allocation11 + $0x74] sm:$0xf0] }
  0xba   :  { %v5534_v10 = vsel %vm371_vm2, %v5517_v2, %v370_v54  ;;  %v3475_v2 = vor.u32 %v4754_v20, %v3472_v21  ;;  %v3603_v54 = vor.u32 %v4786_v49, %v3600_v53  ;;  %v3544_v21 = vld [vmem:[#allocation11 + $0xb8] sm:$0xf0]  ;;  %v4763_v49 = vld [vmem:[#allocation11 + $0x6c] sm:$0xf] }
  0xbb   :  { %v224_v58 = vpop.f32.mrf.mxu0  ;;  %334 = vmatmul.bf16.vlgmr.msra.gmra.mxu1 %v229_v57  ;;  %347 = vmatmul.bf16.vlgmr.msra.gmra.mxu2 %v229_v57  ;;  %v4798_v57 = vld [vmem:[#allocation11 + $0x184] sm:$0xf]  ;;  %v3547_v25 = vor.u32 %v4771_v18, %v3544_v21  ;;  %v3512_v53 = vld [vmem:[#allocation11 + $0x78] sm:$0xf0]  ;;  %v3622_v21 = vld [vmem:[#allocation11 + $0x148] sm:$0xf] }
  0xbc   :  { %v3648_v58 = vld [vmem:[#allocation11 + $0x190] sm:$0xf0]  ;;  %841 = vmatpush.bf16.msrb.mxu0 %v3647_v56  ;;  %857 = vmatpush.bf16.msrb.mxu1 %v3475_v2  ;;  %v3558_v56 = vld [vmem:[#allocation11 + $0xc8] sm:$0xf] }
  0xbd   :  { %v3651_v61 = vor.u32 %v4798_v57, %v3648_v58  ;;  %v4777_v57 = vld [vmem:[#allocation11 + $0xd4] sm:$0xf0]  ;;  %v4775_v58 = vld [vmem:[#allocation11 + $0xcc] sm:$0xf] }
  0xbe   :  { %v3563_v1 = vor.u32 %v4775_v58, %v3560_v62  ;;  %v4799_v58 = vld [vmem:[#allocation11 + $0x18c] sm:$0xf]  ;;  %v3656_v62 = vld [vmem:[#allocation11 + $0x198] sm:$0xf0] }
  0xbf   :  { %867 = vmatpush.bf16.msrb.mxu2 %v3651_v61  ;;  %v3559_v61 = vor.u32 %v4777_v57, %v3558_v56  ;;  %v3654_v56 = vld [vmem:[#allocation11 + $0x188] sm:$0xf]  ;;  %v4801_v57 = vld [vmem:[#allocation11 + $0x194] sm:$0xf0] }
  0xc0   :  { %842 = vmatpush.bf16.msrb.mxu0 %v3631_v11  ;;  %858 = vmatpush.bf16.msrb.mxu1 %v3459_v42  ;;  %v4813_v11 = vld [vmem:[#allocation11 + $0x1f4] sm:$0xf0]  ;;  %v4803_v42 = vld [vmem:[#allocation11 + $0x1ac] sm:$0xf] }
  0xc3   :  { %868 = vmatpush.bf16.msrb.mxu2 %v3635_v16 }
  0xc4   :  { %843 = vmatpush.bf16.msrb.mxu0 %v3615_v28  ;;  %v3688_v28 = vld [vmem:[#allocation11 + $0x1d8] sm:$0xf0] }
  0xc7   :  { %869 = vmatpush.bf16.msrb.mxu2 %v3619_v33  ;;  %v4769_v33 = vld [vmem:[#allocation11 + $0x94] sm:$0xf0] }
  0xc8   :  { %844 = vmatpush.bf16.msrb.mxu0 %v3599_v52  ;;  %v3511_v52 = vor.u32 %v4765_v48, %v3510_v47 }
  0xcb   :  { %870 = vmatpush.bf16.msrb.mxu2 %v3603_v54  ;;  %v3515_v54 = vor.u32 %v4763_v49, %v3512_v53  ;;  %v4783_v53 = vld [vmem:[#allocation11 + $0x10c] sm:$0xf] }
 0x138   :  { %v5520_v32 = vpop.f32.mrf.mxu1 }
 0x139   :  { %v354_v35 = vrot.slane %v5520_v32, 4 }
 0x13b   :  { %v355_v43 = vadd.f32 %v354_v35, %v5520_v32  ;;  %v4752_v35 = vld [vmem:[#allocation11 + $0xc] sm:$0xf0] }
 0x13c   :  { %v3455_v36 = vor.u32 %v4752_v35, %v3454_v34  ;;  %v4767_v34 = vld [vmem:[#allocation11 + $0x8c] sm:$0xf] }
 0x13d   :  { %v356_v50 = vrot.slane %v355_v43, 2 }
 0x13e   :  { %v5526_v55 = vpop.f32.mrf.mxu2  ;;  %832 = vmatpush.bf16.msra.mxu3 %v3455_v36 }
 0x13f   :  { %v357_v59 = vadd.f32 %v356_v50, %v355_v43  ;;  %v360_v60 = vrot.slane %v5526_v55, 4  ;;  %v4781_v43 = vld [vmem:[#allocation11 + $0xf4] sm:$0xf0] }
 0x140   :  { %v337_v0 = vpop.f32.mrf.mxu1  ;;  %v3575_v45 = vor.u32 %v4781_v43, %v3574_v39  ;;  %v3531_v39 = vor.u32 %v4767_v34, %v3528_v38 }
 0x141   :  { %v358_v5 = vrot.slane %v357_v59, 1  ;;  %v361_v6 = vadd.f32 %v360_v60, %v5526_v55  ;;  %v4784_v0 = vld [vmem:[#allocation11 + $0x10c] sm:$0xf0] }
 0x142   :  { %877 = vmatpush.bf16.msrb.mxu3 %v3575_v45  ;;  %v3583_v3 = vor.u32 %v4784_v0, %v3582_v63  ;;  %v3672_v45 = vld [vmem:[#allocation11 + $0x1b8] sm:$0xf0]  ;;  %v3494_v63 = vld [vmem:[#allocation11 + $0x48] sm:$0xf]  ;;  %v4761_v0 = vld [vmem:[#allocation11 + $0x54] sm:$0xf0] }
 0x143   :  { %v359_v14 = vadd.f32 %v358_v5, %v357_v59  ;;  %v362_v15 = vrot.slane %v361_v6, 2  ;;  %v3584_v5 = vld [vmem:[#allocation11 + $0x110] sm:$0xf0] }
 0x144   :  { %v3587_v9 = vor.u32 %v4782_v4, %v3584_v5  ;;  %845 = vmatpush.bf16.msrb.mxu0 %v3583_v3  ;;  %v3495_v3 = vor.u32 %v4761_v0, %v3494_v63  ;;  %v4759_v4 = vld [vmem:[#allocation11 + $0x4c] sm:$0xf]  ;;  %v3496_v5 = vld [vmem:[#allocation11 + $0x58] sm:$0xf0] }
 0x145   :  { %v373_v22 = vmul.f32 %v5534_v10, %v359_v14  ;;  %v363_v23 = vadd.f32 %v362_v15, %v361_v6  ;;  %v3702_v6 = vld [vmem:[#allocation11 + $0x1e8] sm:$0xf]  ;;  %v4773_v15 = vld [vmem:[#allocation11 + $0xb4] sm:$0xf0] }
 0x146   :  { %v350_v27 = vpop.f32.mrf.mxu2  ;;  %878 = vmatpush.bf16.msrb.mxu3 %v3559_v61  ;;  %v3542_v14 = vld [vmem:[#allocation11 + $0xa8] sm:$0xf]  ;;  %871 = vmatpush.bf16.msrb.mxu2 %v3587_v9  ;;  %v3655_v61 = vor.u32 %v4801_v57, %v3654_v56  ;;  %v4797_v9 = vld [vmem:[#allocation11 + $0x174] sm:$0xf0]  ;;  %v3592_v56 = vld [vmem:[#allocation11 + $0x118] sm:$0xf0] }
 0x147   :  { %v5538_v30 = vsub.f32 %v5520_v32, %v373_v22  ;;  %v364_v31 = vrot.slane %v363_v23, 1  ;;  %v3576_v32 = vld [vmem:[#allocation11 + $0xf8] sm:$0xf0]  ;;  %v3543_v20 = vor.u32 %v4773_v15, %v3542_v14  ;;  %v3686_v22 = vld [vmem:[#allocation11 + $0x1c8] sm:$0xf] }
 0x148   :  { %v3579_v46 = vor.u32 %v4779_v44, %v3576_v32  ;;  %v4807_v27 = vld [vmem:[#allocation11 + $0x1cc] sm:$0xf]  ;;  %v3478_v15 = vld [vmem:[#allocation11 + $0x28] sm:$0xf]  ;;  %v353_v57 = vld [vmem:[#allocation10] sm:$0x3] }
 0x149   :  { %v377_v40 = vmul.f32 %v5538_v30, %v5538_v30  ;;  %v365_v41 = vadd.f32 %v364_v31, %v363_v23  ;;  %v4809_v23 = vld [vmem:[#allocation11 + $0x1d4] sm:$0xf0]  ;;  %v3691_v29 = vor.u32 %v4807_v27, %v3688_v28  ;;  %v3526_v31 = vld [vmem:[#allocation11 + $0x88] sm:$0xf] }
 0x14a   :  { %903 = vmatpush.bf16.msra.mxu1 %v3579_v46  ;;  %v3687_v26 = vor.u32 %v4809_v23, %v3686_v22  ;;  %916 = vmatpush.bf16.msra.mxu2 %v3707_v19  ;;  %v3527_v37 = vor.u32 %v4769_v33, %v3526_v31  ;;  %v3675_v46 = vor.u32 %v4803_v42, %v3672_v45  ;;  %v4793_v22 = vld [vmem:[#allocation11 + $0x154] sm:$0xf0]  ;;  %v3462_v27 = vld [vmem:[#allocation11 + $0x8] sm:$0xf] }
 0x14b   :  { %v379_v50 = vrot.slane %v377_v40, 4  ;;  %v374_v51 = vmul.f32 %v5534_v10, %v365_v41  ;;  %879 = vmatpush.bf16.msrb.mxu3 %v3543_v20  ;;  %v4805_v41 = vld [vmem:[#allocation11 + $0x1b4] sm:$0xf0]  ;;  %v3480_v20 = vld [vmem:[#allocation11 + $0x38] sm:$0xf0] }
 0x14c   :  { %v4753_v28 = vld [vmem:[#allocation11 + $0x14] sm:$0xf0] }
 0x14d   :  { %v380_v59 = vadd.f32 %v379_v50, %v377_v40  ;;  %v5544_v60 = vsub.f32 %v5526_v55, %v374_v51  ;;  %v3703_v55 = vor.u32 %v4813_v11, %v3702_v6  ;;  %v3670_v40 = vld [vmem:[#allocation11 + $0x1a8] sm:$0xf]  ;;  %v4795_v11 = vld [vmem:[#allocation11 + $0x16c] sm:$0xf]  ;;  %v3463_v34 = vor.u32 %v4753_v28, %v3462_v27 }
 0x14e   :  { %904 = vmatpush.bf16.msra.mxu1 %v3563_v1  ;;  %v3671_v32 = vor.u32 %v4805_v41, %v3670_v40  ;;  %917 = vmatpush.bf16.msra.mxu2 %v3691_v29  ;;  %v3659_v1 = vor.u32 %v4799_v58, %v3656_v62  ;;  %v3643_v14 = vor.u32 %v4795_v11, %v3640_v13  ;;  %v4751_v29 = vld [vmem:[#allocation11 + $0xc] sm:$0xf]  ;;  %v3608_v40 = vld [vmem:[#allocation11 + $0x138] sm:$0xf0]  ;;  %v428_v11 = vperm.slane %v353_v57, 1 }
 0x14f   :  { %v381_v7 = vrot.slane %v380_v59, 2  ;;  %v378_v8 = vmul.f32 %v5544_v60, %v5544_v60  ;;  %890 = vmatpush.bf16.msra.mxu0 %v3703_v55  ;;  %880 = vmatpush.bf16.msrb.mxu3 %v3527_v37  ;;  %v4789_v37 = vld [vmem:[#allocation11 + $0x134] sm:$0xf0]  ;;  %v352_v41 = vld [vmem:[#allocation8] sm:$0x3] }
 0x150   :  { %v416_v47 = vperm.slane %v352_v41, 0  ;;  %v4158_v27 = vld [vmem:[#allocation16 + $0x380] sm:$0xf] }
 0x151   :  { %v382_v16 = vadd.f32 %v381_v7, %v380_v59  ;;  %v385_v17 = vrot.slane %v378_v8, 4  ;;  %v3499_v7 = vor.u32 %v4759_v4, %v3496_v5  ;;  %v4930_v28 = vld [vmem:[#allocation16 + $0x39c] sm:$0xf0] }
 0x152   :  { %905 = vmatpush.bf16.msra.mxu1 %v3547_v25  ;;  %918 = vmatpush.bf16.msra.mxu2 %v3675_v46  ;;  %v4791_v25 = vld [vmem:[#allocation11 + $0x14c] sm:$0xf] }
 0x153   :  { %v383_v2 = vrot.slane %v382_v16, 1  ;;  %v386_v24 = vadd.f32 %v385_v17, %v378_v8  ;;  %891 = vmatpush.bf16.msra.mxu0 %v3687_v26  ;;  %881 = vmatpush.bf16.msrb.mxu3 %v3511_v52  ;;  %v3638_v8 = vld [vmem:[#allocation11 + $0x168] sm:$0xf]  ;;  %v4755_v17 = vld [vmem:[#allocation11 + $0x2c] sm:$0xf] }
 0x154   :  { %v3639_v55 = vor.u32 %v4797_v9, %v3638_v8  ;;  %v3624_v26 = vld [vmem:[#allocation11 + $0x158] sm:$0xf0]  ;;  %v4785_v52 = vld [vmem:[#allocation11 + $0x114] sm:$0xf0] }
 0x155   :  { %v384_v35 = vadd.f32 %v383_v2, %v382_v16  ;;  %v387_v36 = vrot.slane %v386_v24, 2  ;;  %v4757_v16 = vld [vmem:[#allocation11 + $0x34] sm:$0xf0]  ;;  %v3483_v2 = vor.u32 %v4755_v17, %v3480_v20  ;;  %v3627_v33 = vor.u32 %v4791_v25, %v3624_v26  ;;  %v4866_v20 = vld [vmem:[#allocation16 + $0x19c] sm:$0xf0] }
 0x156   :  { %906 = vmatpush.bf16.msra.mxu1 %v3531_v39  ;;  %919 = vmatpush.bf16.msra.mxu2 %v3659_v1  ;;  %v3479_v19 = vor.u32 %v4757_v16, %v3478_v15  ;;  %v4787_v39 = vld [vmem:[#allocation11 + $0x12c] sm:$0xf]  ;;  %v427_v1 = vperm.slane %v353_v57, 0  ;;  %v4858_v25 = vld [vmem:[#allocation16 + $0x15c] sm:$0xf0] }
 0x157   :  { %v391_v43 = vmul.f32 %v384_v35, %v5534_v10  ;;  %v388_v44 = vadd.f32 %v387_v36, %v386_v24  ;;  %892 = vmatpush.bf16.msra.mxu0 %v3671_v32  ;;  %882 = vmatpush.bf16.msrb.mxu3 %v3495_v3  ;;  %v3623_v24 = vor.u32 %v4793_v22, %v3622_v21  ;;  %v3464_v35 = vld [vmem:[#allocation11 + $0x18] sm:$0xf0]  ;;  %v3606_v36 = vld [vmem:[#allocation11 + $0x128] sm:$0xf] }
 0x158   :  { %v3467_v38 = vor.u32 %v4751_v29, %v3464_v35  ;;  %v3611_v46 = vor.u32 %v4787_v39, %v3608_v40  ;;  %v4190_v22 = vld [vmem:[#allocation16 + $0x3c0] sm:$0xf]  ;;  %v4159_v29 = vor.u32 %v4930_v28, %v4158_v27  ;;  %v3936_v27 = vld [vmem:[#allocation16 + $0x1e0] sm:$0xf0] }
 0x159   :  { %v5549_v50 = vadd.f32 1e-05, %v391_v43  ;;  %v389_v51 = vrot.slane %v388_v44, 1  ;;  %v3607_v43 = vor.u32 %v4789_v37, %v3606_v36  ;;  %v4126_v35 = vld [vmem:[#allocation16 + $0x340] sm:$0xf] }
 0x15a   :  { %907 = vmatpush.bf16.msra.mxu1 %v3515_v54  ;;  %920 = vmatpush.bf16.msra.mxu2 %v3643_v14  ;;  %v4922_v36 = vld [vmem:[#allocation16 + $0x35c] sm:$0xf0] }
 0x15b   :  { %5093 = vrsqrt.f32 %v5549_v50  ;;  %v390_v59 = vadd.f32 %v389_v51, %v388_v44  ;;  %893 = vmatpush.bf16.msra.mxu0 %v3655_v61  ;;  %883 = vmatpush.bf16.msrb.mxu3 %v3479_v19  ;;  %vm401_vm4 = vweird.f32 %v5549_v50  ;;  %v3590_v51 = vld [vmem:[#allocation11 + $0x108] sm:$0xf]  ;;  %v3595_v61 = vor.u32 %v4783_v53, %v3592_v56 }
 0x15c   :  { %v3591_v54 = vor.u32 %v4785_v52, %v3590_v51  ;;  %v3806_v39 = vld [vmem:[#allocation16 + $0xc0] sm:$0xf] }
 0x15d   :  { %v392_v6 = vmul.f32 %v390_v59, %v5534_v10  ;;  %v4842_v40 = vld [vmem:[#allocation16 + $0xdc] sm:$0xf0] }
 0x15e   :  { %908 = vmatpush.bf16.msra.mxu1 %v3499_v7  ;;  %921 = vmatpush.bf16.msra.mxu2 %v3627_v33  ;;  %v4850_v33 = vld [vmem:[#allocation16 + $0x11c] sm:$0xf0] }
 0x15f   :  { %v5553_v12 = vadd.f32 1e-05, %v392_v6  ;;  %894 = vmatpush.bf16.msra.mxu0 %v3639_v55  ;;  %884 = vmatpush.bf16.msrb.mxu3 %v3463_v34  ;;  %v3998_v28 = vld [vmem:[#allocation16 + $0x240] sm:$0xf] }
 0x161   :  { %v5094_v18 = vpop.eup %5093  ;;  %5095 = vrsqrt.f32 %v5553_v12  ;;  %vm411_vm7 = vweird.f32 %v5553_v12 }
 0x162   :  { %v396_v23 = vmul.f32 %v5094_v18, %v5549_v50  ;;  %909 = vmatpush.bf16.msra.mxu1 %v3483_v2  ;;  %vm402_vm3 = vweird.f32 %v5094_v18  ;;  %922 = vmatpush.bf16.msra.mxu2 %v3611_v46  ;;  %v417_v50 = vperm.slane %v352_v41, 1  ;;  %v4446_v41 = vld [vmem:[#allocation16 + $0x5c0] sm:$0xf] }
 0x163   :  { %895 = vmatpush.bf16.msra.mxu0 %v3623_v24  ;;  %vm403_vm5 = vmor %vm401_vm4, %vm402_vm3  ;;  %v3870_v24 = vld [vmem:[#allocation16 + $0x140] sm:$0xf] }
 0x164   :  { %v397_v31 = vmul.f32 %v5094_v18, %v396_v23  ;;  %v4938_v23 = vld [vmem:[#allocation16 + $0x3dc] sm:$0xf0]  ;;  %v3871_v26 = vor.u32 %v4858_v25, %v3870_v24 }
 0x165   :  { %v4191_v2 = vor.u32 %v4938_v23, %v4190_v22  ;;  %v4350_v22 = vld [vmem:[#allocation16 + $0x500] sm:$0xf] }
 0x166   :  { %v398_v42 = vmul.f32 0.5, %v397_v31  ;;  %910 = vmatpush.bf16.msra.mxu1 %v3467_v38  ;;  %923 = vmatpush.bf16.msra.mxu2 %v3595_v61  ;;  %v3838_v31 = vld [vmem:[#allocation16 + $0x100] sm:$0xf]  ;;  %v4127_v38 = vor.u32 %v4922_v36, %v4126_v35 }
 0x167   :  { %v5096_v44 = vpop.eup %5095  ;;  %896 = vmatpush.bf16.msra.mxu0 %v3607_v43  ;;  %v3839_v34 = vor.u32 %v4850_v33, %v3838_v31  ;;  %v5002_v43 = vld [vmem:[#allocation16 + $0x5dc] sm:$0xf0] }
 0x168   :  { %v399_v32 = vsub.f32 1.5, %v398_v42  ;;  %v406_v45 = vmul.f32 %v5096_v44, %v5553_v12  ;;  %vm412_vm6 = vweird.f32 %v5096_v44  ;;  %v3807_v42 = vor.u32 %v4842_v40, %v3806_v39  ;;  %v4702_v61 = vld [vmem:[#allocation16 + $0x7c0] sm:$0xf] }
 0x169   :  { %vm413_vm8 = vmor %vm411_vm7, %vm412_vm6  ;;  %v4978_v23 = vld [vmem:[#allocation16 + $0x51c] sm:$0xf0] }
 0x16a   :  { %v400_v48 = vmul.f32 %v5094_v18, %v399_v32  ;;  %v407_v49 = vmul.f32 %v5096_v44, %v406_v45  ;;  %v4094_v32 = vld [vmem:[#allocation16 + $0x300] sm:$0xf] }
 0x16b   :  { %897 = vmatpush.bf16.msra.mxu0 %v3591_v54  ;;  %v4914_v45 = vld [vmem:[#allocation16 + $0x31c] sm:$0xf0] }
 0x16c   :  { %v404_v58 = vsel %vm403_vm5, %v5094_v18, %v400_v48  ;;  %v408_v59 = vmul.f32 0.5, %v407_v49  ;;  %v4874_v18 = vld [vmem:[#allocation16 + $0x1dc] sm:$0xf0]  ;;  %v4095_v46 = vor.u32 %v4914_v45, %v4094_v32 }
 0x16d   :  { %v420_v62 = vmul.f32 %v416_v47, %v404_v58  ;;  %v3774_v47 = vld [vmem:[#allocation16 + $0x80] sm:$0xf] }
 0x16e   :  { %v409_v63 = vsub.f32 1.5, %v408_v59  ;;  %v4834_v48 = vld [vmem:[#allocation16 + $0x9c] sm:$0xf0] }
 0x16f   :  { %v422_v0 = vperm.slane %v420_v62, 0  ;;  %v4414_v49 = vld [vmem:[#allocation16 + $0x580] sm:$0xf]  ;;  %v3775_v53 = vor.u32 %v4834_v48, %v3774_v47 }
 0x170   :  { %v410_v3 = vmul.f32 %v5096_v44, %v409_v63  ;;  %v4994_v54 = vld [vmem:[#allocation16 + $0x59c] sm:$0xf0] }
 0x171   :  { %v424_v4 = vmul.f32 %v422_v0, %v5538_v30  ;;  %v3934_v30 = vld [vmem:[#allocation16 + $0x1c0] sm:$0xf]  ;;  %v4415_v57 = vor.u32 %v4994_v54, %v4414_v49  ;;  %v4934_v54 = vld [vmem:[#allocation16 + $0x3c4] sm:$0xf] }
 0x172   :  { %v414_v5 = vsel %vm413_vm8, %v5096_v44, %v410_v3  ;;  %v3935_v19 = vor.u32 %v4874_v18, %v3934_v30  ;;  %v4447_v44 = vor.u32 %v5002_v43, %v4446_v41  ;;  %v4062_v58 = vld [vmem:[#allocation16 + $0x2c0] sm:$0xf]  ;;  %v4862_v43 = vld [vmem:[#allocation16 + $0x184] sm:$0xf] }
 0x173   :  { %v431_v6 = vadd.f32 %v427_v1, %v424_v4  ;;  %v421_v7 = vmul.f32 %v417_v50, %v414_v5  ;;  %v4906_v59 = vld [vmem:[#allocation16 + $0x2dc] sm:$0xf0] }
 0x174   :  { %v4063_v63 = vor.u32 %v4906_v59, %v4062_v58  ;;  %v5066_v0 = vld [vmem:[#allocation16 + $0x7dc] sm:$0xf0] }
 0x175   :  { %v435_v8 = vmul.f32 0.2, %v431_v6  ;;  %v423_v9 = vperm.slane %v421_v7, 0  ;;  %vm433_vm9 = vcmp.gt.f32.partialorder %v431_v6, 0.0  ;;  %v4703_v50 = vor.u32 %v5066_v0, %v4702_v61  ;;  %v3742_v3 = vld [vmem:[#allocation16 + $0x40] sm:$0xf] }
 0x176   :  { %v4826_v4 = vld [vmem:[#allocation16 + $0x5c] sm:$0xf0]  ;;  %v4192_v61 = vld [vmem:[#allocation16 + $0x3e0] sm:$0xf0] }
 0x177   :  { %v425_v55 = vmul.f32 %v423_v9, %v5544_v60  ;;  %v437_v13 = vsel %vm433_vm9, %v431_v6, %v435_v8  ;;  %v3902_v60 = vld [vmem:[#allocation16 + $0x180] sm:$0xf]  ;;  %v3743_v5 = vor.u32 %v4826_v4, %v3742_v3  ;;  %v4854_v4 = vld [vmem:[#allocation16 + $0x144] sm:$0xf] }
 0x178   :  { %v439_v14 = vpack.c.bf16 %v437_v13, %v437_v13  ;;  %v3903_v21 = vor.u32 %v4866_v20, %v3902_v60  ;;  %v4382_v6 = vld [vmem:[#allocation16 + $0x540] sm:$0xf] }
 0x179   :  { %v432_v15 = vadd.f32 %v428_v11, %v425_v55  ;;  %v4986_v7 = vld [vmem:[#allocation16 + $0x55c] sm:$0xf0] }
 0x17a   :  { %833 = vmatmul.bf16.vlgmr.msra.gmra.mxu3 %v439_v14  ;;  %859 = vmatmul.bf16.vlgmr.msrb.gmra.mxu1 %v439_v14  ;;  %v4383_v9 = vor.u32 %v4986_v7, %v4382_v6  ;;  %v4030_v11 = vld [vmem:[#allocation16 + $0x280] sm:$0xf] }
 0x17b   :  { %v436_v16 = vmul.f32 0.2, %v432_v15  ;;  %vm434_vm10 = vcmp.gt.f32.partialorder %v432_v15, 0.0  ;;  %2625 = vmatpush.bf16.msra.mxu3 %v3935_v19  ;;  %2651 = vmatpush.bf16.msrb.mxu1 %v4447_v44  ;;  %v4898_v55 = vld [vmem:[#allocation16 + $0x29c] sm:$0xf0] }
 0x17c   :  { %v4670_v13 = vld [vmem:[#allocation16 + $0x780] sm:$0xf]  ;;  %v3904_v44 = vld [vmem:[#allocation16 + $0x1a0] sm:$0xf0] }
 0x17d   :  { %v438_v12 = vsel %vm434_vm10, %v432_v15, %v436_v16  ;;  %v4031_v15 = vor.u32 %v4898_v55, %v4030_v11  ;;  %v5058_v16 = vld [vmem:[#allocation16 + $0x79c] sm:$0xf0] }
 0x17e   :  { %v440_v17 = vpack.c.bf16 %v438_v12, %v438_v12  ;;  %v4671_v30 = vor.u32 %v5058_v16, %v4670_v13  ;;  %v3710_v18 = vld [vmem:[#allocation16] sm:$0xf]  ;;  %v4160_v16 = vld [vmem:[#allocation16 + $0x3a0] sm:$0xf0] }
 0x17f   :  { %2626 = vmatpush.bf16.msra.mxu3 %v3903_v21  ;;  %2652 = vmatpush.bf16.msrb.mxu1 %v4415_v57  ;;  %v4818_v19 = vld [vmem:[#allocation16 + $0x1c] sm:$0xf0] }
 0x180   :  { %846 = vmatmul.bf16.vlgmr.msrb.gmra.mxu0 %v440_v17  ;;  %872 = vmatmul.bf16.vlgmr.msrb.gmra.mxu2 %v440_v17  ;;  %v3711_v21 = vor.u32 %v4818_v19, %v3710_v18  ;;  %v4890_v33 = vld [vmem:[#allocation16 + $0x25c] sm:$0xf0] }
 0x181   :  { %2638 = vmatpush.bf16.msrb.mxu0 %v4191_v2  ;;  %2664 = vmatpush.bf16.msrb.mxu2 %v4703_v50  ;;  %v4870_v2 = vld [vmem:[#allocation16 + $0x1c4] sm:$0xf]  ;;  %v5050_v35 = vld [vmem:[#allocation16 + $0x75c] sm:$0xf0]  ;;  %v4195_v50 = vor.u32 %v4934_v54, %v4192_v61 }
 0x182   :  { %v3939_v31 = vor.u32 %v4870_v2, %v3936_v27  ;;  %v4318_v40 = vld [vmem:[#allocation16 + $0x4c0] sm:$0xf] }
 0x183   :  { %2627 = vmatpush.bf16.msra.mxu3 %v3871_v26  ;;  %2653 = vmatpush.bf16.msrb.mxu1 %v4383_v9  ;;  %v4351_v26 = vor.u32 %v4978_v23, %v4350_v22  ;;  %v4970_v41 = vld [vmem:[#allocation16 + $0x4dc] sm:$0xf0]  ;;  %v3840_v22 = vld [vmem:[#allocation16 + $0x120] sm:$0xf0] }
 0x184   :  { %v3966_v47 = vld [vmem:[#allocation16 + $0x200] sm:$0xf] }
 0x185   :  { %2639 = vmatpush.bf16.msrb.mxu0 %v4159_v29  ;;  %2665 = vmatpush.bf16.msrb.mxu2 %v4671_v30  ;;  %v4882_v48 = vld [vmem:[#allocation16 + $0x21c] sm:$0xf0] }
 0x186   :  { %v4574_v11 = vld [vmem:[#allocation16 + $0x6c0] sm:$0xf] }
 0x187   :  { %2628 = vmatpush.bf16.msra.mxu3 %v3839_v34  ;;  %v4638_v34 = vld [vmem:[#allocation16 + $0x740] sm:$0xf]  ;;  %2654 = vmatpush.bf16.msrb.mxu1 %v4351_v26 }
 0x188   :  { %v4639_v39 = vor.u32 %v5050_v35, %v4638_v34  ;;  %v5034_v55 = vld [vmem:[#allocation16 + $0x6dc] sm:$0xf0]  ;;  %v4128_v34 = vld [vmem:[#allocation16 + $0x360] sm:$0xf0] }
 0x189   :  { %2640 = vmatpush.bf16.msrb.mxu0 %v4127_v38  ;;  %v3999_v38 = vor.u32 %v4890_v33, %v3998_v28  ;;  %v4254_v19 = vld [vmem:[#allocation16 + $0x440] sm:$0xf]  ;;  %v4918_v33 = vld [vmem:[#allocation16 + $0x344] sm:$0xf] }
 0x18a   :  { %885 = vmatmul.bf16.vlgmr.msrb.gmra.mxu3 %v439_v14  ;;  %911 = vmatmul.bf16.vlgmr.msra.gmra.mxu1 %v439_v14  ;;  %v5026_v26 = vld [vmem:[#allocation16 + $0x69c] sm:$0xf0] }
 0x18b   :  { %2629 = vmatpush.bf16.msra.mxu3 %v3807_v42  ;;  %v4319_v42 = vor.u32 %v4970_v41, %v4318_v40  ;;  %2666 = vmatpush.bf16.msrb.mxu2 %v4639_v39  ;;  %v4222_v39 = vld [vmem:[#allocation16 + $0x400] sm:$0xf] }
 0x18c   :  { %v4946_v40 = vld [vmem:[#allocation16 + $0x41c] sm:$0xf0] }
 0x18d   :  { %2641 = vmatpush.bf16.msrb.mxu0 %v4095_v46  ;;  %v3907_v46 = vor.u32 %v4862_v43, %v3904_v44  ;;  %2655 = vmatpush.bf16.msrb.mxu1 %v4319_v42  ;;  %v4131_v43 = vor.u32 %v4918_v33, %v4128_v34  ;;  %v4223_v44 = vor.u32 %v4946_v40, %v4222_v39  ;;  %v5018_v54 = vld [vmem:[#allocation16 + $0x65c] sm:$0xf0]  ;;  %v4894_v39 = vld [vmem:[#allocation16 + $0x284] sm:$0xf] }
 0x18f   :  { %2630 = vmatpush.bf16.msra.mxu3 %v3775_v53  ;;  %v5042_v53 = vld [vmem:[#allocation16 + $0x71c] sm:$0xf0] }
 0x190   :  { %898 = vmatmul.bf16.vlgmr.msra.gmra.mxu0 %v440_v17  ;;  %924 = vmatmul.bf16.vlgmr.msra.gmra.mxu2 %v440_v17 }
 0x191   :  { %2642 = vmatpush.bf16.msrb.mxu0 %v4063_v63  ;;  %v4962_v63 = vld [vmem:[#allocation16 + $0x49c] sm:$0xf0] }
 0x193   :  { %2631 = vmatpush.bf16.msra.mxu3 %v3743_v5  ;;  %v3872_v5 = vld [vmem:[#allocation16 + $0x160] sm:$0xf0] }
 0x194   :  { %v3875_v9 = vor.u32 %v4854_v4, %v3872_v5 }
 0x195   :  { %2643 = vmatpush.bf16.msrb.mxu0 %v4031_v15  ;;  %v4926_v15 = vld [vmem:[#allocation16 + $0x384] sm:$0xf] }
 0x196   :  { %v4163_v18 = vor.u32 %v4926_v15, %v4160_v16  ;;  %v4478_v16 = vld [vmem:[#allocation16 + $0x600] sm:$0xf] }
 0x197   :  { %2632 = vmatpush.bf16.msra.mxu3 %v3711_v21  ;;  %v4846_v21 = vld [vmem:[#allocation16 + $0x104] sm:$0xf] }
 0x198   :  { %v3843_v28 = vor.u32 %v4846_v21, %v3840_v22 }
 0x199   :  { %2644 = vmatpush.bf16.msrb.mxu0 %v3999_v38 }
 0x19b   :  { %2677 = vmatpush.bf16.msrb.mxu3 %v3939_v31 }
 0x19f   :  { %2678 = vmatpush.bf16.msrb.mxu3 %v3907_v46  ;;  %v4998_v46 = vld [vmem:[#allocation16 + $0x5c4] sm:$0xf] }
 0x1a3   :  { %2679 = vmatpush.bf16.msrb.mxu3 %v3875_v9  ;;  %v4990_v9 = vld [vmem:[#allocation16 + $0x584] sm:$0xf] }
 0x1a7   :  { %2680 = vmatpush.bf16.msrb.mxu3 %v3843_v28  ;;  %v3744_v28 = vld [vmem:[#allocation16 + $0x60] sm:$0xf0] }
 0x1f7   :  { %v860_v37 = vpop.f32.mrf.mxu1 }
 0x1fd   :  { %v834_v51 = vpop.f32.mrf.mxu3  ;;  %v847_v52 = vpop.f32.mrf.mxu0 }
 0x1fe   :  { %v5562_v56 = vadd.f32 %v847_v52, %v834_v51  ;;  %v3967_v51 = vor.u32 %v4882_v48, %v3966_v47  ;;  %v4606_v52 = vld [vmem:[#allocation16 + $0x700] sm:$0xf] }
 0x1ff   :  { %v862_v62 = vpop.f32.mrf.mxu1  ;;  %v4607_v59 = vor.u32 %v5042_v53, %v4606_v52 }
 0x200   :  { %v931_v1 = vrot.slane %v5562_v56, 4  ;;  %v4286_v62 = vld [vmem:[#allocation16 + $0x480] sm:$0xf]  ;;  %2645 = vmatpush.bf16.msrb.mxu0 %v3967_v51 }
 0x201   :  { %v4287_v3 = vor.u32 %v4962_v63, %v4286_v62  ;;  %2667 = vmatpush.bf16.msrb.mxu2 %v4607_v59  ;;  %v4510_v51 = vld [vmem:[#allocation16 + $0x640] sm:$0xf] }
 0x202   :  { %v932_v8 = vadd.f32 %v931_v1, %v5562_v56 }
 0x203   :  { %v873_v14 = vpop.f32.mrf.mxu2  ;;  %2656 = vmatpush.bf16.msrb.mxu1 %v4287_v3  ;;  %v3776_v3 = vld [vmem:[#allocation16 + $0xa0] sm:$0xf0] }
 0x204   :  { %v933_v12 = vrot.slane %v932_v8, 2  ;;  %v5566_v17 = vadd.f32 %v873_v14, %v860_v37  ;;  %2690 = vmatpush.bf16.msra.mxu0 %v4195_v50  ;;  %v4575_v14 = vor.u32 %v5034_v55, %v4574_v11  ;;  %v4830_v50 = vld [vmem:[#allocation16 + $0x84] sm:$0xf] }
 0x205   :  { %v836_v60 = vpop.f32.mrf.mxu3  ;;  %v849_v20 = vpop.f32.mrf.mxu0  ;;  %v4416_v11 = vld [vmem:[#allocation16 + $0x5a0] sm:$0xf0] }
 0x206   :  { %v934_v24 = vadd.f32 %v933_v12, %v932_v8  ;;  %v937_v25 = vrot.slane %v5566_v17, 4  ;;  %v4954_v60 = vld [vmem:[#allocation16 + $0x45c] sm:$0xf0]  ;;  %2668 = vmatpush.bf16.msrb.mxu2 %v4575_v14  ;;  %v4419_v15 = vor.u32 %v4990_v9, %v4416_v11 }
 0x207   :  { %v5569_v29 = vpop.f32.mrf.mxu1  ;;  %v4255_v20 = vor.u32 %v4954_v60, %v4254_v19  ;;  %v4902_v19 = vld [vmem:[#allocation16 + $0x2c4] sm:$0xf] }
 0x208   :  { %v935_v36 = vrot.slane %v934_v24, 1  ;;  %v938_v37 = vadd.f32 %v937_v25, %v5566_v17  ;;  %v4542_v25 = vld [vmem:[#allocation16 + $0x680] sm:$0xf]  ;;  %2691 = vmatpush.bf16.msra.mxu0 %v4163_v18  ;;  %v4064_v60 = vld [vmem:[#allocation16 + $0x2e0] sm:$0xf0] }
 0x209   :  { %v4543_v31 = vor.u32 %v5026_v26, %v4542_v25  ;;  %2657 = vmatpush.bf16.msrb.mxu1 %v4255_v20  ;;  %v4067_v22 = vor.u32 %v4902_v19, %v4064_v60 }
 0x20a   :  { %v936_v32 = vadd.f32 %v935_v36, %v934_v24  ;;  %v939_v45 = vrot.slane %v938_v37, 2 }
 0x20b   :  { %v875_v49 = vpop.f32.mrf.mxu2  ;;  %2669 = vmatpush.bf16.msrb.mxu2 %v4543_v31  ;;  %v4982_v31 = vld [vmem:[#allocation16 + $0x544] sm:$0xf] }
 0x20c   :  { %v955_v57 = vmul.f32 %v936_v32, %v5534_v10  ;;  %v940_v58 = vadd.f32 %v939_v45, %v938_v37  ;;  %v4838_v32 = vld [vmem:[#allocation16 + $0xc4] sm:$0xf]  ;;  %2692 = vmatpush.bf16.msra.mxu0 %v4131_v43 }
 0x20d   :  { %v886_v0 = vpop.f32.mrf.mxu3  ;;  %v899_v1 = vpop.f32.mrf.mxu0  ;;  %v3808_v45 = vld [vmem:[#allocation16 + $0xe0] sm:$0xf0]  ;;  %2658 = vmatpush.bf16.msrb.mxu1 %v4223_v44 }
 0x20e   :  { %v5574_v6 = vsub.f32 %v5562_v56, %v955_v57  ;;  %v941_v7 = vrot.slane %v940_v58, 1  ;;  %v5576_v8 = vadd.f32 %v899_v1, %v886_v0  ;;  %v3811_v52 = vor.u32 %v4838_v32, %v3808_v45  ;;  %v4910_v57 = vld [vmem:[#allocation16 + $0x304] sm:$0xf] }
 0x20f   :  { %v914_v13 = vpop.f32.mrf.mxu1  ;;  %v4511_v0 = vor.u32 %v5018_v54, %v4510_v51  ;;  %v4032_v43 = vld [vmem:[#allocation16 + $0x2a0] sm:$0xf0] }
 0x210   :  { %v963_v12 = vmul.f32 %v5574_v6, %v5574_v6  ;;  %v942_v30 = vadd.f32 %v941_v7, %v940_v58  ;;  %v943_v56 = vrot.slane %v5576_v8, 4  ;;  %v4096_v58 = vld [vmem:[#allocation16 + $0x320] sm:$0xf0]  ;;  %2681 = vmatpush.bf16.msrb.mxu3 %v3811_v52  ;;  %v3779_v7 = vor.u32 %v4830_v50, %v3776_v3 }
 0x211   :  { %v4099_v1 = vor.u32 %v4910_v57, %v4096_v58  ;;  %2670 = vmatpush.bf16.msrb.mxu2 %v4511_v0  ;;  %v4035_v45 = vor.u32 %v4894_v39, %v4032_v43  ;;  %v4352_v51 = vld [vmem:[#allocation16 + $0x520] sm:$0xf0] }
 0x212   :  { %v967_v23 = vrot.slane %v963_v12, 4  ;;  %v956_v2 = vmul.f32 %v942_v30, %v5534_v10  ;;  %v944_v24 = vadd.f32 %v943_v56, %v5576_v8  ;;  %v4640_v50 = vld [vmem:[#allocation16 + $0x760] sm:$0xf0] }
 0x213   :  { %v925_v27 = vpop.f32.mrf.mxu2  ;;  %2693 = vmatpush.bf16.msra.mxu0 %v4099_v1  ;;  %v4966_v3 = vld [vmem:[#allocation16 + $0x4c4] sm:$0xf] }
 0x214   :  { %v968_v35 = vadd.f32 %v967_v23, %v963_v12  ;;  %v5584_v36 = vsub.f32 %v5566_v17, %v956_v2  ;;  %v945_v37 = vrot.slane %v944_v24, 2  ;;  %v5587_v38 = vadd.f32 %v925_v27, %v5569_v29  ;;  %v4448_v29 = vld [vmem:[#allocation16 + $0x5e0] sm:$0xf0]  ;;  %v5010_v12 = vld [vmem:[#allocation16 + $0x61c] sm:$0xf0]  ;;  %2682 = vmatpush.bf16.msrb.mxu3 %v3779_v7 }
 0x215   :  { %v888_v41 = vpop.f32.mrf.mxu3  ;;  %v901_v42 = vpop.f32.mrf.mxu0  ;;  %v4451_v53 = vor.u32 %v4998_v46, %v4448_v29  ;;  %v4479_v18 = vor.u32 %v5010_v12, %v4478_v16  ;;  %v5062_v23 = vld [vmem:[#allocation16 + $0x7c4] sm:$0xf] }
 0x216   :  { %v969_v47 = vrot.slane %v968_v35, 2  ;;  %v964_v17 = vmul.f32 %v5584_v36, %v5584_v36  ;;  %v946_v48 = vadd.f32 %v945_v37, %v944_v24  ;;  %v949_v49 = vrot.slane %v5587_v38, 4  ;;  %v4704_v2 = vld [vmem:[#allocation16 + $0x7e0] sm:$0xf0] }
 0x217   :  { %2703 = vmatpush.bf16.msra.mxu1 %v4451_v53  ;;  %v4822_v24 = vld [vmem:[#allocation16 + $0x44] sm:$0xf]  ;;  %v4707_v27 = vor.u32 %v5062_v23, %v4704_v2  ;;  %2671 = vmatpush.bf16.msrb.mxu2 %v4479_v18 }
 0x218   :  { %v970_v59 = vadd.f32 %v969_v47, %v968_v35  ;;  %v973_v61 = vrot.slane %v964_v17, 4  ;;  %v947_v62 = vrot.slane %v946_v48, 1  ;;  %v950_v63 = vadd.f32 %v949_v49, %v5587_v38  ;;  %2694 = vmatpush.bf16.msra.mxu0 %v4067_v22  ;;  %v4384_v37 = vld [vmem:[#allocation16 + $0x560] sm:$0xf0] }
 0x219   :  { %v3747_v35 = vor.u32 %v4822_v24, %v3744_v28  ;;  %v4387_v42 = vor.u32 %v4982_v31, %v4384_v37  ;;  %v4672_v46 = vld [vmem:[#allocation16 + $0x7a0] sm:$0xf0] }
 0x21a   :  { %v971_v4 = vrot.slane %v970_v59, 1  ;;  %v974_v5 = vadd.f32 %v973_v61, %v964_v17  ;;  %v948_v55 = vadd.f32 %v947_v62, %v946_v48  ;;  %v951_v13 = vrot.slane %v950_v63, 2  ;;  %v4814_v47 = vld [vmem:[#allocation16 + $0x4] sm:$0xf] }
 0x21b   :  { %v927_v14 = vpop.f32.mrf.mxu2  ;;  %2704 = vmatpush.bf16.msra.mxu1 %v4419_v15  ;;  %2716 = vmatpush.bf16.msra.mxu2 %v4707_v27  ;;  %v3712_v49 = vld [vmem:[#allocation16 + $0x20] sm:$0xf0] }
 0x21c   :  { %v972_v30 = vadd.f32 %v971_v4, %v970_v59  ;;  %v975_v56 = vrot.slane %v974_v5, 2  ;;  %v957_v20 = vmul.f32 %v948_v55, %v5534_v10  ;;  %v952_v21 = vadd.f32 %v951_v13, %v950_v63  ;;  %2683 = vmatpush.bf16.msrb.mxu3 %v3747_v35  ;;  %v4974_v29 = vld [vmem:[#allocation16 + $0x504] sm:$0xf]  ;;  %2695 = vmatpush.bf16.msra.mxu0 %v4035_v45 }
 0x21d   :  { %v3715_v54 = vor.u32 %v4814_v47, %v3712_v49  ;;  %v4355_v58 = vor.u32 %v4974_v29, %v4352_v51  ;;  %v4886_v59 = vld [vmem:[#allocation16 + $0x244] sm:$0xf]  ;;  %v5619_v47 = vld [vmem:[#allocation14] sm:$0xf] }
 0x21e   :  { %v991_v25 = vmul.f32 %v972_v30, %v5534_v10  ;;  %v976_v26 = vadd.f32 %v975_v56, %v974_v5  ;;  %v5596_v33 = vsub.f32 %v5576_v8, %v957_v20  ;;  %v953_v34 = vrot.slane %v952_v21, 1  ;;  %v5054_v8 = vld [vmem:[#allocation16 + $0x784] sm:$0xf] }
 0x21f   :  { %2705 = vmatpush.bf16.msra.mxu1 %v4387_v42  ;;  %v4675_v48 = vor.u32 %v5054_v8, %v4672_v46  ;;  %v4000_v61 = vld [vmem:[#allocation16 + $0x260] sm:$0xf0] }
 0x220   :  { %v5598_v40 = vadd.f32 1e-05, %v991_v25  ;;  %v977_v41 = vrot.slane %v976_v26, 1  ;;  %v965_v44 = vmul.f32 %v5596_v33, %v5596_v33  ;;  %v954_v32 = vadd.f32 %v953_v34, %v952_v21  ;;  %v5046_v62 = vld [vmem:[#allocation16 + $0x744] sm:$0xf]  ;;  %2684 = vmatpush.bf16.msrb.mxu3 %v3715_v54 }
 0x221   :  { %2717 = vmatpush.bf16.msra.mxu2 %v4675_v48  ;;  %v4003_v1 = vor.u32 %v4886_v59, %v4000_v61  ;;  %v4320_v4 = vld [vmem:[#allocation16 + $0x4e0] sm:$0xf0]  ;;  %v4643_v7 = vor.u32 %v5046_v62, %v4640_v50 }
 0x222   :  { %5097 = vrsqrt.f32 %v5598_v40  ;;  %v978_v17 = vadd.f32 %v977_v41, %v976_v26  ;;  %v979_v52 = vrot.slane %v965_v44, 4  ;;  %v958_v53 = vmul.f32 %v954_v32, %v5534_v10  ;;  %v4878_v13 = vld [vmem:[#allocation16 + $0x204] sm:$0xf]  ;;  %v5614_v26 = vld [vmem:[#allocation13] sm:$0xf] }
 0x223   :  { %2706 = vmatpush.bf16.msra.mxu1 %v4355_v58  ;;  %v4323_v9 = vor.u32 %v4966_v3, %v4320_v4  ;;  %2696 = vmatpush.bf16.msra.mxu0 %v4003_v1  ;;  %v3968_v14 = vld [vmem:[#allocation16 + $0x220] sm:$0xf0]  ;;  %v1040_v32 = vperm.slane %v5614_v26, 0  ;;  %vm1005_vm12 = vweird.f32 %v5598_v40  ;;  %v1041_v3 = vperm.slane %v5614_v26, 1 }
 0x224   :  { %v992_v57 = vmul.f32 %v978_v17, %v5534_v10  ;;  %v980_v63 = vadd.f32 %v979_v52, %v965_v44  ;;  %v5606_v0 = vsub.f32 %v5587_v38, %v958_v53  ;;  %v3971_v38 = vor.u32 %v4878_v13, %v3968_v14  ;;  %v5038_v16 = vld [vmem:[#allocation16 + $0x704] sm:$0xf] }
 0x225   :  { %2718 = vmatpush.bf16.msra.mxu2 %v4643_v7  ;;  %v4608_v12 = vld [vmem:[#allocation16 + $0x720] sm:$0xf0] }
 0x226   :  { %v5608_v5 = vadd.f32 1e-05, %v992_v57  ;;  %v981_v11 = vrot.slane %v980_v63, 2  ;;  %v966_v55 = vmul.f32 %v5606_v0, %v5606_v0  ;;  %v4958_v18 = vld [vmem:[#allocation16 + $0x484] sm:$0xf]  ;;  %v4611_v60 = vor.u32 %v5038_v16, %v4608_v12 }
 0x227   :  { %2707 = vmatpush.bf16.msra.mxu1 %v4323_v9  ;;  %v4288_v20 = vld [vmem:[#allocation16 + $0x4a0] sm:$0xf0]  ;;  %2697 = vmatpush.bf16.msra.mxu0 %v3971_v38 }
 0x228   :  { %v5098_v15 = vpop.eup %5097  ;;  %5099 = vrsqrt.f32 %v5608_v5  ;;  %v982_v56 = vadd.f32 %v981_v11, %v980_v63  ;;  %v985_v19 = vrot.slane %v966_v55, 4  ;;  %v4291_v23 = vor.u32 %v4958_v18, %v4288_v20  ;;  %v5030_v2 = vld [vmem:[#allocation16 + $0x6c4] sm:$0xf] }
 0x229   :  { %v1000_v30 = vmul.f32 %v5098_v15, %v5598_v40  ;;  %2719 = vmatpush.bf16.msra.mxu2 %v4611_v60  ;;  %v4576_v25 = vld [vmem:[#allocation16 + $0x6e0] sm:$0xf0]  ;;  %vm1006_vm11 = vweird.f32 %v5098_v15  ;;  %v1061_v40 = vperm.slane %v5619_v47, 0  ;;  %vm1015_vm15 = vweird.f32 %v5608_v5 }
 0x22a   :  { %v983_v22 = vrot.slane %v982_v56, 1  ;;  %v986_v24 = vadd.f32 %v985_v19, %v966_v55  ;;  %v4579_v31 = vor.u32 %v5030_v2, %v4576_v25  ;;  %v4950_v34 = vld [vmem:[#allocation16 + $0x444] sm:$0xf]  ;;  %vm1007_vm13 = vmor %vm1005_vm12, %vm1006_vm11  ;;  %v1062_v18 = vperm.slane %v5619_v47, 1  ;;  %v4875_v19 = vld [vmem:[#allocation16 + $0x1e4] sm:$0xf0] }
 0x22b   :  { %v1001_v21 = vmul.f32 %v5098_v15, %v1000_v30  ;;  %2708 = vmatpush.bf16.msra.mxu1 %v4291_v23  ;;  %v4256_v39 = vld [vmem:[#allocation16 + $0x460] sm:$0xf0]  ;;  %v4867_v25 = vld [vmem:[#allocation16 + $0x1a4] sm:$0xf0] }
 0x22c   :  { %v984_v28 = vadd.f32 %v983_v22, %v982_v56  ;;  %v987_v37 = vrot.slane %v986_v24, 2  ;;  %v5022_v44 = vld [vmem:[#allocation16 + $0x684] sm:$0xf]  ;;  %v4259_v8 = vor.u32 %v4950_v34, %v4256_v39  ;;  %v4198_v39 = vld [vmem:[#allocation16 + $0x3c8] sm:$0xf] }
 0x22d   :  { %v1002_v27 = vmul.f32 0.5, %v1001_v21  ;;  %2720 = vmatpush.bf16.msra.mxu2 %v4579_v31  ;;  %v4544_v46 = vld [vmem:[#allocation16 + $0x6a0] sm:$0xf0] }
 0x22e   :  { %v5100_v35 = vpop.eup %5099  ;;  %v993_v43 = vmul.f32 %v984_v28, %v5534_v10  ;;  %v988_v45 = vadd.f32 %v987_v37, %v986_v24  ;;  %v4547_v51 = vor.u32 %v5022_v44, %v4544_v46  ;;  %v4942_v52 = vld [vmem:[#allocation16 + $0x404] sm:$0xf]  ;;  %v3910_v24 = vld [vmem:[#allocation16 + $0x188] sm:$0xf] }
 0x22f   :  { %v1003_v41 = vsub.f32 1.5, %v1002_v27  ;;  %v1010_v42 = vmul.f32 %v5100_v35, %v5608_v5  ;;  %2709 = vmatpush.bf16.msra.mxu1 %v4259_v8  ;;  %v4224_v53 = vld [vmem:[#allocation16 + $0x420] sm:$0xf0]  ;;  %vm1016_vm14 = vweird.f32 %v5100_v35  ;;  %v3942_v5 = vld [vmem:[#allocation16 + $0x1c8] sm:$0xf]  ;;  %v3911_v37 = vor.u32 %v4867_v25, %v3910_v24 }
 0x230   :  { %v5622_v49 = vadd.f32 1e-05, %v993_v43  ;;  %v989_v29 = vrot.slane %v988_v45, 1  ;;  %v4227_v61 = vor.u32 %v4942_v52, %v4224_v53  ;;  %v5014_v62 = vld [vmem:[#allocation16 + $0x644] sm:$0xf]  ;;  %vm1017_vm0 = vmor %vm1015_vm15, %vm1016_vm14  ;;  %v3943_v2 = vor.u32 %v4875_v19, %v3942_v5 }
 0x231   :  { %v1004_v17 = vmul.f32 %v5098_v15, %v1003_v41  ;;  %v1011_v48 = vmul.f32 %v5100_v35, %v1010_v42  ;;  %2721 = vmatpush.bf16.msra.mxu2 %v4547_v51  ;;  %v4512_v1 = vld [vmem:[#allocation16 + $0x660] sm:$0xf0]  ;;  %v4939_v41 = vld [vmem:[#allocation16 + $0x3e4] sm:$0xf0] }
 0x232   :  { %5101 = vrsqrt.f32 %v5622_v49  ;;  %v990_v59 = vadd.f32 %v989_v29, %v988_v45  ;;  %v4515_v7 = vor.u32 %v5014_v62, %v4512_v1  ;;  %v5006_v13 = vld [vmem:[#allocation16 + $0x604] sm:$0xf]  ;;  %vm1025_vm3 = vweird.f32 %v5622_v49  ;;  %v3878_v44 = vld [vmem:[#allocation16 + $0x148] sm:$0xf] }
 0x233   :  { %v1008_v54 = vsel %vm1007_vm13, %v5098_v15, %v1004_v17  ;;  %v1012_v57 = vmul.f32 0.5, %v1011_v48  ;;  %2710 = vmatpush.bf16.msra.mxu1 %v4227_v61  ;;  %v4480_v14 = vld [vmem:[#allocation16 + $0x620] sm:$0xf0]  ;;  %v4199_v17 = vor.u32 %v4939_v41, %v4198_v39  ;;  %v4166_v29 = vld [vmem:[#allocation16 + $0x388] sm:$0xf] }
 0x234   :  { %v1048_v58 = vmul.f32 %v1040_v32, %v1008_v54  ;;  %v994_v4 = vmul.f32 %v990_v59, %v5534_v10  ;;  %v4483_v16 = vor.u32 %v5006_v13, %v4480_v14  ;;  %v4859_v32 = vld [vmem:[#allocation16 + $0x164] sm:$0xf0] }
 0x235   :  { %v1013_v63 = vsub.f32 1.5, %v1012_v57  ;;  %2722 = vmatpush.bf16.msra.mxu2 %v4515_v7  ;;  %v4931_v51 = vld [vmem:[#allocation16 + $0x3a4] sm:$0xf0]  ;;  %v3879_v53 = vor.u32 %v4859_v32, %v3878_v44  ;;  %v1063_v57 = vperm.slane %v5619_v47, 2 }
 0x236   :  { %v1052_v50 = vperm.slane %v1048_v58, 0  ;;  %v5630_v55 = vadd.f32 1e-05, %v994_v4  ;;  %v3846_v58 = vld [vmem:[#allocation16 + $0x108] sm:$0xf]  ;;  %v4167_v62 = vor.u32 %v4931_v51, %v4166_v29 }
 0x237   :  { %v1014_v9 = vmul.f32 %v5100_v35, %v1013_v63  ;;  %v4851_v59 = vld [vmem:[#allocation16 + $0x124] sm:$0xf0]  ;;  %v1043_v63 = vperm.slane %v5614_v26, 3 }
 0x238   :  { %v1056_v11 = vmul.f32 %v1052_v50, %v5574_v6  ;;  %v5102_v15 = vpop.eup %5101  ;;  %5103 = vrsqrt.f32 %v5630_v55  ;;  %v4134_v1 = vld [vmem:[#allocation16 + $0x348] sm:$0xf]  ;;  %vm1035_vm7 = vweird.f32 %v5630_v55  ;;  %v3847_v4 = vor.u32 %v4851_v59, %v3846_v58  ;;  %v3944_v58 = vld [vmem:[#allocation16 + $0x1e8] sm:$0xf0] }
 0x239   :  { %v1018_v38 = vsel %vm1017_vm0, %v5100_v35, %v1014_v9  ;;  %v1020_v56 = vmul.f32 %v5102_v15, %v5622_v49  ;;  %2723 = vmatpush.bf16.msra.mxu2 %v4483_v16  ;;  %vm1026_vm2 = vweird.f32 %v5102_v15  ;;  %v1042_v35 = vperm.slane %v5614_v26, 2  ;;  %v4923_v50 = vld [vmem:[#allocation16 + $0x364] sm:$0xf0] }
 0x23a   :  { %v1069_v12 = vadd.f32 %v1061_v40, %v1056_v11  ;;  %v1049_v30 = vmul.f32 %v1041_v3, %v1018_v38  ;;  %vm1027_vm5 = vmor %vm1025_vm3, %vm1026_vm2  ;;  %v3814_v9 = vld [vmem:[#allocation16 + $0xc8] sm:$0xf]  ;;  %v4135_v14 = vor.u32 %v4923_v50, %v4134_v1 }
 0x23b   :  { %v1021_v20 = vmul.f32 %v5102_v15, %v1020_v56  ;;  %v4843_v11 = vld [vmem:[#allocation16 + $0xe4] sm:$0xf0] }
 0x23c   :  { %vm1073_vm1 = vcmp.gt.f32.partialorder %v1069_v12, 0.0  ;;  %v1077_v6 = vmul.f32 0.2, %v1069_v12  ;;  %v1053_v60 = vperm.slane %v1049_v30, 0  ;;  %v5003_v38 = vld [vmem:[#allocation16 + $0x5e4] sm:$0xf0]  ;;  %v3815_v30 = vor.u32 %v4843_v11, %v3814_v9 }
 0x23d   :  { %v1022_v23 = vmul.f32 0.5, %v1021_v20  ;;  %v4102_v16 = vld [vmem:[#allocation16 + $0x308] sm:$0xf]  ;;  %v4863_v11 = vld [vmem:[#allocation16 + $0x18c] sm:$0xf] }
 0x23e   :  { %v1081_v21 = vsel %vm1073_vm1, %v1069_v12, %v1077_v6  ;;  %v1057_v22 = vmul.f32 %v1053_v60, %v5584_v36  ;;  %v5104_v34 = vpop.eup %5103  ;;  %v4915_v12 = vld [vmem:[#allocation16 + $0x324] sm:$0xf0] }
 0x23f   :  { %v5636_v27 = vpack.c.bf16 %v1081_v21, %v1081_v21  ;;  %v1023_v31 = vsub.f32 1.5, %v1022_v23  ;;  %v1030_v43 = vmul.f32 %v5104_v34, %v5630_v55  ;;  %vm1036_vm6 = vweird.f32 %v5104_v34  ;;  %v3782_v19 = vld [vmem:[#allocation16 + $0x88] sm:$0xf] }
 0x240   :  { %v1070_v28 = vadd.f32 %v1062_v18, %v1057_v22  ;;  %vm1037_vm8 = vmor %vm1035_vm7, %vm1036_vm6  ;;  %v1064_v18 = vperm.slane %v5619_v47, 3  ;;  %v4835_v6 = vld [vmem:[#allocation16 + $0xa4] sm:$0xf0]  ;;  %v4103_v20 = vor.u32 %v4915_v12, %v4102_v16  ;;  %v4200_v16 = vld [vmem:[#allocation16 + $0x3e8] sm:$0xf0] }
 0x241   :  { %2633 = vmatmul.bf16.vlgmr.msra.gmra.mxu3 %v5636_v27  ;;  %v1024_v42 = vmul.f32 %v5102_v15, %v1023_v31  ;;  %v1031_v46 = vmul.f32 %v5104_v34, %v1030_v43  ;;  %v4422_v21 = vld [vmem:[#allocation16 + $0x588] sm:$0xf]  ;;  %v3783_v25 = vor.u32 %v4835_v6, %v3782_v19  ;;  %v4855_v6 = vld [vmem:[#allocation16 + $0x14c] sm:$0xf] }
 0x242   :  { %vm1074_vm4 = vcmp.gt.f32.partialorder %v1070_v28, 0.0  ;;  %v1078_v36 = vmul.f32 0.2, %v1070_v28  ;;  %2729 = vmatpush.bf16.msra.mxu3 %v3943_v2  ;;  %v4995_v22 = vld [vmem:[#allocation16 + $0x5a4] sm:$0xf0] }
 0x243   :  { %v1028_v8 = vsel %vm1027_vm5, %v5102_v15, %v1024_v42  ;;  %v1032_v52 = vmul.f32 0.5, %v1031_v46  ;;  %v4454_v15 = vld [vmem:[#allocation16 + $0x5c8] sm:$0xf]  ;;  %v4423_v31 = vor.u32 %v4995_v22, %v4422_v21  ;;  %v4927_v21 = vld [vmem:[#allocation16 + $0x38c] sm:$0xf] }
 0x244   :  { %v1082_v45 = vsel %vm1074_vm4, %v1070_v28, %v1078_v36  ;;  %v1050_v49 = vmul.f32 %v1042_v35, %v1028_v8  ;;  %v4455_v5 = vor.u32 %v5003_v38, %v4454_v15  ;;  %v4070_v2 = vld [vmem:[#allocation16 + $0x2c8] sm:$0xf]  ;;  %v4935_v38 = vld [vmem:[#allocation16 + $0x3cc] sm:$0xf] }
 0x245   :  { %v5642_v48 = vpack.c.bf16 %v1082_v45, %v1082_v45  ;;  %v1033_v61 = vsub.f32 1.5, %v1032_v52  ;;  %v4907_v24 = vld [vmem:[#allocation16 + $0x2e4] sm:$0xf0]  ;;  %v4203_v19 = vor.u32 %v4935_v38, %v4200_v16  ;;  %v4168_v22 = vld [vmem:[#allocation16 + $0x3a8] sm:$0xf0] }
 0x246   :  { %2730 = vmatpush.bf16.msra.mxu3 %v3911_v37  ;;  %v1054_v54 = vperm.slane %v1050_v49, 0  ;;  %v4710_v47 = vld [vmem:[#allocation16 + $0x7c8] sm:$0xf]  ;;  %v4071_v39 = vor.u32 %v4907_v24, %v4070_v2  ;;  %v5063_v38 = vld [vmem:[#allocation16 + $0x7cc] sm:$0xf] }
 0x247   :  { %2646 = vmatmul.bf16.vlgmr.msrb.gmra.mxu0 %v5642_v48  ;;  %v1034_v3 = vmul.f32 %v5104_v34, %v1033_v61  ;;  %v3750_v35 = vld [vmem:[#allocation16 + $0x48] sm:$0xf]  ;;  %v4712_v16 = vld [vmem:[#allocation16 + $0x7e8] sm:$0xf0] }
 0x248   :  { %2742 = vmatpush.bf16.msrb.mxu0 %v4199_v17  ;;  %v1058_v40 = vmul.f32 %v1054_v54, %v5596_v33  ;;  %v4827_v37 = vld [vmem:[#allocation16 + $0x64] sm:$0xf0] }
 0x249   :  { %v1038_v13 = vsel %vm1037_vm8, %v5104_v34, %v1034_v3  ;;  %v5067_v34 = vld [vmem:[#allocation16 + $0x7e4] sm:$0xf0]  ;;  %v3751_v44 = vor.u32 %v4827_v37, %v3750_v35  ;;  %v4847_v35 = vld [vmem:[#allocation16 + $0x10c] sm:$0xf] }
 0x24a   :  { %2731 = vmatpush.bf16.msra.mxu3 %v3879_v53  ;;  %v1071_v7 = vadd.f32 %v1063_v57, %v1058_v40  ;;  %v1051_v26 = vmul.f32 %v1043_v63, %v1038_v13  ;;  %v4390_v41 = vld [vmem:[#allocation16 + $0x548] sm:$0xf]  ;;  %v4711_v8 = vor.u32 %v5067_v34, %v4710_v47  ;;  %v4871_v57 = vld [vmem:[#allocation16 + $0x1cc] sm:$0xf]  ;;  %v4171_v34 = vor.u32 %v4927_v21, %v4168_v22 }
 0x24b   :  { %v4987_v36 = vld [vmem:[#allocation16 + $0x564] sm:$0xf0]  ;;  %v3947_v3 = vor.u32 %v4871_v57, %v3944_v58  ;;  %v3912_v13 = vld [vmem:[#allocation16 + $0x1a8] sm:$0xf0] }
 0x24c   :  { %2743 = vmatpush.bf16.msrb.mxu0 %v4167_v62  ;;  %vm1075_vm9 = vcmp.gt.f32.partialorder %v1071_v7, 0.0  ;;  %v1079_v33 = vmul.f32 0.2, %v1071_v7  ;;  %v1055_v55 = vperm.slane %v1051_v26, 0  ;;  %v4899_v43 = vld [vmem:[#allocation16 + $0x2a4] sm:$0xf0]  ;;  %v4391_v46 = vor.u32 %v4987_v36, %v4390_v41 }
 0x24d   :  { %v4678_v32 = vld [vmem:[#allocation16 + $0x788] sm:$0xf]  ;;  %v3848_v37 = vld [vmem:[#allocation16 + $0x128] sm:$0xf0] }
 0x24e   :  { %2732 = vmatpush.bf16.msra.mxu3 %v3847_v4  ;;  %v1083_v56 = vsel %vm1075_vm9, %v1071_v7, %v1079_v33  ;;  %v1059_v23 = vmul.f32 %v1055_v55, %v5606_v0  ;;  %v4038_v0 = vld [vmem:[#allocation16 + $0x288] sm:$0xf]  ;;  %v4136_v41 = vld [vmem:[#allocation16 + $0x368] sm:$0xf0] }
 0x24f   :  { %v5650_v60 = vpack.c.bf16 %v1083_v56, %v1083_v56  ;;  %v5059_v17 = vld [vmem:[#allocation16 + $0x7a4] sm:$0xf0]  ;;  %v4039_v52 = vor.u32 %v4899_v43, %v4038_v0  ;;  %v4680_v21 = vld [vmem:[#allocation16 + $0x7a8] sm:$0xf0] }
 0x250   :  { %2744 = vmatpush.bf16.msrb.mxu0 %v4135_v14  ;;  %v1072_v28 = vadd.f32 %v1064_v18, %v1059_v23  ;;  %v3718_v49 = vld [vmem:[#allocation16 + $0x8] sm:$0xf]  ;;  %v4679_v40 = vor.u32 %v5059_v17, %v4678_v32  ;;  %v3816_v17 = vld [vmem:[#allocation16 + $0xe8] sm:$0xf0] }
 0x251   :  { %2685 = vmatmul.bf16.vlgmr.msrb.gmra.mxu3 %v5636_v27  ;;  %2659 = vmatmul.bf16.vlgmr.msrb.gmra.mxu1 %v5650_v60  ;;  %v4819_v29 = vld [vmem:[#allocation16 + $0x24] sm:$0xf0] }
 0x252   :  { %2733 = vmatpush.bf16.msra.mxu3 %v3815_v30  ;;  %2755 = vmatpush.bf16.msrb.mxu1 %v4455_v5  ;;  %vm1076_vm10 = vcmp.gt.f32.partialorder %v1072_v28, 0.0  ;;  %v1080_v42 = vmul.f32 0.2, %v1072_v28  ;;  %v4358_v53 = vld [vmem:[#allocation16 + $0x508] sm:$0xf]  ;;  %v3719_v62 = vor.u32 %v4819_v29, %v3718_v49  ;;  %v3915_v30 = vor.u32 %v4863_v11, %v3912_v13 }
 0x253   :  { %v4979_v54 = vld [vmem:[#allocation16 + $0x524] sm:$0xf0]  ;;  %v4999_v49 = vld [vmem:[#allocation16 + $0x5cc] sm:$0xf] }
 0x254   :  { %2745 = vmatpush.bf16.msrb.mxu0 %v4103_v20  ;;  %v1084_v45 = vsel %vm1076_vm10, %v1072_v28, %v1080_v42  ;;  %v4006_v59 = vld [vmem:[#allocation16 + $0x248] sm:$0xf]  ;;  %v4359_v63 = vor.u32 %v4979_v54, %v4358_v53  ;;  %v3880_v20 = vld [vmem:[#allocation16 + $0x168] sm:$0xf0] }
 0x255   :  { %v5656_v51 = vpack.c.bf16 %v1084_v45, %v1084_v45  ;;  %v4891_v61 = vld [vmem:[#allocation16 + $0x264] sm:$0xf0]  ;;  %v4456_v29 = vld [vmem:[#allocation16 + $0x5e8] sm:$0xf0] }
 0x256   :  { %2734 = vmatpush.bf16.msra.mxu3 %v3783_v25  ;;  %2756 = vmatpush.bf16.msrb.mxu1 %v4423_v31  ;;  %v4646_v1 = vld [vmem:[#allocation16 + $0x748] sm:$0xf]  ;;  %v4007_v4 = vor.u32 %v4891_v61, %v4006_v59  ;;  %v3883_v25 = vor.u32 %v4855_v6, %v3880_v20  ;;  %v4104_v53 = vld [vmem:[#allocation16 + $0x328] sm:$0xf0]  ;;  %v4459_v59 = vor.u32 %v4999_v49, %v4456_v29  ;;  %v4206_v29 = vld [vmem:[#allocation16 + $0x3d0] sm:$0xf] }
 0x257   :  { %2698 = vmatmul.bf16.vlgmr.msra.gmra.mxu0 %v5642_v48  ;;  %2672 = vmatmul.bf16.vlgmr.msrb.gmra.mxu2 %v5656_v51  ;;  %v5051_v50 = vld [vmem:[#allocation16 + $0x764] sm:$0xf0]  ;;  %v5055_v20 = vld [vmem:[#allocation16 + $0x78c] sm:$0xf] }
 0x258   :  { %2746 = vmatpush.bf16.msrb.mxu0 %v4071_v39  ;;  %2768 = vmatpush.bf16.msrb.mxu2 %v4711_v8  ;;  %v4326_v7 = vld [vmem:[#allocation16 + $0x4c8] sm:$0xf]  ;;  %v4647_v33 = vor.u32 %v5051_v50, %v4646_v1  ;;  %v4919_v39 = vld [vmem:[#allocation16 + $0x34c] sm:$0xf] }
 0x259   :  { %v4971_v9 = vld [vmem:[#allocation16 + $0x4e4] sm:$0xf0]  ;;  %v4839_v8 = vld [vmem:[#allocation16 + $0xcc] sm:$0xf] }
 0x25a   :  { %2735 = vmatpush.bf16.msra.mxu3 %v3751_v44  ;;  %2757 = vmatpush.bf16.msrb.mxu1 %v4391_v46  ;;  %v3974_v14 = vld [vmem:[#allocation16 + $0x208] sm:$0xf]  ;;  %v4327_v26 = vor.u32 %v4971_v9, %v4326_v7  ;;  %v3851_v44 = vor.u32 %v4847_v35, %v3848_v37  ;;  %v4139_v46 = vor.u32 %v4919_v39, %v4136_v41  ;;  %v3784_v1 = vld [vmem:[#allocation16 + $0xa8] sm:$0xf0] }
 0x25b   :  { %v4883_v15 = vld [vmem:[#allocation16 + $0x224] sm:$0xf0]  ;;  %v3819_v58 = vor.u32 %v4839_v8, %v3816_v17  ;;  %v4991_v50 = vld [vmem:[#allocation16 + $0x58c] sm:$0xf]  ;;  %v4683_v37 = vor.u32 %v5055_v20, %v4680_v21  ;;  %v4868_v8 = vld [vmem:[#allocation16 + $0x1ac] sm:$0xf0] }
 0x25c   :  { %2747 = vmatpush.bf16.msrb.mxu0 %v4039_v52  ;;  %2769 = vmatpush.bf16.msrb.mxu2 %v4679_v40  ;;  %v4614_v12 = vld [vmem:[#allocation16 + $0x708] sm:$0xf]  ;;  %v3975_v56 = vor.u32 %v4883_v15, %v3974_v14  ;;  %v4911_v52 = vld [vmem:[#allocation16 + $0x30c] sm:$0xf]  ;;  %v3822_v20 = vld [vmem:[#allocation16 + $0xd0] sm:$0xf] }
 0x25d   :  { %v5043_v55 = vld [vmem:[#allocation16 + $0x724] sm:$0xf0]  ;;  %v4831_v40 = vld [vmem:[#allocation16 + $0x8c] sm:$0xf] }
 0x25e   :  { %2736 = vmatpush.bf16.msra.mxu3 %v3719_v62  ;;  %2758 = vmatpush.bf16.msrb.mxu1 %v4359_v63  ;;  %v4294_v18 = vld [vmem:[#allocation16 + $0x488] sm:$0xf]  ;;  %v4615_v23 = vor.u32 %v5043_v55, %v4614_v12  ;;  %v4107_v63 = vor.u32 %v4911_v52, %v4104_v53  ;;  %v4072_v7 = vld [vmem:[#allocation16 + $0x2e8] sm:$0xf0]  ;;  %v3787_v13 = vor.u32 %v4831_v40, %v3784_v1  ;;  %v4940_v52 = vld [vmem:[#allocation16 + $0x3ec] sm:$0xf0] }
 0x25f   :  { %v4963_v5 = vld [vmem:[#allocation16 + $0x4a4] sm:$0xf0]  ;;  %v3752_v12 = vld [vmem:[#allocation16 + $0x68] sm:$0xf0]  ;;  %v4207_v40 = vor.u32 %v4940_v52, %v4206_v29  ;;  %v4860_v1 = vld [vmem:[#allocation16 + $0x16c] sm:$0xf0] }
 0x260   :  { %2748 = vmatpush.bf16.msrb.mxu0 %v4007_v4  ;;  %2770 = vmatpush.bf16.msrb.mxu2 %v4647_v33  ;;  %v4295_v2 = vor.u32 %v4963_v5, %v4294_v18  ;;  %v4582_v24 = vld [vmem:[#allocation16 + $0x6c8] sm:$0xf]  ;;  %v4903_v4 = vld [vmem:[#allocation16 + $0x2cc] sm:$0xf]  ;;  %v5068_v29 = vld [vmem:[#allocation16 + $0x7ec] sm:$0xf0] }
 0x261   :  { %2737 = vmatmul.bf16.vlgmr.msra.gmra.mxu3 %v5636_v27  ;;  %2711 = vmatmul.bf16.vlgmr.msra.gmra.mxu1 %v5650_v60  ;;  %v5035_v47 = vld [vmem:[#allocation16 + $0x6e4] sm:$0xf0]  ;;  %v4075_v33 = vor.u32 %v4903_v4, %v4072_v7  ;;  %v4895_v55 = vld [vmem:[#allocation16 + $0x28c] sm:$0xf]  ;;  %v4932_v4 = vld [vmem:[#allocation16 + $0x3ac] sm:$0xf0] }
 0x262   :  { %2781 = vmatpush.bf16.msrb.mxu3 %v3947_v3  ;;  %2759 = vmatpush.bf16.msrb.mxu1 %v4327_v26  ;;  %v4262_v28 = vld [vmem:[#allocation16 + $0x448] sm:$0xf]  ;;  %v4583_v36 = vor.u32 %v5035_v47, %v4582_v24  ;;  %v4424_v3 = vld [vmem:[#allocation16 + $0x5a8] sm:$0xf0]  ;;  %v3758_v52 = vld [vmem:[#allocation16 + $0x50] sm:$0xf] }
 0x263   :  { %v4955_v31 = vld [vmem:[#allocation16 + $0x464] sm:$0xf0]  ;;  %v4427_v14 = vor.u32 %v4991_v50, %v4424_v3  ;;  %v4823_v26 = vld [vmem:[#allocation16 + $0x4c] sm:$0xf]  ;;  %v4174_v3 = vld [vmem:[#allocation16 + $0x390] sm:$0xf] }
 0x264   :  { %2749 = vmatpush.bf16.msrb.mxu0 %v3975_v56  ;;  %2771 = vmatpush.bf16.msrb.mxu2 %v4615_v23  ;;  %v4263_v0 = vor.u32 %v4955_v31, %v4262_v28  ;;  %v4550_v42 = vld [vmem:[#allocation16 + $0x688] sm:$0xf]  ;;  %v4392_v56 = vld [vmem:[#allocation16 + $0x568] sm:$0xf0]  ;;  %v3755_v6 = vor.u32 %v4823_v26, %v3752_v12  ;;  %v3950_v28 = vld [vmem:[#allocation16 + $0x1d0] sm:$0xf] }
 0x265   :  { %v5027_v43 = vld [vmem:[#allocation16 + $0x6a4] sm:$0xf0]  ;;  %v4040_v18 = vld [vmem:[#allocation16 + $0x2a8] sm:$0xf0]  ;;  %v4876_v31 = vld [vmem:[#allocation16 + $0x1ec] sm:$0xf0] }
 0x266   :  { %2782 = vmatpush.bf16.msrb.mxu3 %v3915_v30  ;;  %2760 = vmatpush.bf16.msrb.mxu1 %v4295_v2  ;;  %v4230_v32 = vld [vmem:[#allocation16 + $0x408] sm:$0xf]  ;;  %v4551_v54 = vor.u32 %v5027_v43, %v4550_v42  ;;  %v4983_v30 = vld [vmem:[#allocation16 + $0x54c] sm:$0xf]  ;;  %v4043_v23 = vor.u32 %v4895_v55, %v4040_v18  ;;  %v4142_v12 = vld [vmem:[#allocation16 + $0x350] sm:$0xf] }
 0x267   :  { %2750 = vmatmul.bf16.vlgmr.msrb.gmra.mxu0 %v5642_v48  ;;  %v4947_v45 = vld [vmem:[#allocation16 + $0x424] sm:$0xf0]  ;;  %2724 = vmatmul.bf16.vlgmr.msra.gmra.mxu2 %v5656_v51  ;;  %v4395_v22 = vor.u32 %v4983_v30, %v4392_v56  ;;  %v4815_v2 = vld [vmem:[#allocation16 + $0xc] sm:$0xf]  ;;  %v4924_v30 = vld [vmem:[#allocation16 + $0x36c] sm:$0xf0] }
 0x268   :  { %2794 = vmatpush.bf16.msra.mxu0 %v4203_v19  ;;  %2772 = vmatpush.bf16.msrb.mxu2 %v4583_v36  ;;  %v4231_v57 = vor.u32 %v4947_v45, %v4230_v32  ;;  %v4518_v61 = vld [vmem:[#allocation16 + $0x648] sm:$0xf]  ;;  %v4715_v19 = vor.u32 %v5063_v38, %v4712_v16  ;;  %v3720_v24 = vld [vmem:[#allocation16 + $0x28] sm:$0xf0]  ;;  %v3951_v36 = vor.u32 %v4876_v31, %v3950_v28  ;;  %v3918_v45 = vld [vmem:[#allocation16 + $0x190] sm:$0xf] }
 0x269   :  { %v5019_v62 = vld [vmem:[#allocation16 + $0x664] sm:$0xf0]  ;;  %v4360_v47 = vld [vmem:[#allocation16 + $0x528] sm:$0xf0]  ;;  %v3723_v39 = vor.u32 %v4815_v2, %v3720_v24  ;;  %v4175_v38 = vor.u32 %v4932_v4, %v4174_v3  ;;  %v3854_v16 = vld [vmem:[#allocation16 + $0x110] sm:$0xf]  ;;  %v4143_v21 = vor.u32 %v4924_v30, %v4142_v12 }
 0x26a   :  { %2783 = vmatpush.bf16.msrb.mxu3 %v3883_v25  ;;  %2761 = vmatpush.bf16.msrb.mxu1 %v4263_v0  ;;  %v4519_v9 = vor.u32 %v5019_v62, %v4518_v61  ;;  %v4486_v11 = vld [vmem:[#allocation16 + $0x608] sm:$0xf]  ;;  %v4975_v25 = vld [vmem:[#allocation16 + $0x50c] sm:$0xf]  ;;  %v5004_v2 = vld [vmem:[#allocation16 + $0x5ec] sm:$0xf0] }
 0x26b   :  { %v5011_v15 = vld [vmem:[#allocation16 + $0x624] sm:$0xf0]  ;;  %v4008_v35 = vld [vmem:[#allocation16 + $0x268] sm:$0xf0]  ;;  %v4363_v41 = vor.u32 %v4975_v25, %v4360_v47  ;;  %v4110_v25 = vld [vmem:[#allocation16 + $0x310] sm:$0xf] }
 0x26c   :  { %2795 = vmatpush.bf16.msra.mxu0 %v4171_v34  ;;  %2773 = vmatpush.bf16.msrb.mxu2 %v4551_v54  ;;  %v4487_v5 = vor.u32 %v5011_v15, %v4486_v11  ;;  %v4887_v34 = vld [vmem:[#allocation16 + $0x24c] sm:$0xf]  ;;  %v3919_v54 = vor.u32 %v4868_v8, %v3918_v45  ;;  %v4916_v47 = vld [vmem:[#allocation16 + $0x32c] sm:$0xf0] }
 0x26d   :  { %v5047_v0 = vld [vmem:[#allocation16 + $0x74c] sm:$0xf]  ;;  %v5060_v3 = vld [vmem:[#allocation16 + $0x7ac] sm:$0xf0] }
 0x26e   :  { %2784 = vmatpush.bf16.msrb.mxu3 %v3851_v44  ;;  %2762 = vmatpush.bf16.msrb.mxu1 %v4231_v57  ;;  %v4648_v42 = vld [vmem:[#allocation16 + $0x768] sm:$0xf0]  ;;  %v4011_v44 = vor.u32 %v4887_v34, %v4008_v35  ;;  %v3726_v4 = vld [vmem:[#allocation16 + $0x10] sm:$0xf] }
 0x26f   :  { %v4967_v43 = vld [vmem:[#allocation16 + $0x4cc] sm:$0xf]  ;;  %v4651_v49 = vor.u32 %v5047_v0, %v4648_v42  ;;  %v4430_v0 = vld [vmem:[#allocation16 + $0x590] sm:$0xf] }
 0x270   :  { %2796 = vmatpush.bf16.msra.mxu0 %v4139_v46  ;;  %2774 = vmatpush.bf16.msrb.mxu2 %v4519_v9  ;;  %v4328_v32 = vld [vmem:[#allocation16 + $0x4e8] sm:$0xf0]  ;;  %v4996_v42 = vld [vmem:[#allocation16 + $0x5ac] sm:$0xf0] }
 0x271   :  { %2763 = vmatmul.bf16.vlgmr.msrb.gmra.mxu1 %v5650_v60  ;;  %v4879_v46 = vld [vmem:[#allocation16 + $0x20c] sm:$0xf]  ;;  %v4331_v53 = vor.u32 %v4967_v43, %v4328_v32  ;;  %v4908_v32 = vld [vmem:[#allocation16 + $0x2ec] sm:$0xf0] }
 0x272   :  { %2785 = vmatpush.bf16.msrb.mxu3 %v3819_v58  ;;  %2807 = vmatpush.bf16.msra.mxu1 %v4459_v59  ;;  %v3976_v17 = vld [vmem:[#allocation16 + $0x228] sm:$0xf0]  ;;  %v4654_v30 = vld [vmem:[#allocation16 + $0x750] sm:$0xf] }
 0x273   :  { %v5039_v57 = vld [vmem:[#allocation16 + $0x70c] sm:$0xf]  ;;  %v3979_v59 = vor.u32 %v4879_v46, %v3976_v17  ;;  %v4431_v17 = vor.u32 %v4996_v42, %v4430_v0  ;;  %v4928_v42 = vld [vmem:[#allocation16 + $0x394] sm:$0xf] }
 0x274   :  { %2797 = vmatpush.bf16.msra.mxu0 %v4107_v63  ;;  %2775 = vmatpush.bf16.msrb.mxu2 %v4487_v5  ;;  %v4616_v58 = vld [vmem:[#allocation16 + $0x728] sm:$0xf0]  ;;  %v3886_v63 = vld [vmem:[#allocation16 + $0x150] sm:$0xf] }
 0x275   :  { %v4959_v61 = vld [vmem:[#allocation16 + $0x48c] sm:$0xf]  ;;  %v4619_v50 = vor.u32 %v5039_v57, %v4616_v58  ;;  %v4398_v57 = vld [vmem:[#allocation16 + $0x550] sm:$0xf] }
 0x276   :  { %2786 = vmatpush.bf16.msrb.mxu3 %v3787_v13  ;;  %2808 = vmatpush.bf16.msra.mxu1 %v4427_v14  ;;  %v4296_v62 = vld [vmem:[#allocation16 + $0x4a8] sm:$0xf0]  ;;  %v3887_v13 = vor.u32 %v4860_v1, %v3886_v63  ;;  %v4988_v58 = vld [vmem:[#allocation16 + $0x56c] sm:$0xf0] }
 0x277   :  { %2776 = vmatmul.bf16.vlgmr.msrb.gmra.mxu2 %v5656_v51  ;;  %v4299_v7 = vor.u32 %v4959_v61, %v4296_v62  ;;  %v5031_v9 = vld [vmem:[#allocation16 + $0x6cc] sm:$0xf]  ;;  %v4046_v61 = vld [vmem:[#allocation16 + $0x290] sm:$0xf] }
 0x278   :  { %2798 = vmatpush.bf16.msra.mxu0 %v4075_v33  ;;  %2820 = vmatpush.bf16.msra.mxu2 %v4715_v19  ;;  %v4584_v11 = vld [vmem:[#allocation16 + $0x6e8] sm:$0xf0]  ;;  %v4852_v33 = vld [vmem:[#allocation16 + $0x12c] sm:$0xf0] }
 0x279   :  { %v4951_v14 = vld [vmem:[#allocation16 + $0x44c] sm:$0xf]  ;;  %v4587_v26 = vor.u32 %v5031_v9, %v4584_v11  ;;  %v3855_v5 = vor.u32 %v4852_v33, %v3854_v16  ;;  %v4900_v62 = vld [vmem:[#allocation16 + $0x2ac] sm:$0xf0] }
 0x27a   :  { %2787 = vmatpush.bf16.msrb.mxu3 %v3755_v6  ;;  %2809 = vmatpush.bf16.msra.mxu1 %v4395_v22  ;;  %v4264_v15 = vld [vmem:[#allocation16 + $0x468] sm:$0xf0]  ;;  %v4844_v22 = vld [vmem:[#allocation16 + $0xec] sm:$0xf0]  ;;  %v4047_v9 = vor.u32 %v4900_v62, %v4046_v61 }
 0x27b   :  { %v4267_v56 = vor.u32 %v4951_v14, %v4264_v15  ;;  %v5023_v55 = vld [vmem:[#allocation16 + $0x68c] sm:$0xf]  ;;  %v3823_v35 = vor.u32 %v4844_v22, %v3822_v20  ;;  %v4686_v63 = vld [vmem:[#allocation16 + $0x790] sm:$0xf]  ;;  %v4872_v14 = vld [vmem:[#allocation16 + $0x1d4] sm:$0xf] }
 0x27c   :  { %2799 = vmatpush.bf16.msra.mxu0 %v4043_v23  ;;  %2821 = vmatpush.bf16.msra.mxu2 %v4683_v37  ;;  %v4552_v18 = vld [vmem:[#allocation16 + $0x6a8] sm:$0xf0]  ;;  %v4462_v23 = vld [vmem:[#allocation16 + $0x5d0] sm:$0xf]  ;;  %v3952_v15 = vld [vmem:[#allocation16 + $0x1f0] sm:$0xf0]  ;;  %v4687_v33 = vor.u32 %v5060_v3, %v4686_v63 }
 0x27d   :  { %v4943_v19 = vld [vmem:[#allocation16 + $0x40c] sm:$0xf]  ;;  %v4555_v24 = vor.u32 %v5023_v55, %v4552_v18  ;;  %v4463_v37 = vor.u32 %v5004_v2, %v4462_v23  ;;  %v4366_v11 = vld [vmem:[#allocation16 + $0x510] sm:$0xf]  ;;  %v3955_v55 = vor.u32 %v4872_v14, %v3952_v15  ;;  %v3920_v20 = vld [vmem:[#allocation16 + $0x1b0] sm:$0xf0] }
 0x27e   :  { %2788 = vmatpush.bf16.msrb.mxu3 %v3723_v39  ;;  %2810 = vmatpush.bf16.msra.mxu1 %v4363_v41  ;;  %v4232_v6 = vld [vmem:[#allocation16 + $0x428] sm:$0xf0]  ;;  %v3790_v39 = vld [vmem:[#allocation16 + $0x90] sm:$0xf]  ;;  %v4111_v41 = vor.u32 %v4916_v47, %v4110_v25  ;;  %v4936_v2 = vld [vmem:[#allocation16 + $0x3d4] sm:$0xf] }
 0x27f   :  { %v4235_v28 = vor.u32 %v4943_v19, %v4232_v6  ;;  %v5015_v31 = vld [vmem:[#allocation16 + $0x64c] sm:$0xf]  ;;  %v4892_v16 = vld [vmem:[#allocation16 + $0x26c] sm:$0xf0]  ;;  %v4864_v6 = vld [vmem:[#allocation16 + $0x194] sm:$0xf] }
 0x280   :  { %2800 = vmatpush.bf16.msra.mxu0 %v4011_v44  ;;  %2822 = vmatpush.bf16.msra.mxu2 %v4651_v49  ;;  %v4520_v34 = vld [vmem:[#allocation16 + $0x668] sm:$0xf0]  ;;  %v4078_v44 = vld [vmem:[#allocation16 + $0x2d0] sm:$0xf]  ;;  %v3824_v3 = vld [vmem:[#allocation16 + $0xf0] sm:$0xf0] }
 0x281   :  { %2789 = vmatmul.bf16.vlgmr.msrb.gmra.mxu3 %v5636_v27  ;;  %v4523_v43 = vor.u32 %v5015_v31, %v4520_v34  ;;  %v5007_v45 = vld [vmem:[#allocation16 + $0x60c] sm:$0xf]  ;;  %v4718_v49 = vld [vmem:[#allocation16 + $0x7d0] sm:$0xf]  ;;  %v3923_v31 = vor.u32 %v4864_v6, %v3920_v20 }
 0x282   :  { %2833 = vmatpush.bf16.msra.mxu3 %v3951_v36  ;;  %2811 = vmatpush.bf16.msra.mxu1 %v4331_v53  ;;  %v4836_v36 = vld [vmem:[#allocation16 + $0xac] sm:$0xf0]  ;;  %v4488_v8 = vld [vmem:[#allocation16 + $0x628] sm:$0xf0]  ;;  %v4079_v53 = vor.u32 %v4908_v32, %v4078_v44 }
 0x283   :  { %v3791_v46 = vor.u32 %v4836_v36, %v3790_v39  ;;  %v4972_v19 = vld [vmem:[#allocation16 + $0x4ec] sm:$0xf0]  ;;  %v3888_v36 = vld [vmem:[#allocation16 + $0x170] sm:$0xf0] }
 0x284   :  { %2801 = vmatpush.bf16.msra.mxu0 %v3979_v59  ;;  %2823 = vmatpush.bf16.msra.mxu2 %v4619_v50  ;;  %v4491_v59 = vor.u32 %v5007_v45, %v4488_v8  ;;  %v4399_v50 = vor.u32 %v4988_v58, %v4398_v57  ;;  %v4884_v22 = vld [vmem:[#allocation16 + $0x22c] sm:$0xf0]  ;;  %v4144_v57 = vld [vmem:[#allocation16 + $0x370] sm:$0xf0] }
 0x285   :  { %v4622_v47 = vld [vmem:[#allocation16 + $0x710] sm:$0xf] }
 0x286   :  { %2834 = vmatpush.bf16.msra.mxu3 %v3919_v54  ;;  %2812 = vmatpush.bf16.msra.mxu1 %v4299_v7  ;;  %v4828_v54 = vld [vmem:[#allocation16 + $0x6c] sm:$0xf0] }
 0x287   :  { %2802 = vmatmul.bf16.vlgmr.msra.gmra.mxu0 %v5642_v48  ;;  %v3759_v1 = vor.u32 %v4828_v54, %v3758_v52  ;;  %v4820_v7 = vld [vmem:[#allocation16 + $0x2c] sm:$0xf0]  ;;  %v3856_v52 = vld [vmem:[#allocation16 + $0x130] sm:$0xf0] }
 0x288   :  { %2846 = vmatpush.bf16.msrb.mxu0 %v4207_v40  ;;  %2824 = vmatpush.bf16.msra.mxu2 %v4587_v26  ;;  %v4719_v40 = vor.u32 %v5068_v29, %v4718_v49  ;;  %v3727_v26 = vor.u32 %v4820_v7, %v3726_v4  ;;  %v4590_v32 = vld [vmem:[#allocation16 + $0x6d0] sm:$0xf]  ;;  %v4848_v29 = vld [vmem:[#allocation16 + $0x114] sm:$0xf] }
 0x289   :  { %v5036_v45 = vld [vmem:[#allocation16 + $0x6ec] sm:$0xf0]  ;;  %v4920_v54 = vld [vmem:[#allocation16 + $0x354] sm:$0xf]  ;;  %v3859_v62 = vor.u32 %v4848_v29, %v3856_v52 }
 0x28a   :  { %2835 = vmatpush.bf16.msra.mxu3 %v3887_v13  ;;  %2813 = vmatpush.bf16.msra.mxu1 %v4267_v56  ;;  %v4980_v13 = vld [vmem:[#allocation16 + $0x52c] sm:$0xf0]  ;;  %v5000_v4 = vld [vmem:[#allocation16 + $0x5d4] sm:$0xf] }
 0x28b   :  { %v4367_v12 = vor.u32 %v4980_v13, %v4366_v11  ;;  %v5052_v56 = vld [vmem:[#allocation16 + $0x76c] sm:$0xf0]  ;;  %v4464_v7 = vld [vmem:[#allocation16 + $0x5f0] sm:$0xf0] }
 0x28c   :  { %2847 = vmatpush.bf16.msrb.mxu0 %v4175_v38  ;;  %2825 = vmatpush.bf16.msra.mxu2 %v4555_v24  ;;  %v4014_v38 = vld [vmem:[#allocation16 + $0x250] sm:$0xf]  ;;  %v4655_v23 = vor.u32 %v5052_v56, %v4654_v30  ;;  %v4208_v24 = vld [vmem:[#allocation16 + $0x3f0] sm:$0xf0] }
 0x28d   :  { %v4015_v18 = vor.u32 %v4892_v16, %v4014_v38  ;;  %v4211_v39 = vor.u32 %v4936_v2, %v4208_v24  ;;  %v5028_v61 = vld [vmem:[#allocation16 + $0x6ac] sm:$0xf0]  ;;  %v4912_v11 = vld [vmem:[#allocation16 + $0x314] sm:$0xf] }
 0x28e   :  { %2836 = vmatpush.bf16.msra.mxu3 %v3855_v5  ;;  %2814 = vmatpush.bf16.msra.mxu1 %v4235_v28  ;;  %v4334_v5 = vld [vmem:[#allocation16 + $0x4d0] sm:$0xf]  ;;  %v4112_v13 = vld [vmem:[#allocation16 + $0x330] sm:$0xf0] }
 0x28f   :  { %v4335_v25 = vor.u32 %v4972_v19, %v4334_v5  ;;  %v5044_v28 = vld [vmem:[#allocation16 + $0x72c] sm:$0xf0]  ;;  %v3792_v30 = vld [vmem:[#allocation16 + $0xb0] sm:$0xf0] }
 0x290   :  { %2848 = vmatpush.bf16.msrb.mxu0 %v4143_v21  ;;  %2826 = vmatpush.bf16.msra.mxu2 %v4523_v43  ;;  %v3982_v21 = vld [vmem:[#allocation16 + $0x210] sm:$0xf]  ;;  %v4623_v0 = vor.u32 %v5044_v28, %v4622_v47  ;;  %v4176_v43 = vld [vmem:[#allocation16 + $0x3b0] sm:$0xf0] }
 0x291   :  { %2815 = vmatmul.bf16.vlgmr.msra.gmra.mxu1 %v5650_v60  ;;  %v3983_v34 = vor.u32 %v4884_v22, %v3982_v21  ;;  %v4179_v49 = vor.u32 %v4928_v42, %v4176_v43  ;;  %v4948_v63 = vld [vmem:[#allocation16 + $0x42c] sm:$0xf0]  ;;  %v4992_v56 = vld [vmem:[#allocation16 + $0x594] sm:$0xf] }
 0x292   :  { %2837 = vmatpush.bf16.msra.mxu3 %v3823_v35  ;;  %2859 = vmatpush.bf16.msrb.mxu1 %v4463_v37  ;;  %v4302_v35 = vld [vmem:[#allocation16 + $0x490] sm:$0xf]  ;;  %v4904_v5 = vld [vmem:[#allocation16 + $0x2d4] sm:$0xf] }
 0x293   :  { %v4964_v37 = vld [vmem:[#allocation16 + $0x4ac] sm:$0xf0]  ;;  %v4080_v19 = vld [vmem:[#allocation16 + $0x2f0] sm:$0xf0] }
 0x294   :  { %2849 = vmatpush.bf16.msrb.mxu0 %v4111_v41  ;;  %2827 = vmatpush.bf16.msra.mxu2 %v4491_v59  ;;  %v4856_v41 = vld [vmem:[#allocation16 + $0x154] sm:$0xf]  ;;  %v4303_v44 = vor.u32 %v4964_v37, %v4302_v35  ;;  %v4558_v59 = vld [vmem:[#allocation16 + $0x690] sm:$0xf] }
 0x295   :  { %v3891_v8 = vor.u32 %v4856_v41, %v3888_v36  ;;  %v4526_v15 = vld [vmem:[#allocation16 + $0x650] sm:$0xf]  ;;  %v4720_v2 = vld [vmem:[#allocation16 + $0x7f0] sm:$0xf0] }
 0x296   :  { %2838 = vmatpush.bf16.msra.mxu3 %v3791_v46  ;;  %2860 = vmatpush.bf16.msrb.mxu1 %v4431_v17  ;;  %v4270_v46 = vld [vmem:[#allocation16 + $0x450] sm:$0xf]  ;;  %v4824_v24 = vld [vmem:[#allocation16 + $0x54] sm:$0xf] }
 0x297   :  { %2828 = vmatmul.bf16.vlgmr.msra.gmra.mxu2 %v5656_v51  ;;  %v4956_v17 = vld [vmem:[#allocation16 + $0x46c] sm:$0xf0]  ;;  %v3760_v47 = vld [vmem:[#allocation16 + $0x70] sm:$0xf0] }
 0x298   :  { %2850 = vmatpush.bf16.msrb.mxu0 %v4079_v53  ;;  %2872 = vmatpush.bf16.msrb.mxu2 %v4719_v40  ;;  %v4591_v53 = vor.u32 %v5036_v45, %v4590_v32  ;;  %v4271_v58 = vor.u32 %v4956_v17, %v4270_v46  ;;  %v4238_v40 = vld [vmem:[#allocation16 + $0x410] sm:$0xf]  ;;  %v4984_v28 = vld [vmem:[#allocation16 + $0x554] sm:$0xf]  ;;  %v3763_v36 = vor.u32 %v4824_v24, %v3760_v47  ;;  %v3958_v46 = vld [vmem:[#allocation16 + $0x1d8] sm:$0xf] }
 0x299   :  { %v4239_v14 = vor.u32 %v4948_v63, %v4238_v40  ;;  %v5020_v38 = vld [vmem:[#allocation16 + $0x66c] sm:$0xf0]  ;;  %v4896_v35 = vld [vmem:[#allocation16 + $0x294] sm:$0xf]  ;;  %v4877_v17 = vld [vmem:[#allocation16 + $0x1f4] sm:$0xf0] }
 0x29a   :  { %2839 = vmatpush.bf16.msra.mxu3 %v3759_v1  ;;  %2861 = vmatpush.bf16.msrb.mxu1 %v4399_v50  ;;  %v4840_v1 = vld [vmem:[#allocation16 + $0xd4] sm:$0xf]  ;;  %v4147_v50 = vor.u32 %v4920_v54, %v4144_v57  ;;  %v4494_v6 = vld [vmem:[#allocation16 + $0x610] sm:$0xf]  ;;  %v3926_v63 = vld [vmem:[#allocation16 + $0x198] sm:$0xf] }
 0x29b   :  { %v3827_v16 = vor.u32 %v4840_v1, %v3824_v3  ;;  %v5012_v20 = vld [vmem:[#allocation16 + $0x62c] sm:$0xf0]  ;;  %v4048_v37 = vld [vmem:[#allocation16 + $0x2b0] sm:$0xf0]  ;;  %v4869_v1 = vld [vmem:[#allocation16 + $0x1b4] sm:$0xf0] }
 0x29c   :  { %2851 = vmatpush.bf16.msrb.mxu0 %v4047_v9  ;;  %2873 = vmatpush.bf16.msrb.mxu2 %v4687_v33  ;;  %v4559_v9 = vor.u32 %v5028_v61, %v4558_v59  ;;  %v4467_v33 = vor.u32 %v5000_v4, %v4464_v7  ;;  %v5056_v41 = vld [vmem:[#allocation16 + $0x794] sm:$0xf]  ;;  %v4051_v32 = vor.u32 %v4896_v35, %v4048_v37  ;;  %v4214_v7 = vld [vmem:[#allocation16 + $0x3d8] sm:$0xf] }
 0x29d   :  { %v4688_v42 = vld [vmem:[#allocation16 + $0x7b0] sm:$0xf0]  ;;  %v3959_v59 = vor.u32 %v4877_v17, %v3958_v46  ;;  %v4853_v24 = vld [vmem:[#allocation16 + $0x134] sm:$0xf0] }
 0x29e   :  { %2840 = vmatpush.bf16.msra.mxu3 %v3727_v26  ;;  %2862 = vmatpush.bf16.msrb.mxu1 %v4367_v12  ;;  %v4832_v26 = vld [vmem:[#allocation16 + $0x94] sm:$0xf]  ;;  %v4115_v12 = vor.u32 %v4912_v11, %v4112_v13  ;;  %v4691_v52 = vor.u32 %v5056_v41, %v4688_v42  ;;  %v4150_v47 = vld [vmem:[#allocation16 + $0x358] sm:$0xf] }
 0x29f   :  { %v3795_v21 = vor.u32 %v4832_v26, %v3792_v30  ;;  %v4816_v43 = vld [vmem:[#allocation16 + $0x14] sm:$0xf]  ;;  %v4861_v30 = vld [vmem:[#allocation16 + $0x174] sm:$0xf0] }
 0x2a0   :  { %2852 = vmatpush.bf16.msrb.mxu0 %v4015_v18  ;;  %2874 = vmatpush.bf16.msrb.mxu2 %v4655_v23  ;;  %v4527_v18 = vor.u32 %v5020_v38, %v4526_v15  ;;  %v5064_v23 = vld [vmem:[#allocation16 + $0x7d4] sm:$0xf]  ;;  %v3927_v15 = vor.u32 %v4869_v1, %v3926_v63  ;;  %v4845_v42 = vld [vmem:[#allocation16 + $0xf4] sm:$0xf0] }
 0x2a1   :  { %2841 = vmatmul.bf16.vlgmr.msra.gmra.mxu3 %v5636_v27  ;;  %v4976_v45 = vld [vmem:[#allocation16 + $0x514] sm:$0xf]  ;;  %v4086_v63 = vld [vmem:[#allocation16 + $0x2d8] sm:$0xf] }
 0x2a2   :  { %2885 = vmatpush.bf16.msrb.mxu3 %v3955_v55  ;;  %2863 = vmatpush.bf16.msrb.mxu1 %v4335_v25  ;;  %v4432_v55 = vld [vmem:[#allocation16 + $0x5b0] sm:$0xf0]  ;;  %v4083_v25 = vor.u32 %v4904_v5, %v4080_v19  ;;  %v4909_v1 = vld [vmem:[#allocation16 + $0x2f4] sm:$0xf0] }
 0x2a3   :  { %v4435_v22 = vor.u32 %v4992_v56, %v4432_v55  ;;  %v4016_v29 = vld [vmem:[#allocation16 + $0x270] sm:$0xf0]  ;;  %v4182_v55 = vld [vmem:[#allocation16 + $0x398] sm:$0xf] }
 0x2a4   :  { %2853 = vmatpush.bf16.msrb.mxu0 %v3983_v34  ;;  %2875 = vmatpush.bf16.msrb.mxu2 %v4623_v0  ;;  %v4495_v34 = vor.u32 %v5012_v20, %v4494_v6  ;;  %v5048_v57 = vld [vmem:[#allocation16 + $0x754] sm:$0xf] }
 0x2a5   :  { %v4336_v40 = vld [vmem:[#allocation16 + $0x4f0] sm:$0xf0] }
 0x2a6   :  { %2886 = vmatpush.bf16.msrb.mxu3 %v3923_v31  ;;  %2864 = vmatpush.bf16.msrb.mxu1 %v4303_v44  ;;  %v4400_v31 = vld [vmem:[#allocation16 + $0x570] sm:$0xf0] }
 0x2a7   :  { %2854 = vmatmul.bf16.vlgmr.msrb.gmra.mxu0 %v5642_v48  ;;  %v4403_v0 = vor.u32 %v4984_v28, %v4400_v31  ;;  %v3728_v44 = vld [vmem:[#allocation16 + $0x30] sm:$0xf0]  ;;  %v4925_v28 = vld [vmem:[#allocation16 + $0x374] sm:$0xf0] }
 0x2a8   :  { %2898 = vmatpush.bf16.msra.mxu0 %v4211_v39  ;;  %2876 = vmatpush.bf16.msrb.mxu2 %v4591_v53  ;;  %v4723_v39 = vor.u32 %v5064_v23, %v4720_v2  ;;  %v3731_v53 = vor.u32 %v4816_v43, %v3728_v44  ;;  %v3984_v3 = vld [vmem:[#allocation16 + $0x230] sm:$0xf0]  ;;  %v3862_v2 = vld [vmem:[#allocation16 + $0x118] sm:$0xf] }
 0x2a9   :  { %v5040_v13 = vld [vmem:[#allocation16 + $0x714] sm:$0xf]  ;;  %v3863_v37 = vor.u32 %v4853_v24, %v3862_v2  ;;  %v4470_v43 = vld [vmem:[#allocation16 + $0x5d8] sm:$0xf]  ;;  %v4873_v24 = vld [vmem:[#allocation16 + $0x1dc] sm:$0xf] }
 0x2aa   :  { %2887 = vmatpush.bf16.msrb.mxu3 %v3891_v8  ;;  %2865 = vmatpush.bf16.msrb.mxu1 %v4271_v58  ;;  %v4368_v8 = vld [vmem:[#allocation16 + $0x530] sm:$0xf0]  ;;  %v5005_v44 = vld [vmem:[#allocation16 + $0x5f4] sm:$0xf0] }
 0x2ab   :  { %v4371_v54 = vor.u32 %v4976_v45, %v4368_v8  ;;  %v4656_v58 = vld [vmem:[#allocation16 + $0x770] sm:$0xf0]  ;;  %v4118_v45 = vld [vmem:[#allocation16 + $0x318] sm:$0xf] }
 0x2ac   :  { %2899 = vmatpush.bf16.msra.mxu0 %v4179_v49  ;;  %2877 = vmatpush.bf16.msrb.mxu2 %v4559_v9  ;;  %v4888_v49 = vld [vmem:[#allocation16 + $0x254] sm:$0xf]  ;;  %v4659_v4 = vor.u32 %v5048_v57, %v4656_v58  ;;  %v4941_v9 = vld [vmem:[#allocation16 + $0x3f4] sm:$0xf0] }
 0x2ad   :  { %v4019_v61 = vor.u32 %v4888_v49, %v4016_v29  ;;  %v4215_v26 = vor.u32 %v4941_v9, %v4214_v7  ;;  %v5032_v19 = vld [vmem:[#allocation16 + $0x6d4] sm:$0xf]  ;;  %v4917_v8 = vld [vmem:[#allocation16 + $0x334] sm:$0xf0] }
 0x2ae   :  { %2888 = vmatpush.bf16.msrb.mxu3 %v3859_v62  ;;  %2866 = vmatpush.bf16.msrb.mxu1 %v4239_v14  ;;  %v4968_v62 = vld [vmem:[#allocation16 + $0x4d4] sm:$0xf]  ;;  %v3798_v57 = vld [vmem:[#allocation16 + $0x98] sm:$0xf]  ;;  %v4119_v58 = vor.u32 %v4917_v8, %v4118_v45 }
 0x2af   :  { %v4339_v11 = vor.u32 %v4968_v62, %v4336_v40  ;;  %v4624_v14 = vld [vmem:[#allocation16 + $0x730] sm:$0xf0]  ;;  %v4997_v62 = vld [vmem:[#allocation16 + $0x5b4] sm:$0xf0] }
 0x2b0   :  { %2900 = vmatpush.bf16.msra.mxu0 %v4147_v50  ;;  %2878 = vmatpush.bf16.msrb.mxu2 %v4527_v18  ;;  %v4880_v50 = vld [vmem:[#allocation16 + $0x214] sm:$0xf]  ;;  %v4627_v56 = vor.u32 %v5040_v13, %v4624_v14  ;;  %v4933_v18 = vld [vmem:[#allocation16 + $0x3b4] sm:$0xf0]  ;;  %v4087_v14 = vor.u32 %v4909_v1, %v4086_v63 }
 0x2b1   :  { %2867 = vmatmul.bf16.vlgmr.msrb.gmra.mxu1 %v5650_v60  ;;  %v3987_v38 = vor.u32 %v4880_v50, %v3984_v3  ;;  %v4592_v6 = vld [vmem:[#allocation16 + $0x6f0] sm:$0xf0]  ;;  %v4183_v23 = vor.u32 %v4933_v18, %v4182_v55  ;;  %v4726_v9 = vld [vmem:[#allocation16 + $0x7d8] sm:$0xf] }
 0x2b2   :  { %2889 = vmatpush.bf16.msrb.mxu3 %v3827_v16  ;;  %2911 = vmatpush.bf16.msra.mxu1 %v4467_v33  ;;  %v4960_v16 = vld [vmem:[#allocation16 + $0x494] sm:$0xf]  ;;  %v3766_v13 = vld [vmem:[#allocation16 + $0x58] sm:$0xf] }
 0x2b3   :  { %v4304_v33 = vld [vmem:[#allocation16 + $0x4b0] sm:$0xf0]  ;;  %v4981_v2 = vld [vmem:[#allocation16 + $0x534] sm:$0xf0] }
 0x2b4   :  { %2901 = vmatpush.bf16.msra.mxu0 %v4115_v12  ;;  %2879 = vmatpush.bf16.msrb.mxu2 %v4495_v34  ;;  %v3894_v12 = vld [vmem:[#allocation16 + $0x158] sm:$0xf]  ;;  %v4307_v5 = vor.u32 %v4960_v16, %v4304_v33  ;;  %v5024_v34 = vld [vmem:[#allocation16 + $0x694] sm:$0xf] }
 0x2b5   :  { %v3895_v20 = vor.u32 %v4861_v30, %v3894_v12  ;;  %v4560_v35 = vld [vmem:[#allocation16 + $0x6b0] sm:$0xf0]  ;;  %v4989_v16 = vld [vmem:[#allocation16 + $0x574] sm:$0xf0] }
 0x2b6   :  { %2890 = vmatpush.bf16.msrb.mxu3 %v3795_v21  ;;  %2912 = vmatpush.bf16.msra.mxu1 %v4435_v22  ;;  %v4952_v21 = vld [vmem:[#allocation16 + $0x454] sm:$0xf]  ;;  %v4901_v12 = vld [vmem:[#allocation16 + $0x2b4] sm:$0xf0] }
 0x2b7   :  { %2880 = vmatmul.bf16.vlgmr.msrb.gmra.mxu2 %v5656_v51  ;;  %v4272_v22 = vld [vmem:[#allocation16 + $0x470] sm:$0xf0]  ;;  %v3990_v45 = vld [vmem:[#allocation16 + $0x218] sm:$0xf] }
 0x2b8   :  { %2902 = vmatpush.bf16.msra.mxu0 %v4083_v25  ;;  %2924 = vmatpush.bf16.msra.mxu2 %v4723_v39  ;;  %v4595_v25 = vor.u32 %v5032_v19, %v4592_v6  ;;  %v4275_v31 = vor.u32 %v4952_v21, %v4272_v22  ;;  %v4944_v39 = vld [vmem:[#allocation16 + $0x414] sm:$0xf]  ;;  %v5061_v6 = vld [vmem:[#allocation16 + $0x7b4] sm:$0xf0] }
 0x2b9   :  { %v4240_v41 = vld [vmem:[#allocation16 + $0x430] sm:$0xf0]  ;;  %v4821_v21 = vld [vmem:[#allocation16 + $0x34] sm:$0xf0] }
 0x2ba   :  { %2891 = vmatpush.bf16.msrb.mxu3 %v3763_v36  ;;  %2913 = vmatpush.bf16.msra.mxu1 %v4403_v0  ;;  %v3830_v36 = vld [vmem:[#allocation16 + $0xd8] sm:$0xf]  ;;  %v4151_v0 = vor.u32 %v4925_v28, %v4150_v47  ;;  %v4243_v46 = vor.u32 %v4944_v39, %v4240_v41  ;;  %v5016_v17 = vld [vmem:[#allocation16 + $0x654] sm:$0xf] }
 0x2bb   :  { %v4528_v49 = vld [vmem:[#allocation16 + $0x670] sm:$0xf0]  ;;  %v4022_v47 = vld [vmem:[#allocation16 + $0x258] sm:$0xf] }
 0x2bc   :  { %2903 = vmatpush.bf16.msra.mxu0 %v4051_v32  ;;  %2925 = vmatpush.bf16.msra.mxu2 %v4691_v52  ;;  %v4563_v32 = vor.u32 %v5024_v34, %v4560_v35  ;;  %v4531_v40 = vor.u32 %v5016_v17, %v4528_v49  ;;  %v5008_v50 = vld [vmem:[#allocation16 + $0x614] sm:$0xf]  ;;  %v4893_v28 = vld [vmem:[#allocation16 + $0x274] sm:$0xf0]  ;;  %v4937_v17 = vld [vmem:[#allocation16 + $0x3dc] sm:$0xf] }
 0x2bd   :  { %v4496_v3 = vld [vmem:[#allocation16 + $0x630] sm:$0xf0]  ;;  %v4662_v39 = vld [vmem:[#allocation16 + $0x758] sm:$0xf]  ;;  %v4216_v49 = vld [vmem:[#allocation16 + $0x3f8] sm:$0xf0] }
 0x2be   :  { %2892 = vmatpush.bf16.msrb.mxu3 %v3731_v53  ;;  %2914 = vmatpush.bf16.msra.mxu1 %v4371_v54  ;;  %v3831_v53 = vor.u32 %v4845_v42, %v3830_v36  ;;  %v4471_v54 = vor.u32 %v5005_v44, %v4470_v43  ;;  %v4499_v33 = vor.u32 %v5008_v50, %v4496_v3  ;;  %v5053_v41 = vld [vmem:[#allocation16 + $0x774] sm:$0xf0]  ;;  %v4865_v44 = vld [vmem:[#allocation16 + $0x19c] sm:$0xf] }
 0x2bf   :  { %v4342_v42 = vld [vmem:[#allocation16 + $0x4d8] sm:$0xf]  ;;  %v4219_v1 = vor.u32 %v4937_v17, %v4216_v49  ;;  %v4857_v50 = vld [vmem:[#allocation16 + $0x15c] sm:$0xf] }
 0x2c0   :  { %2904 = vmatpush.bf16.msra.mxu0 %v4019_v61  ;;  %2926 = vmatpush.bf16.msra.mxu2 %v4659_v4  ;;  %v4438_v61 = vld [vmem:[#allocation16 + $0x598] sm:$0xf]  ;;  %v3896_v3 = vld [vmem:[#allocation16 + $0x178] sm:$0xf0] }
 0x2c1   :  { %2893 = vmatmul.bf16.vlgmr.msrb.gmra.mxu3 %v5636_v27  ;;  %v4439_v7 = vor.u32 %v4997_v62, %v4438_v61  ;;  %v4973_v43 = vld [vmem:[#allocation16 + $0x4f4] sm:$0xf0]  ;;  %v3800_v49 = vld [vmem:[#allocation16 + $0xb8] sm:$0xf0] }
 0x2c2   :  { %2937 = vmatpush.bf16.msra.mxu3 %v3959_v59  ;;  %2915 = vmatpush.bf16.msra.mxu1 %v4339_v11  ;;  %v4837_v59 = vld [vmem:[#allocation16 + $0xb4] sm:$0xf0] }
 0x2c3   :  { %v3799_v4 = vor.u32 %v4837_v59, %v3798_v57  ;;  %v5069_v11 = vld [vmem:[#allocation16 + $0x7f4] sm:$0xf0]  ;;  %v4343_v57 = vor.u32 %v4973_v43, %v4342_v42 }
 0x2c4   :  { %2905 = vmatpush.bf16.msra.mxu0 %v3987_v38  ;;  %2927 = vmatpush.bf16.msra.mxu2 %v4627_v56  ;;  %v5675_v29 = vpop.f32.mrf.mxu3  ;;  %v5677_v52 = vpop.f32.mrf.mxu0  ;;  %v4406_v38 = vld [vmem:[#allocation16 + $0x558] sm:$0xf]  ;;  %v4727_v30 = vor.u32 %v5069_v11, %v4726_v9  ;;  %v4929_v9 = vld [vmem:[#allocation16 + $0x39c] sm:$0xf] }
 0x2c5   :  { %v4694_v56 = vld [vmem:[#allocation16 + $0x798] sm:$0xf]  ;;  %v4407_v19 = vor.u32 %v4989_v16, %v4406_v38  ;;  %v4184_v11 = vld [vmem:[#allocation16 + $0x3b8] sm:$0xf0]  ;;  %v3899_v38 = vor.u32 %v4857_v50, %v3896_v3 }
 0x2c6   :  { %2938 = vmatpush.bf16.msra.mxu3 %v3927_v15  ;;  %2916 = vmatpush.bf16.msra.mxu1 %v4307_v5  ;;  %v4829_v15 = vld [vmem:[#allocation16 + $0x74] sm:$0xf0]  ;;  %v4695_v34 = vor.u32 %v5061_v6, %v4694_v56  ;;  %v3864_v56 = vld [vmem:[#allocation16 + $0x138] sm:$0xf0] }
 0x2c7   :  { %2906 = vmatmul.bf16.vlgmr.msra.gmra.mxu0 %v5642_v48  ;;  %v3767_v5 = vor.u32 %v4829_v15, %v3766_v13  ;;  %v4885_v8 = vld [vmem:[#allocation16 + $0x234] sm:$0xf0] }
 0x2c8   :  { %2950 = vmatpush.bf16.msrb.mxu0 %v4215_v26  ;;  %2928 = vmatpush.bf16.msra.mxu2 %v4595_v25  ;;  %v4054_v26 = vld [vmem:[#allocation16 + $0x298] sm:$0xf]  ;;  %v3960_v25 = vld [vmem:[#allocation16 + $0x1f8] sm:$0xf0]  ;;  %v3991_v62 = vor.u32 %v4885_v8, %v3990_v45 }
 0x2c9   :  { %v4055_v22 = vor.u32 %v4901_v12, %v4054_v26  ;;  %v3963_v36 = vor.u32 %v4873_v24, %v3960_v25  ;;  %v5045_v59 = vld [vmem:[#allocation16 + $0x734] sm:$0xf0]  ;;  %v2648_v26 = vadd.f32 %v5677_v52, %v5675_v29  ;;  %v4187_v12 = vor.u32 %v4929_v9, %v4184_v11  ;;  %v4841_v25 = vld [vmem:[#allocation16 + $0xdc] sm:$0xf] }
 0x2ca   :  { %2939 = vmatpush.bf16.msra.mxu3 %v3895_v20  ;;  %2917 = vmatpush.bf16.msra.mxu1 %v4275_v31  ;;  %v3734_v20 = vld [vmem:[#allocation16 + $0x18] sm:$0xf]  ;;  %v4833_v8 = vld [vmem:[#allocation16 + $0x9c] sm:$0xf] }
 0x2cb   :  { %v3735_v35 = vor.u32 %v4821_v21, %v3734_v20  ;;  %v4965_v63 = vld [vmem:[#allocation16 + $0x4b4] sm:$0xf0]  ;;  %v5065_v11 = vld [vmem:[#allocation16 + $0x7dc] sm:$0xf] }
 0x2cc   :  { %2951 = vmatpush.bf16.msrb.mxu0 %v4183_v23  ;;  %2929 = vmatpush.bf16.msra.mxu2 %v4563_v32  ;;  %v2636_v55 = vpop.f32.mrf.mxu3  ;;  %v2649_v18 = vpop.f32.mrf.mxu0  ;;  %v4374_v23 = vld [vmem:[#allocation16 + $0x518] sm:$0xf]  ;;  %v3928_v32 = vld [vmem:[#allocation16 + $0x1b8] sm:$0xf0] }
 0x2cd   :  { %v3931_v61 = vor.u32 %v4865_v44, %v3928_v32  ;;  %v5037_v15 = vld [vmem:[#allocation16 + $0x6f4] sm:$0xf0]  ;;  %v4921_v18 = vld [vmem:[#allocation16 + $0x35c] sm:$0xf] }
 0x2ce   :  { %2940 = vmatpush.bf16.msra.mxu3 %v3863_v37  ;;  %2918 = vmatpush.bf16.msra.mxu1 %v4243_v46  ;;  %v2660_v31 = vpop.f32.mrf.mxu1  ;;  %v4375_v37 = vor.u32 %v4981_v2, %v4374_v23  ;;  %v4663_v46 = vor.u32 %v5053_v41, %v4662_v39  ;;  %v4278_v16 = vld [vmem:[#allocation16 + $0x458] sm:$0xf]  ;;  %v4913_v41 = vld [vmem:[#allocation16 + $0x31c] sm:$0xf] }
 0x2cf   :  { %v5029_v23 = vld [vmem:[#allocation16 + $0x6b4] sm:$0xf0] }
 0x2d0   :  { %2952 = vmatpush.bf16.msrb.mxu0 %v4151_v0  ;;  %2930 = vmatpush.bf16.msra.mxu2 %v4531_v40  ;;  %v4023_v0 = vor.u32 %v4893_v28, %v4022_v47  ;;  %v4310_v40 = vld [vmem:[#allocation16 + $0x498] sm:$0xf] }
 0x2d1   :  { %2919 = vmatmul.bf16.vlgmr.msra.gmra.mxu1 %v5650_v60  ;;  %v4311_v13 = vor.u32 %v4965_v63, %v4310_v40  ;;  %v4246_v52 = vld [vmem:[#allocation16 + $0x418] sm:$0xf] }
 0x2d2   :  { %2941 = vmatpush.bf16.msra.mxu3 %v3831_v53  ;;  %2963 = vmatpush.bf16.msrb.mxu1 %v4471_v54  ;;  %v4949_v24 = vld [vmem:[#allocation16 + $0x434] sm:$0xf0] }
 0x2d3   :  { %v4247_v42 = vor.u32 %v4949_v24, %v4246_v52  ;;  %v4534_v43 = vld [vmem:[#allocation16 + $0x658] sm:$0xf]  ;;  %v3736_v52 = vld [vmem:[#allocation16 + $0x38] sm:$0xf0] }
 0x2d4   :  { %2953 = vmatpush.bf16.msrb.mxu0 %v4119_v58  ;;  %2931 = vmatpush.bf16.msra.mxu2 %v4499_v33  ;;  %v5681_v53 = vpop.f32.mrf.mxu3  ;;  %v5683_v54 = vpop.f32.mrf.mxu0  ;;  %v4630_v58 = vld [vmem:[#allocation16 + $0x718] sm:$0xf]  ;;  %v4977_v24 = vld [vmem:[#allocation16 + $0x51c] sm:$0xf] }
 0x2d5   :  { %v4957_v33 = vld [vmem:[#allocation16 + $0x474] sm:$0xf0] }
 0x2d6   :  { %2942 = vmatpush.bf16.msra.mxu3 %v3799_v4  ;;  %2964 = vmatpush.bf16.msrb.mxu1 %v4439_v7  ;;  %v2662_v4 = vpop.f32.mrf.mxu1  ;;  %v4631_v7 = vor.u32 %v5045_v59, %v4630_v58  ;;  %v4279_v21 = vor.u32 %v4957_v33, %v4278_v16  ;;  %v5021_v44 = vld [vmem:[#allocation16 + $0x674] sm:$0xf0]  ;;  %v4440_v58 = vld [vmem:[#allocation16 + $0x5b8] sm:$0xf0] }
 0x2d7   :  { %2932 = vmatmul.bf16.vlgmr.msra.gmra.mxu2 %v5656_v51  ;;  %v4535_v59 = vor.u32 %v5021_v44, %v4534_v43  ;;  %v5013_v50 = vld [vmem:[#allocation16 + $0x634] sm:$0xf0]  ;;  %v3768_v16 = vld [vmem:[#allocation16 + $0x78] sm:$0xf0] }
 0x2d8   :  { %2954 = vmatpush.bf16.msrb.mxu0 %v4087_v14  ;;  %2976 = vmatpush.bf16.msrb.mxu2 %v4727_v30  ;;  %v4598_v14 = vld [vmem:[#allocation16 + $0x6d8] sm:$0xf]  ;;  %v4849_v30 = vld [vmem:[#allocation16 + $0x11c] sm:$0xf] }
 0x2d9   :  { %v4599_v55 = vor.u32 %v5037_v15, %v4598_v14  ;;  %v3867_v29 = vor.u32 %v4849_v30, %v3864_v56  ;;  %v4825_v14 = vld [vmem:[#allocation16 + $0x5c] sm:$0xf] }
 0x2da   :  { %2943 = vmatpush.bf16.msra.mxu3 %v3767_v5  ;;  %2965 = vmatpush.bf16.msrb.mxu1 %v4407_v19  ;;  %v4152_v5 = vld [vmem:[#allocation16 + $0x378] sm:$0xf0]  ;;  %v2661_v19 = vadd.f32 %v2660_v31, %v2648_v26  ;;  %v2673_v2 = vpop.f32.mrf.mxu2 }
 0x2db   :  { %v4155_v28 = vor.u32 %v4921_v18, %v4152_v5  ;;  %v5001_v31 = vld [vmem:[#allocation16 + $0x5dc] sm:$0xf] }
 0x2dc   :  { %2955 = vmatpush.bf16.msrb.mxu0 %v4055_v22  ;;  %2977 = vmatpush.bf16.msrb.mxu2 %v4695_v34  ;;  %v2688_v6 = vpop.f32.mrf.mxu3  ;;  %v2701_v20 = vpop.f32.mrf.mxu0  ;;  %v4566_v22 = vld [vmem:[#allocation16 + $0x698] sm:$0xf]  ;;  %v5689_v47 = vadd.f32 %v2673_v2, %v2661_v19  ;;  %v3832_v34 = vld [vmem:[#allocation16 + $0xf8] sm:$0xf0]  ;;  %v3771_v19 = vor.u32 %v4825_v14, %v3768_v16 }
 0x2dd   :  { %v4567_v39 = vor.u32 %v5029_v23, %v4566_v22  ;;  %v3835_v32 = vor.u32 %v4841_v25, %v3832_v34  ;;  %v4985_v33 = vld [vmem:[#allocation16 + $0x55c] sm:$0xf]  ;;  %v2700_v23 = vadd.f32 %v5683_v54, %v5681_v53 }
 0x2de   :  { %2944 = vmatpush.bf16.msra.mxu3 %v3735_v35  ;;  %2966 = vmatpush.bf16.msrb.mxu1 %v4375_v37  ;;  %v4472_v35 = vld [vmem:[#allocation16 + $0x5f8] sm:$0xf0]  ;;  %v5691_v37 = vpop.f32.mrf.mxu1 }
 0x2df   :  { %v4475_v45 = vor.u32 %v5001_v31, %v4472_v35  ;;  %v4408_v26 = vld [vmem:[#allocation16 + $0x578] sm:$0xf0]  ;;  %v2713_v35 = vadd.f32 %v5691_v37, %v2700_v23 }
 0x2e0   :  { %2956 = vmatpush.bf16.msrb.mxu0 %v4023_v0  ;;  %2978 = vmatpush.bf16.msrb.mxu2 %v4663_v46  ;;  %v3043_v0 = vrot.slane %v5689_v47, 4  ;;  %v4897_v56 = vld [vmem:[#allocation16 + $0x29c] sm:$0xf]  ;;  %v4411_v6 = vor.u32 %v4985_v33, %v4408_v26 }
 0x2e1   :  { %2945 = vmatmul.bf16.vlgmr.msra.gmra.mxu3 %v5636_v27  ;;  %v5057_v20 = vld [vmem:[#allocation16 + $0x79c] sm:$0xf] }
 0x2e2   :  { %2989 = vmatpush.bf16.msrb.mxu3 %v3963_v36  ;;  %2967 = vmatpush.bf16.msrb.mxu1 %v4343_v57  ;;  %v4120_v36 = vld [vmem:[#allocation16 + $0x338] sm:$0xf0]  ;;  %v3044_v46 = vadd.f32 %v3043_v0, %v5689_v47  ;;  %v2675_v3 = vpop.f32.mrf.mxu2 }
 0x2e3   :  { %v4123_v17 = vor.u32 %v4913_v41, %v4120_v36  ;;  %v4993_v57 = vld [vmem:[#allocation16 + $0x59c] sm:$0xf] }
 0x2e4   :  { %2957 = vmatpush.bf16.msrb.mxu0 %v3991_v62  ;;  %2979 = vmatpush.bf16.msrb.mxu2 %v4631_v7  ;;  %v4088_v62 = vld [vmem:[#allocation16 + $0x2f8] sm:$0xf0]  ;;  %v3045_v40 = vrot.slane %v3044_v46, 2  ;;  %v5695_v63 = vpop.f32.mrf.mxu3  ;;  %v5697_v4 = vpop.f32.mrf.mxu0  ;;  %v3803_v7 = vor.u32 %v4833_v8, %v3800_v49  ;;  %v4443_v9 = vor.u32 %v4993_v57, %v4440_v58 }
 0x2e5   :  { %v4817_v22 = vld [vmem:[#allocation16 + $0x1c] sm:$0xf] }
 0x2e6   :  { %2990 = vmatpush.bf16.msrb.mxu3 %v3931_v61  ;;  %2968 = vmatpush.bf16.msrb.mxu1 %v4311_v13  ;;  %v4905_v61 = vld [vmem:[#allocation16 + $0x2dc] sm:$0xf]  ;;  %v3046_v15 = vadd.f32 %v3045_v40, %v3044_v46  ;;  %v3739_v54 = vor.u32 %v4817_v22, %v3736_v52 }
 0x2e7   :  { %2958 = vmatmul.bf16.vlgmr.msrb.gmra.mxu0 %v5642_v48  ;;  %v4728_v13 = vld [vmem:[#allocation16 + $0x7f8] sm:$0xf0] }
 0x2e8   :  { %3002 = vmatpush.bf16.msra.mxu0 %v4219_v1  ;;  %2980 = vmatpush.bf16.msrb.mxu2 %v4599_v55  ;;  %v4502_v1 = vld [vmem:[#allocation16 + $0x618] sm:$0xf]  ;;  %v4056_v55 = vld [vmem:[#allocation16 + $0x2b8] sm:$0xf0]  ;;  %v3047_v18 = vrot.slane %v3046_v15, 1  ;;  %v4731_v5 = vor.u32 %v5065_v11, %v4728_v13 }
 0x2e9   :  { %v4503_v30 = vor.u32 %v5013_v50, %v4502_v1  ;;  %v4376_v25 = vld [vmem:[#allocation16 + $0x538] sm:$0xf0] }
 0x2ea   :  { %2991 = vmatpush.bf16.msrb.mxu3 %v3899_v38  ;;  %2969 = vmatpush.bf16.msrb.mxu1 %v4279_v21  ;;  %v4091_v38 = vor.u32 %v4905_v61, %v4088_v62  ;;  %v4696_v21 = vld [vmem:[#allocation16 + $0x7b8] sm:$0xf0]  ;;  %v3048_v2 = vadd.f32 %v3047_v18, %v3046_v15  ;;  %v2725_v36 = vpop.f32.mrf.mxu2  ;;  %v4379_v0 = vor.u32 %v4977_v24, %v4376_v25 }
 0x2eb   :  { %v4024_v34 = vld [vmem:[#allocation16 + $0x278] sm:$0xf0]  ;;  %v4699_v41 = vor.u32 %v5057_v20, %v4696_v21  ;;  %v2752_v21 = vadd.f32 %v5697_v4, %v5695_v63 }
 0x2ec   :  { %3003 = vmatpush.bf16.msra.mxu0 %v4187_v12  ;;  %2981 = vmatpush.bf16.msrb.mxu2 %v4567_v39  ;;  %v2714_v12 = vpop.f32.mrf.mxu1  ;;  %v3091_v31 = vmul.f32 %v3048_v2, %v5534_v10  ;;  %v2740_v39 = vpop.f32.mrf.mxu3  ;;  %v4664_v43 = vld [vmem:[#allocation16 + $0x778] sm:$0xf0] }
 0x2ed   :  { %v2753_v53 = vpop.f32.mrf.mxu0  ;;  %v4344_v8 = vld [vmem:[#allocation16 + $0x4f8] sm:$0xf0] }
 0x2ee   :  { %2992 = vmatpush.bf16.msrb.mxu3 %v3867_v29  ;;  %2970 = vmatpush.bf16.msrb.mxu1 %v4247_v42  ;;  %v4059_v29 = vor.u32 %v4897_v56, %v4056_v55  ;;  %v5049_v42 = vld [vmem:[#allocation16 + $0x75c] sm:$0xf]  ;;  %v5705_v44 = vsub.f32 %v5689_v47, %v3091_v31 }
 0x2ef   :  { %v3992_v49 = vld [vmem:[#allocation16 + $0x238] sm:$0xf0] }
 0x2f0   :  { %3004 = vmatpush.bf16.msra.mxu0 %v4155_v28  ;;  %2982 = vmatpush.bf16.msrb.mxu2 %v4535_v59  ;;  %v4889_v28 = vld [vmem:[#allocation16 + $0x25c] sm:$0xf]  ;;  %v3107_v57 = vmul.f32 %v5705_v44, %v5705_v44  ;;  %v4667_v59 = vor.u32 %v5049_v42, %v4664_v43 }
 0x2f1   :  { %2971 = vmatmul.bf16.vlgmr.msrb.gmra.mxu1 %v5650_v60  ;;  %v4027_v37 = vor.u32 %v4889_v28, %v4024_v34  ;;  %v5041_v61 = vld [vmem:[#allocation16 + $0x71c] sm:$0xf] }
 0x2f2   :  { %2993 = vmatpush.bf16.msrb.mxu3 %v3835_v32  ;;  %3015 = vmatpush.bf16.msra.mxu1 %v4475_v45  ;;  %v5707_v32 = vadd.f32 %v2725_v36, %v2713_v35  ;;  %v4969_v45 = vld [vmem:[#allocation16 + $0x4dc] sm:$0xf]  ;;  %v3115_v40 = vrot.slane %v3107_v57, 4  ;;  %v2727_v14 = vpop.f32.mrf.mxu2 }
 0x2f3   :  { %v4347_v47 = vor.u32 %v4969_v45, %v4344_v8  ;;  %v4632_v62 = vld [vmem:[#allocation16 + $0x738] sm:$0xf0] }
 0x2f4   :  { %3005 = vmatpush.bf16.msra.mxu0 %v4123_v17  ;;  %2983 = vmatpush.bf16.msrb.mxu2 %v4503_v30  ;;  %v2764_v46 = vpop.f32.mrf.mxu1  ;;  %v4881_v17 = vld [vmem:[#allocation16 + $0x21c] sm:$0xf]  ;;  %v3049_v58 = vrot.slane %v5707_v32, 4  ;;  %v4635_v13 = vor.u32 %v5041_v61, %v4632_v62 }
 0x2f5   :  { %v3995_v50 = vor.u32 %v4881_v17, %v3992_v49  ;;  %v4961_v3 = vld [vmem:[#allocation16 + $0x49c] sm:$0xf]  ;;  %v2765_v24 = vadd.f32 %v2764_v46, %v2752_v21 }
 0x2f6   :  { %2994 = vmatpush.bf16.msrb.mxu3 %v3803_v7  ;;  %3016 = vmatpush.bf16.msra.mxu1 %v4443_v9  ;;  %v3050_v1 = vadd.f32 %v3049_v58, %v5707_v32  ;;  %v4312_v7 = vld [vmem:[#allocation16 + $0x4b8] sm:$0xf0]  ;;  %v3116_v9 = vadd.f32 %v3115_v40, %v3107_v57 }
 0x2f7   :  { %2984 = vmatmul.bf16.vlgmr.msrb.gmra.mxu2 %v5656_v51  ;;  %v4315_v15 = vor.u32 %v4961_v3, %v4312_v7  ;;  %v4600_v16 = vld [vmem:[#allocation16 + $0x6f8] sm:$0xf0] }
 0x2f8   :  { %3006 = vmatpush.bf16.msra.mxu0 %v4091_v38  ;;  %3028 = vmatpush.bf16.msra.mxu2 %v4731_v5  ;;  %v3051_v11 = vrot.slane %v3050_v1, 2  ;;  %v5033_v38 = vld [vmem:[#allocation16 + $0x6dc] sm:$0xf]  ;;  %v3117_v33 = vrot.slane %v3116_v9, 2 }
 0x2f9   :  { %v4953_v12 = vld [vmem:[#allocation16 + $0x45c] sm:$0xf]  ;;  %v4603_v5 = vor.u32 %v5033_v38, %v4600_v16 }
 0x2fa   :  { %2995 = vmatpush.bf16.msrb.mxu3 %v3771_v19  ;;  %3017 = vmatpush.bf16.msra.mxu1 %v4411_v6  ;;  %v3052_v26 = vadd.f32 %v3051_v11, %v3050_v1  ;;  %v4280_v30 = vld [vmem:[#allocation16 + $0x478] sm:$0xf0]  ;;  %v3118_v55 = vadd.f32 %v3117_v33, %v3116_v9  ;;  %v2777_v28 = vpop.f32.mrf.mxu2 }
 0x2fb   :  { %v5025_v19 = vld [vmem:[#allocation16 + $0x69c] sm:$0xf]  ;;  %v2778_v63 = vadd.f32 %v2777_v28, %v2765_v24 }
 0x2fc   :  { %3007 = vmatpush.bf16.msra.mxu0 %v4059_v29  ;;  %3029 = vmatpush.bf16.msra.mxu2 %v4699_v41  ;;  %v2766_v56 = vpop.f32.mrf.mxu1  ;;  %v3053_v18 = vrot.slane %v3052_v26, 1  ;;  %v4568_v6 = vld [vmem:[#allocation16 + $0x6b8] sm:$0xf0]  ;;  %v3119_v20 = vrot.slane %v3118_v55, 1 }
 0x2fd   :  { %v4945_v23 = vld [vmem:[#allocation16 + $0x41c] sm:$0xf]  ;;  %v4571_v25 = vor.u32 %v5025_v19, %v4568_v6  ;;  %v3055_v36 = vrot.slane %v2778_v63, 4 }
 0x2fe   :  { %2996 = vmatpush.bf16.msrb.mxu3 %v3739_v54  ;;  %3018 = vmatpush.bf16.msra.mxu1 %v4379_v0  ;;  %v3054_v22 = vadd.f32 %v3053_v18, %v3052_v26  ;;  %v4248_v2 = vld [vmem:[#allocation16 + $0x438] sm:$0xf0]  ;;  %v3120_v29 = vadd.f32 %v3119_v20, %v3118_v55 }
 0x2ff   :  { %v4251_v34 = vor.u32 %v4945_v23, %v4248_v2  ;;  %v4536_v31 = vld [vmem:[#allocation16 + $0x678] sm:$0xf0]  ;;  %v3056_v43 = vadd.f32 %v3055_v36, %v2778_v63 }
 0x300   :  { %3008 = vmatpush.bf16.msra.mxu0 %v4027_v37  ;;  %3030 = vmatpush.bf16.msra.mxu2 %v4667_v59  ;;  %v3092_v52 = vmul.f32 %v3054_v22, %v5534_v10  ;;  %v3163_v35 = vmul.f32 %v3120_v29, %v5534_v10  ;;  %v5009_v54 = vld [vmem:[#allocation16 + $0x61c] sm:$0xf] }
 0x301   :  { %2997 = vmatmul.bf16.vlgmr.msrb.gmra.mxu3 %v5636_v27  ;;  %v4283_v27 = vor.u32 %v4953_v12, %v4280_v30  ;;  %v4504_v0 = vld [vmem:[#allocation16 + $0x638] sm:$0xf0]  ;;  %v3057_v46 = vrot.slane %v3056_v43, 2  ;;  %v5739_v30 = vld [vmem:[#allocation17] sm:$0xff] }
 0x302   :  { %3019 = vmatpush.bf16.msra.mxu1 %v4347_v47  ;;  %v5721_v39 = vsub.f32 %v5707_v32, %v3092_v52  ;;  %v3171_v4 = vadd.f32 1e-05, %v3163_v35  ;;  %v4507_v32 = vor.u32 %v5009_v54, %v4504_v0  ;;  %v2779_v17 = vpop.f32.mrf.mxu2  ;;  %v3301_v19 = vperm.slane %v5739_v30, 0 }
 0x303   :  { %v3058_v57 = vadd.f32 %v3057_v46, %v3056_v43 }
 0x304   :  { %3009 = vmatpush.bf16.msra.mxu0 %v3995_v50  ;;  %3031 = vmatpush.bf16.msra.mxu2 %v4635_v13  ;;  %v3108_v41 = vmul.f32 %v5721_v39, %v5721_v39  ;;  %5105 = vrsqrt.f32 %v3171_v4  ;;  %v2790_v37 = vpop.f32.mrf.mxu3  ;;  %v2803_v45 = vpop.f32.mrf.mxu0  ;;  %vm3185_vm12 = vweird.f32 %v3171_v4 }
 0x305   :  { %v3059_v47 = vrot.slane %v3058_v57, 1  ;;  %v2804_v20 = vadd.f32 %v2803_v45, %v2790_v37 }
 0x306   :  { %3020 = vmatpush.bf16.msra.mxu1 %v4315_v15  ;;  %v3121_v42 = vrot.slane %v3108_v41, 4 }
 0x307   :  { %3010 = vmatmul.bf16.vlgmr.msra.gmra.mxu0 %v5642_v48  ;;  %v5017_v48 = vld [vmem:[#allocation16 + $0x65c] sm:$0xf]  ;;  %v3060_v40 = vadd.f32 %v3059_v47, %v3058_v57  ;;  %v3302_v57 = vperm.slane %v5739_v30, 1 }
 0x308   :  { %3032 = vmatpush.bf16.msra.mxu2 %v4603_v5  ;;  %v4539_v53 = vor.u32 %v5017_v48, %v4536_v31  ;;  %v3122_v8 = vadd.f32 %v3121_v42, %v3108_v41 }
 0x309   :  { %v3093_v9 = vmul.f32 %v3060_v40, %v5534_v10 }
 0x30a   :  { %3021 = vmatpush.bf16.msra.mxu1 %v4283_v27  ;;  %v3123_v49 = vrot.slane %v3122_v8, 2  ;;  %v5106_v58 = vpop.eup %5105 }
 0x30b   :  { %v3180_v61 = vmul.f32 %v5106_v58, %v3171_v4  ;;  %v5734_v15 = vsub.f32 %v2778_v63, %v3093_v9  ;;  %vm3186_vm11 = vweird.f32 %v5106_v58 }
 0x30c   :  { %3033 = vmatpush.bf16.msra.mxu2 %v4571_v25  ;;  %v3124_v59 = vadd.f32 %v3123_v49, %v3122_v8  ;;  %v2792_v1 = vpop.f32.mrf.mxu3  ;;  %v2805_v50 = vpop.f32.mrf.mxu0  ;;  %vm3187_vm13 = vmor %vm3185_vm12, %vm3186_vm11 }
 0x30d   :  { %v3181_v3 = vmul.f32 %v5106_v58, %v3180_v61 }
 0x30e   :  { %3022 = vmatpush.bf16.msra.mxu1 %v4251_v34  ;;  %v3125_v62 = vrot.slane %v3124_v59, 1  ;;  %v2816_v13 = vpop.f32.mrf.mxu1 }
 0x30f   :  { %v3182_v11 = vmul.f32 0.5, %v3181_v3  ;;  %v2817_v29 = vadd.f32 %v2816_v13, %v2804_v20 }
 0x310   :  { %3034 = vmatpush.bf16.msra.mxu2 %v4539_v53  ;;  %v3126_v7 = vadd.f32 %v3125_v62, %v3124_v59 }
 0x311   :  { %3023 = vmatmul.bf16.vlgmr.msra.gmra.mxu1 %v5650_v60  ;;  %v5731_v60 = vld [vmem:[%s5798_s10] sm:$0xff]  ;;  %v3183_v38 = vsub.f32 1.5, %v3182_v11  ;;  %s5418_s10 = smov [#allocation19]  }
 0x312   :  { %v3164_v14 = vmul.f32 %v3126_v7, %v5534_v10  ;;  %v3260_v16 = vperm.slane %v5731_v60, 0  ;;  %v3261_v54 = vperm.slane %v5731_v60, 1  ;;  %s3362_s14 = sshll.u32 %s5418_s10, 4  ;;  %s3363_s14 = int_to_ptr.vmem [resolvable:$true] %s3362_s14 }
 0x313   :  { %v3184_v26 = vmul.f32 %v5106_v58, %v3183_v38 }
 0x314   :  { %3035 = vmatpush.bf16.msra.mxu2 %v4507_v32  ;;  %v3172_v33 = vadd.f32 1e-05, %v3164_v14 }
 0x315   :  { %v3188_v56 = vsel %vm3187_vm13, %v5106_v58, %v3184_v26 }
 0x316   :  { %5107 = vrsqrt.f32 %v3172_v33  ;;  %v3276_v55 = vmul.f32 %v3260_v16, %v3188_v56  ;;  %v2818_v5 = vpop.f32.mrf.mxu1  ;;  %vm3195_vm0 = vweird.f32 %v3172_v33 }
 0x317   :  { %3036 = vmatmul.bf16.vlgmr.msra.gmra.mxu2 %v5656_v51  ;;  %v3109_v51 = vmul.f32 %v5734_v15, %v5734_v15 }
 0x318   :  { %v3284_v27 = vperm.slane %v3276_v55, 0 }
 0x319   :  { %v3127_v12 = vrot.slane %v3109_v51, 4 }
 0x31a   :  { %v3292_v22 = vmul.f32 %v3284_v27, %v5705_v44  ;;  %v2829_v25 = vpop.f32.mrf.mxu2 }
 0x31b   :  { %v3128_v18 = vadd.f32 %v3127_v12, %v3109_v51  ;;  %v2830_v34 = vadd.f32 %v2829_v25, %v2817_v29 }
 0x31c   :  { %v5108_v21 = vpop.eup %5107  ;;  %v3317_v52 = vadd.f32 %v3301_v19, %v3292_v22 }
 0x31d   :  { %v3129_v6 = vrot.slane %v3128_v18, 2  ;;  %v3190_v2 = vmul.f32 %v5108_v21, %v3172_v33  ;;  %v3061_v63 = vrot.slane %v2830_v34, 4  ;;  %vm3196_vm15 = vweird.f32 %v5108_v21 }
 0x31e   :  { %vm3325_vm14 = vcmp.gt.f32.partialorder %v3317_v52, 0.0  ;;  %v3333_v48 = vmul.f32 0.2, %v3317_v52  ;;  %vm3197_vm1 = vmor %vm3195_vm0, %vm3196_vm15  ;;  %v3262_v33 = vperm.slane %v5731_v60, 2 }
 0x31f   :  { %v3130_v23 = vadd.f32 %v3129_v6, %v3128_v18  ;;  %v3191_v28 = vmul.f32 %v5108_v21, %v3190_v2  ;;  %v3062_v44 = vadd.f32 %v3061_v63, %v2830_v34  ;;  %v3303_v6 = vperm.slane %v5739_v30, 2 }
 0x320   :  { %v3341_v4 = vsel %vm3325_vm14, %v3317_v52, %v3333_v48 }
 0x321   :  { %v3131_v24 = vrot.slane %v3130_v23, 1  ;;  %v3192_v35 = vmul.f32 0.5, %v3191_v28  ;;  %3349 = vst [vmem:[#allocation19] sm:$0xff] %v3341_v4  ;;  %v3063_v37 = vrot.slane %v3062_v44, 2 }
 0x322   :  { %v2831_v45 = vpop.f32.mrf.mxu2 }
 0x323   :  { %v3132_v31 = vadd.f32 %v3131_v24, %v3130_v23  ;;  %v3193_v36 = vsub.f32 1.5, %v3192_v35  ;;  %v3064_v46 = vadd.f32 %v3063_v37, %v3062_v44 }
 0x324   :  { %v2855_v53 = vpop.f32.mrf.mxu0  ;;  %v2842_v42 = vpop.f32.mrf.mxu3 }
 0x325   :  { %v3165_v41 = vmul.f32 %v3132_v31, %v5534_v10  ;;  %v3194_v43 = vmul.f32 %v5108_v21, %v3193_v36  ;;  %v3065_v17 = vrot.slane %v3064_v46, 1  ;;  %v2856_v5 = vadd.f32 %v2855_v53, %v2842_v42 }
 0x327   :  { %v3173_v0 = vadd.f32 1e-05, %v3165_v41  ;;  %v3198_v8 = vsel %vm3197_vm1, %v5108_v21, %v3194_v43  ;;  %v3066_v58 = vadd.f32 %v3065_v17, %v3064_v46 }
 0x328   :  { %v3277_v32 = vmul.f32 %v3261_v54, %v3198_v8 }
 0x329   :  { %5109 = vrsqrt.f32 %v3173_v0  ;;  %v3094_v1 = vmul.f32 %v3066_v58, %v5534_v10  ;;  %vm3205_vm4 = vweird.f32 %v3173_v0 }
 0x32a   :  { %v3285_v49 = vperm.slane %v3277_v32, 0 }
 0x32b   :  { %v5748_v9 = vsub.f32 %v2830_v34, %v3094_v1 }
 0x32c   :  { %v2857_v59 = vpop.f32.mrf.mxu0  ;;  %v3293_v61 = vmul.f32 %v3285_v49, %v5721_v39  ;;  %v2844_v62 = vpop.f32.mrf.mxu3 }
 0x32d   :  { %v3110_v14 = vmul.f32 %v5748_v9, %v5748_v9 }
 0x32e   :  { %v3318_v50 = vadd.f32 %v3302_v57, %v3293_v61  ;;  %v2868_v3 = vpop.f32.mrf.mxu1  ;;  %v3263_v57 = vperm.slane %v5731_v60, 3 }
 0x32f   :  { %v5110_v47 = vpop.eup %5109  ;;  %v3133_v39 = vrot.slane %v3110_v14, 4  ;;  %v2869_v20 = vadd.f32 %v2868_v3, %v2856_v5 }
 0x330   :  { %v3200_v40 = vmul.f32 %v5110_v47, %v3173_v0  ;;  %vm3326_vm2 = vcmp.gt.f32.partialorder %v3318_v50, 0.0  ;;  %v3334_v11 = vmul.f32 0.2, %v3318_v50  ;;  %vm3206_vm3 = vweird.f32 %v5110_v47 }
 0x331   :  { %v3134_v26 = vadd.f32 %v3133_v39, %v3110_v14  ;;  %vm3207_vm5 = vmor %vm3205_vm4, %vm3206_vm3 }
 0x332   :  { %v3201_v7 = vmul.f32 %v5110_v47, %v3200_v40  ;;  %v3342_v38 = vsel %vm3326_vm2, %v3318_v50, %v3334_v11 }
 0x333   :  { %3350 = vst [vmem:[#allocation19 + $0x8] sm:$0xff] %v3342_v38  ;;  %v3135_v55 = vrot.slane %v3134_v26, 2 }
 0x334   :  { %v3202_v13 = vmul.f32 0.5, %v3201_v7  ;;  %v3304_v7 = vperm.slane %v5739_v30, 3 }
 0x335   :  { %v3136_v27 = vadd.f32 %v3135_v55, %v3134_v26 }
 0x336   :  { %v3203_v16 = vsub.f32 1.5, %v3202_v13  ;;  %v2870_v12 = vpop.f32.mrf.mxu1 }
 0x337   :  { %v3137_v21 = vrot.slane %v3136_v27, 1 }
 0x338   :  { %v3204_v51 = vmul.f32 %v5110_v47, %v3203_v16 }
 0x339   :  { %v3138_v29 = vadd.f32 %v3137_v21, %v3136_v27 }
 0x33a   :  { %v3208_v56 = vsel %vm3207_vm5, %v5110_v47, %v3204_v51  ;;  %v2881_v22 = vpop.f32.mrf.mxu2 }
 0x33b   :  { %v3278_v18 = vmul.f32 %v3262_v33, %v3208_v56  ;;  %v2882_v2 = vadd.f32 %v2881_v22, %v2869_v20  ;;  %v3166_v25 = vmul.f32 %v3138_v29, %v5534_v10 }
 0x33d   :  { %v3286_v19 = vperm.slane %v3278_v18, 0  ;;  %v3067_v24 = vrot.slane %v2882_v2, 4  ;;  %v3174_v31 = vadd.f32 1e-05, %v3166_v25 }
 0x33f   :  { %v3294_v23 = vmul.f32 %v3286_v19, %v5734_v15  ;;  %v3068_v34 = vadd.f32 %v3067_v24, %v2882_v2  ;;  %5111 = vrsqrt.f32 %v3174_v31  ;;  %vm3215_vm8 = vweird.f32 %v3174_v31 }
 0x341   :  { %v3319_v52 = vadd.f32 %v3303_v6, %v3294_v23  ;;  %v3069_v4 = vrot.slane %v3068_v34, 2 }
 0x342   :  { %v2883_v41 = vpop.f32.mrf.mxu2 }
 0x343   :  { %vm3327_vm6 = vcmp.gt.f32.partialorder %v3319_v52, 0.0  ;;  %v3335_v28 = vmul.f32 0.2, %v3319_v52  ;;  %v3070_v36 = vadd.f32 %v3069_v4, %v3068_v34 }
 0x344   :  { %v2907_v48 = vpop.f32.mrf.mxu0  ;;  %v2894_v35 = vpop.f32.mrf.mxu3 }
 0x345   :  { %v3343_v63 = vsel %vm3327_vm6, %v3319_v52, %v3335_v28  ;;  %v3071_v44 = vrot.slane %v3070_v36, 1  ;;  %v5112_v54 = vpop.eup %5111  ;;  %v2908_v1 = vadd.f32 %v2907_v48, %v2894_v35 }
 0x346   :  { %3351 = vst [vmem:[#allocation19 + $0x10] sm:$0xff] %v3343_v63  ;;  %v3210_v42 = vmul.f32 %v5112_v54, %v3174_v31  ;;  %vm3216_vm7 = vweird.f32 %v5112_v54  ;;  %v3264_v63 = vperm.slane %v5731_v60, 4 }
 0x347   :  { %v3072_v15 = vadd.f32 %v3071_v44, %v3070_v36  ;;  %vm3217_vm9 = vmor %vm3215_vm8, %vm3216_vm7 }
 0x348   :  { %v3211_v45 = vmul.f32 %v5112_v54, %v3210_v42 }
 0x349   :  { %v3095_v43 = vmul.f32 %v3072_v15, %v5534_v10 }
 0x34a   :  { %v3212_v46 = vmul.f32 0.5, %v3211_v45 }
 0x34b   :  { %v5757_v8 = vsub.f32 %v2882_v2, %v3095_v43  ;;  %v3305_v43 = vperm.slane %v5739_v30, 4 }
 0x34c   :  { %v2909_v53 = vpop.f32.mrf.mxu0  ;;  %v2896_v0 = vpop.f32.mrf.mxu3  ;;  %v3213_v17 = vsub.f32 1.5, %v3212_v46 }
 0x34d   :  { %v3111_v32 = vmul.f32 %v5757_v8, %v5757_v8 }
 0x34e   :  { %v2920_v37 = vpop.f32.mrf.mxu1  ;;  %v3214_v58 = vmul.f32 %v5112_v54, %v3213_v17 }
 0x34f   :  { %v3139_v49 = vrot.slane %v3111_v32, 4  ;;  %v2921_v11 = vadd.f32 %v2920_v37, %v2908_v1 }
 0x350   :  { %v3218_v61 = vsel %vm3217_vm9, %v5112_v54, %v3214_v58 }
 0x351   :  { %v3140_v59 = vadd.f32 %v3139_v49, %v3111_v32  ;;  %v3279_v40 = vmul.f32 %v3263_v57, %v3218_v61 }
 0x353   :  { %v3141_v62 = vrot.slane %v3140_v59, 2  ;;  %v3287_v3 = vperm.slane %v3279_v40, 0 }
 0x355   :  { %v3142_v50 = vadd.f32 %v3141_v62, %v3140_v59  ;;  %v3295_v38 = vmul.f32 %v3287_v3, %v5748_v9 }
 0x356   :  { %v2922_v47 = vpop.f32.mrf.mxu1 }
 0x357   :  { %v3143_v13 = vrot.slane %v3142_v50, 1  ;;  %v3320_v33 = vadd.f32 %v3304_v7, %v3295_v38 }
 0x359   :  { %v3144_v39 = vadd.f32 %v3143_v13, %v3142_v50  ;;  %vm3328_vm10 = vcmp.gt.f32.partialorder %v3320_v33, 0.0  ;;  %v3336_v12 = vmul.f32 0.2, %v3320_v33 }
 0x35a   :  { %v2933_v14 = vpop.f32.mrf.mxu2 }
 0x35b   :  { %v2934_v16 = vadd.f32 %v2933_v14, %v2921_v11  ;;  %v3167_v26 = vmul.f32 %v3144_v39, %v5534_v10  ;;  %v3344_v27 = vsel %vm3328_vm10, %v3320_v33, %v3336_v12 }
 0x35c   :  { %3352 = vst [vmem:[#allocation19 + $0x18] sm:$0xff] %v3344_v27  ;;  %v3265_v27 = vperm.slane %v5731_v60, 5 }
 0x35d   :  { %v3073_v51 = vrot.slane %v2934_v16, 4  ;;  %v3175_v18 = vadd.f32 1e-05, %v3167_v26 }
 0x35f   :  { %v3074_v56 = vadd.f32 %v3073_v51, %v2934_v16  ;;  %5113 = vrsqrt.f32 %v3175_v18  ;;  %vm3225_vm12 = vweird.f32 %v3175_v18 }
 0x361   :  { %v3075_v19 = vrot.slane %v3074_v56, 2 }
 0x362   :  { %v2935_v6 = vpop.f32.mrf.mxu2 }
 0x363   :  { %v3076_v20 = vadd.f32 %v3075_v19, %v3074_v56 }
 0x364   :  { %v2959_v55 = vpop.f32.mrf.mxu0  ;;  %v2946_v5 = vpop.f32.mrf.mxu3 }
 0x365   :  { %v3077_v21 = vrot.slane %v3076_v20, 1  ;;  %v5114_v23 = vpop.eup %5113  ;;  %v2960_v54 = vadd.f32 %v2959_v55, %v2946_v5 }
 0x366   :  { %v3220_v29 = vmul.f32 %v5114_v23, %v3175_v18  ;;  %vm3226_vm11 = vweird.f32 %v5114_v23 }
 0x367   :  { %v3078_v9 = vadd.f32 %v3077_v21, %v3076_v20  ;;  %vm3227_vm13 = vmor %vm3225_vm12, %vm3226_vm11 }
 0x368   :  { %v3221_v25 = vmul.f32 %v5114_v23, %v3220_v29 }
 0x369   :  { %v3096_v52 = vmul.f32 %v3078_v9, %v5534_v10 }
 0x36a   :  { %v3222_v34 = vmul.f32 0.5, %v3221_v25 }
 0x36b   :  { %v5766_v28 = vsub.f32 %v2934_v16, %v3096_v52  ;;  %v3306_v52 = vperm.slane %v5739_v30, 5 }
 0x36c   :  { %v2961_v22 = vpop.f32.mrf.mxu0  ;;  %v2948_v2 = vpop.f32.mrf.mxu3  ;;  %v3223_v31 = vsub.f32 1.5, %v3222_v34 }
 0x36d   :  { %v3112_v48 = vmul.f32 %v5766_v28, %v5766_v28 }
 0x36e   :  { %v2972_v24 = vpop.f32.mrf.mxu1  ;;  %v3224_v4 = vmul.f32 %v5114_v23, %v3223_v31 }
 0x36f   :  { %v3145_v35 = vrot.slane %v3112_v48, 4  ;;  %v2973_v37 = vadd.f32 %v2972_v24, %v2960_v54 }
 0x370   :  { %v3228_v44 = vsel %vm3227_vm13, %v5114_v23, %v3224_v4 }
 0x371   :  { %v3146_v41 = vadd.f32 %v3145_v35, %v3112_v48  ;;  %v3280_v53 = vmul.f32 %v3264_v63, %v3228_v44 }
 0x373   :  { %v3147_v15 = vrot.slane %v3146_v41, 2  ;;  %v3288_v42 = vperm.slane %v3280_v53, 0 }
 0x375   :  { %v3148_v0 = vadd.f32 %v3147_v15, %v3146_v41  ;;  %v3296_v32 = vmul.f32 %v3288_v42, %v5757_v8 }
 0x376   :  { %v2974_v36 = vpop.f32.mrf.mxu1 }
 0x377   :  { %v3149_v45 = vrot.slane %v3148_v0, 1  ;;  %v3321_v57 = vadd.f32 %v3305_v43, %v3296_v32 }
 0x379   :  { %v3150_v49 = vadd.f32 %v3149_v45, %v3148_v0  ;;  %vm3329_vm14 = vcmp.gt.f32.partialorder %v3321_v57, 0.0  ;;  %v3337_v47 = vmul.f32 0.2, %v3321_v57 }
 0x37a   :  { %v2985_v46 = vpop.f32.mrf.mxu2 }
 0x37b   :  { %v2986_v17 = vadd.f32 %v2985_v46, %v2973_v37  ;;  %v3168_v59 = vmul.f32 %v3150_v49, %v5534_v10  ;;  %v3345_v50 = vsel %vm3329_vm14, %v3321_v57, %v3337_v47  ;;  %v3266_v47 = vperm.slane %v5731_v60, 6 }
 0x37c   :  { %3353 = vst [vmem:[#allocation19 + $0x20] sm:$0xff] %v3345_v50 }
 0x37d   :  { %v3079_v58 = vrot.slane %v2986_v17, 4  ;;  %v3176_v40 = vadd.f32 1e-05, %v3168_v59 }
 0x37f   :  { %v3080_v61 = vadd.f32 %v3079_v58, %v2986_v17  ;;  %5115 = vrsqrt.f32 %v3176_v40  ;;  %vm3235_vm0 = vweird.f32 %v3176_v40 }
 0x381   :  { %v3081_v3 = vrot.slane %v3080_v61, 2 }
 0x382   :  { %v2987_v7 = vpop.f32.mrf.mxu2 }
 0x383   :  { %v3082_v11 = vadd.f32 %v3081_v3, %v3080_v61 }
 0x384   :  { %v3011_v62 = vpop.f32.mrf.mxu0  ;;  %v2998_v1 = vpop.f32.mrf.mxu3 }
 0x385   :  { %v3083_v13 = vrot.slane %v3082_v11, 1  ;;  %v5116_v38 = vpop.eup %5115  ;;  %v3012_v23 = vadd.f32 %v3011_v62, %v2998_v1 }
 0x386   :  { %v3230_v39 = vmul.f32 %v5116_v38, %v3176_v40  ;;  %vm3236_vm15 = vweird.f32 %v5116_v38 }
 0x387   :  { %v3084_v8 = vadd.f32 %v3083_v13, %v3082_v11  ;;  %vm3237_vm1 = vmor %vm3235_vm0, %vm3236_vm15  ;;  %v3307_v11 = vperm.slane %v5739_v30, 6 }
 0x388   :  { %v3231_v26 = vmul.f32 %v5116_v38, %v3230_v39 }
 0x389   :  { %v3097_v33 = vmul.f32 %v3084_v8, %v5534_v10 }
 0x38a   :  { %v3232_v56 = vmul.f32 0.5, %v3231_v26 }
 0x38b   :  { %v3105_v12 = vsub.f32 %v2986_v17, %v3097_v33 }
 0x38c   :  { %v3013_v14 = vpop.f32.mrf.mxu0  ;;  %v3000_v16 = vpop.f32.mrf.mxu3  ;;  %v3233_v18 = vsub.f32 1.5, %v3232_v56 }
 0x38d   :  { %v3113_v55 = vmul.f32 %v3105_v12, %v3105_v12 }
 0x38e   :  { %v3024_v51 = vpop.f32.mrf.mxu1  ;;  %v3234_v19 = vmul.f32 %v5116_v38, %v3233_v18 }
 0x38f   :  { %v3151_v5 = vrot.slane %v3113_v55, 4  ;;  %v3025_v24 = vadd.f32 %v3024_v51, %v3012_v23 }
 0x390   :  { %v3238_v21 = vsel %vm3237_vm1, %v5116_v38, %v3234_v19 }
 0x391   :  { %v3152_v6 = vadd.f32 %v3151_v5, %v3113_v55  ;;  %v3281_v22 = vmul.f32 %v3265_v27, %v3238_v21  ;;  %v3267_v27 = vperm.slane %v5731_v60, 7 }
 0x393   :  { %v3153_v9 = vrot.slane %v3152_v6, 2  ;;  %v3289_v29 = vperm.slane %v3281_v22, 0 }
 0x395   :  { %v3154_v2 = vadd.f32 %v3153_v9, %v3152_v6  ;;  %v3297_v48 = vmul.f32 %v3289_v29, %v5766_v28 }
 0x396   :  { %v3026_v20 = vpop.f32.mrf.mxu1 }
 0x397   :  { %v3155_v25 = vrot.slane %v3154_v2, 1  ;;  %v3322_v63 = vadd.f32 %v3306_v52, %v3297_v48  ;;  %v3308_v20 = vperm.slane %v5739_v30, 7 }
 0x399   :  { %v3156_v35 = vadd.f32 %v3155_v25, %v3154_v2  ;;  %vm3330_vm2 = vcmp.gt.f32.partialorder %v3322_v63, 0.0  ;;  %v3338_v36 = vmul.f32 0.2, %v3322_v63 }
 0x39a   :  { %v3037_v34 = vpop.f32.mrf.mxu2 }
 0x39b   :  { %v3038_v31 = vadd.f32 %v3037_v34, %v3025_v24  ;;  %v3169_v41 = vmul.f32 %v3156_v35, %v5534_v10  ;;  %v3346_v53 = vsel %vm3330_vm2, %v3322_v63, %v3338_v36 }
 0x39c   :  { %3354 = vst [vmem:[#allocation19 + $0x28] sm:$0xff] %v3346_v53 }
 0x39d   :  { %v3085_v4 = vrot.slane %v3038_v31, 4  ;;  %v3177_v15 = vadd.f32 1e-05, %v3169_v41 }
 0x39f   :  { %v3086_v44 = vadd.f32 %v3085_v4, %v3038_v31  ;;  %5117 = vrsqrt.f32 %v3177_v15  ;;  %vm3245_vm4 = vweird.f32 %v3177_v15 }
 0x3a1   :  { %v3087_v54 = vrot.slane %v3086_v44, 2 }
 0x3a2   :  { %v3039_v0 = vpop.f32.mrf.mxu2 }
 0x3a3   :  { %v3088_v42 = vadd.f32 %v3087_v54, %v3086_v44 }
 0x3a5   :  { %v3089_v43 = vrot.slane %v3088_v42, 1  ;;  %v5118_v45 = vpop.eup %5117 }
 0x3a6   :  { %v3240_v28 = vmul.f32 %v5118_v45, %v3177_v15  ;;  %vm3246_vm3 = vweird.f32 %v5118_v45 }
 0x3a7   :  { %v3090_v37 = vadd.f32 %v3089_v43, %v3088_v42  ;;  %vm3247_vm5 = vmor %vm3245_vm4, %vm3246_vm3 }
 0x3a8   :  { %v3241_v32 = vmul.f32 %v5118_v45, %v3240_v28 }
 0x3a9   :  { %v3098_v46 = vmul.f32 %v3090_v37, %v5534_v10 }
 0x3aa   :  { %v3242_v49 = vmul.f32 0.5, %v3241_v32 }
 0x3ab   :  { %v3106_v17 = vsub.f32 %v3038_v31, %v3098_v46 }
 0x3ac   :  { %v3243_v58 = vsub.f32 1.5, %v3242_v49 }
 0x3ad   :  { %v3114_v57 = vmul.f32 %v3106_v17, %v3106_v17 }
 0x3ae   :  { %v3244_v61 = vmul.f32 %v5118_v45, %v3243_v58 }
 0x3af   :  { %v3157_v59 = vrot.slane %v3114_v57, 4 }
 0x3b0   :  { %v3248_v40 = vsel %vm3247_vm5, %v5118_v45, %v3244_v61 }
 0x3b1   :  { %v3158_v62 = vadd.f32 %v3157_v59, %v3114_v57  ;;  %v3282_v50 = vmul.f32 %v3266_v47, %v3248_v40 }
 0x3b3   :  { %v3159_v1 = vrot.slane %v3158_v62, 2  ;;  %v3290_v7 = vperm.slane %v3282_v50, 0 }
 0x3b5   :  { %v3160_v3 = vadd.f32 %v3159_v1, %v3158_v62  ;;  %v3298_v8 = vmul.f32 %v3290_v7, %v3105_v12 }
 0x3b7   :  { %v3161_v13 = vrot.slane %v3160_v3, 1  ;;  %v3323_v38 = vadd.f32 %v3307_v11, %v3298_v8 }
 0x3b9   :  { %v3162_v14 = vadd.f32 %v3161_v13, %v3160_v3  ;;  %vm3331_vm6 = vcmp.gt.f32.partialorder %v3323_v38, 0.0  ;;  %v3339_v39 = vmul.f32 0.2, %v3323_v38 }
 0x3bb   :  { %v3170_v16 = vmul.f32 %v3162_v14, %v5534_v10  ;;  %v3347_v51 = vsel %vm3331_vm6, %v3323_v38, %v3339_v39 }
 0x3bc   :  { %3355 = vst [vmem:[#allocation19 + $0x30] sm:$0xff] %v3347_v51 }
 0x3bd   :  { %v3178_v33 = vadd.f32 1e-05, %v3170_v16 }
 0x3bf   :  { %5119 = vrsqrt.f32 %v3178_v33  ;;  %vm3255_vm8 = vweird.f32 %v3178_v33 }
 0x3c5   :  { %v5120_v26 = vpop.eup %5119 }
 0x3c6   :  { %v3250_v56 = vmul.f32 %v5120_v26, %v3178_v33  ;;  %vm3256_vm7 = vweird.f32 %v5120_v26 }
 0x3c7   :  { %vm3257_vm9 = vmor %vm3255_vm8, %vm3256_vm7 }
 0x3c8   :  { %v3251_v55 = vmul.f32 %v5120_v26, %v3250_v56 }
 0x3ca   :  { %v3252_v18 = vmul.f32 0.5, %v3251_v55 }
 0x3cc   :  { %v3253_v5 = vsub.f32 1.5, %v3252_v18 }
 0x3ce   :  { %v3254_v19 = vmul.f32 %v5120_v26, %v3253_v5 }
 0x3d0   :  { %v3258_v12 = vsel %vm3257_vm9, %v5120_v26, %v3254_v19 }
 0x3d1   :  { %v3283_v6 = vmul.f32 %v3267_v27, %v3258_v12 }
 0x3d3   :  { %v3291_v10 = vperm.slane %v3283_v6, 0 }
 0x3d5   :  { %v3299_v21 = vmul.f32 %v3291_v10, %v3106_v17 }
 0x3d7   :  { %v3324_v9 = vadd.f32 %v3308_v20, %v3299_v21 }
 0x3d9   :  { %vm3332_vm10 = vcmp.gt.f32.partialorder %v3324_v9, 0.0  ;;  %v3340_v22 = vmul.f32 0.2, %v3324_v9 }
 0x3db   :  { %v3348_v60 = vsel %vm3332_vm10, %v3324_v9, %v3340_v22 }
 0x3dc   :  { %3356 = vst [vmem:[#allocation19 + $0x38] sm:$0xff] %v3348_v60 }
 0x3dd   :  { %3367 = dma.vmem_to_hbm [thread:$0]  %s3363_s14, 1024, %s3365_s17, [#allocation4]  }
 0x3de   :  { %5397 = dma.done.wait [#allocation4], 1024  }
 0x3df   :  { %5398 = vsyncadd [#allocation4], 4294966272 }
 0x3e0   :  { %3372 = vsyncpa [#allocation3], 1 }
 0x3e1   :  { %3373 = vsyncpa [#allocation6], 1 }
 0x3e2   :  { %3374 = vsyncpa [#allocation9], 1 }
 0x3e3   :  { %3375 = vsyncpa [#allocation12], 1 }
 0x3e4   :  { %3376 = vsyncpa [#allocation15], 1 }
 0x3e5   :  { %3377 = vsyncpa [#allocation18], 1 }
 0x3e6   :  { %3378 = vsyncpa [#allocation4], 1 }

</bundles_post_ra>
